<compile_context>
chip_gen: v6e
topology: v6e:2x2x1
jax: 0.10.0
libtpu: 0.0.40
codegen_flags: <defaults>
</compile_context>

<pallas_src>
import functools
import numpy as np
import jax
import jax.numpy as jnp
from jax import lax
from jax.experimental import pallas as pl
from jax.experimental.pallas import tpu as pltpu

EPS = 1e-4
MP_SILU_SCALE = 1.0 / 0.596


# ------------------------------ weight prep (XLA) ------------------------------

def _normalize_prep(w, gain=1.0):
    """MPConv weight prep: normalize(w) * gain / sqrt(fan_in)."""
    w = w.astype(jnp.float32)
    axes = tuple(range(1, w.ndim))
    fan_in = float(np.prod(w.shape[1:]))
    norm = jnp.sqrt(jnp.sum(jnp.square(w), axis=axes, keepdims=True))
    return w / (EPS + norm / np.sqrt(fan_in)) * (gain / np.sqrt(fan_in))


def _pad_cols(a, c_pad):
    return jnp.pad(a, ((0, 0),) * (a.ndim - 1) + ((0, c_pad - a.shape[-1]),))


def _conv3x3_w9(w, c_pad):
    """(Cout, Cin, 3, 3) prepped weight -> im2col layout (9*c_pad, c_pad), bf16."""
    cout, cin = w.shape[0], w.shape[1]
    w = jnp.transpose(w, (2, 3, 1, 0)).reshape(9, cin, cout)
    w = jnp.pad(w, ((0, 0), (0, c_pad - cin), (0, c_pad - cout)))
    return w.reshape(9 * c_pad, c_pad).astype(jnp.bfloat16)


# --------------------------------- fused kernel --------------------------------

def _make_block_kernel(H, W, cin, cout, c_pad, halo, num_heads, head_dim,
                       res_t, attn_t, clip_act):
    P = H * W
    inv_res = 1.0 / np.sqrt((1.0 - res_t) ** 2 + res_t ** 2)
    inv_attn = 1.0 / np.sqrt((1.0 - attn_t) ** 2 + attn_t ** 2)
    inv_sqrt_cout = 1.0 / np.sqrt(cout)
    inv_sqrt_hd = 1.0 / np.sqrt(head_dim) if num_heads > 0 else 1.0
    attn_scale = 1.0 / np.sqrt(head_dim) if num_heads > 0 else 1.0

    def _bdot(a, b):  # bf16 MXU operands, f32 accumulation
        return jnp.dot(a.astype(jnp.bfloat16), b.astype(jnp.bfloat16),
                       preferred_element_type=jnp.float32)

    def _mp_silu(x):
        return x * jax.nn.sigmoid(x) * MP_SILU_SCALE

    def _chan_norm(x, inv_sqrt_n):  # normalize over the channel (lane) axis
        n = EPS + jnp.sqrt(jnp.sum(x * x, axis=-1, keepdims=True)) * inv_sqrt_n
        return x * pl.reciprocal(n, approx=True)

    def kernel(*refs):
        if num_heads > 0:
            (x_ref, c_ref, wskip_ref, w0_ref, w1_ref, wqkv_ref, wproj_ref,
             o_ref, vbuf_ref, im_ref) = refs
        else:
            (x_ref, c_ref, wskip_ref, w0_ref, w1_ref,
             o_ref, vbuf_ref, im_ref) = refs

        # zero the halo scratch; only its interior is rewritten by each conv,
        # so the zero borders provide the 3x3 vertical zero-padding.
        vbuf_ref[...] = jnp.zeros_like(vbuf_ref)

        # horizontal-tap validity masks (hoisted, reused by both convs)
        col = lax.broadcasted_iota(jnp.int32, (P, 1), 0) % W
        col_mask = {-1: col >= 1, 1: col < (W - 1)}

        def conv3x3(act, w9_ref):
            # act: (P, c_pad) f32, activation already applied (mp_silu(0)==0,
            # so the zero halo is consistent).  One im2col matmul, K=9*c_pad.
            vbuf_ref[halo:halo + P, :] = act
            for k in range(9):
                sy, sx = k // 3 - 1, k % 3 - 1
                start = halo + sy * W + sx
                patch = vbuf_ref[start:start + P, :]
                if sx != 0:
                    patch = jnp.where(col_mask[sx], patch, 0.0)
                im_ref[:, k * c_pad:(k + 1) * c_pad] = patch.astype(jnp.bfloat16)
            return jnp.dot(im_ref[...], w9_ref[...],
                           preferred_element_type=jnp.float32)

        # ---- enc: 1x1 skip conv + pixel norm over channels -------------------
        h = _bdot(x_ref[0], wskip_ref[...])                      # (P, c_pad)
        x0 = _chan_norm(h, inv_sqrt_cout)

        # ---- y = conv_res1(mp_silu(conv_res0(mp_silu(x)) * c)) ----------------
        y = conv3x3(_mp_silu(x0), w0_ref)
        y = conv3x3(_mp_silu(y * c_ref[0]), w1_ref)

        # ---- x = mp_sum(x, y, res_balance) ------------------------------------
        x1 = (x0 + res_t * (y - x0)) * inv_res

        # ---- attention ---------------------------------------------------------
        if num_heads > 0:
            qkv = _bdot(x1, wqkv_ref[...])                       # (P, 3*cout)
            y_at = jnp.zeros((P, c_pad), jnp.float32)
            for hh in range(num_heads):
                base = hh * head_dim
                q = _chan_norm(qkv[:, base:base + head_dim], inv_sqrt_hd)
                k = _chan_norm(qkv[:, cout + base:cout + base + head_dim],
                               inv_sqrt_hd)
                v = _chan_norm(qkv[:, 2 * cout + base:2 * cout + base + head_dim],
                               inv_sqrt_hd)
                s = lax.dot_general(q.astype(jnp.bfloat16), k.astype(jnp.bfloat16),
                                    (((1,), (1,)), ((), ())),
                                    preferred_element_type=jnp.float32)
                s = s * attn_scale
                s = s - jnp.max(s, axis=-1, keepdims=True)
                p = jnp.exp(s)
                p = p * pl.reciprocal(jnp.sum(p, axis=-1, keepdims=True),
                                      approx=True)
                a = _bdot(p, v)                                  # (P, head_dim)
                y_at = y_at + _bdot(a, wproj_ref[hh])            # per-head proj slice
            x1 = (x1 + attn_t * (y_at - x1)) * inv_attn

        o_ref[0] = jnp.clip(x1, -clip_act, clip_act)

    return kernel


# ------------------------------- Block forward ---------------------------------

@functools.partial(jax.jit, static_argnames=('flavor', 'res_balance',
                                              'attn_balance', 'clip_act',
                                              'num_heads'))
def block_forward(x_nchw, emb, params, *, flavor='enc', res_balance=0.3,
                  attn_balance=0.3, clip_act=256.0, num_heads=0):
    # resample(mode='keep') is the identity; dropout is training-only (eval mode).
    # TODO(synk): resample 'up'/'down' and pos_channels>0 (fourier positional
    #             embedding) paths are not wired; this runs the enc/keep/pos=0 config.
    assert flavor == 'enc'
    B, cin, H, W = x_nchw.shape
    P = H * W
    cout = params['conv_res0'].shape[0]
    c_pad = ((cout + 127) // 128) * 128
    halo = max(8, -(-(W + 1) // 8) * 8)          # >= W+1, multiple of 8

    # ---- weight prep (channels-last matmul layouts, bf16 at the MXU boundary) --
    w0 = _conv3x3_w9(_normalize_prep(params['conv_res0']), c_pad)
    w1 = _conv3x3_w9(_normalize_prep(params['conv_res1']), c_pad)

    if 'conv_skip' in params:
        w_skip = jnp.transpose(_normalize_prep(params['conv_skip'])[:, :, 0, 0])
    else:
        assert cin == cout, "identity skip requires in_channels == out_channels"
        w_skip = jnp.eye(cin, dtype=jnp.float32)
    w_skip = _pad_cols(w_skip, c_pad).astype(jnp.bfloat16)          # (cin, c_pad)

    # c = emb_linear(emb, gain=emb_gain) + 1  -- tiny, plain XLA (no extra launch)
    w_emb = jnp.transpose(_normalize_prep(params['emb_linear'],
                                          gain=params['emb_gain']))
    c = emb.astype(jnp.float32) @ w_emb + 1.0                        # (B, cout)
    c = _pad_cols(c, c_pad).reshape(B, 1, c_pad)

    x_flat = jnp.transpose(x_nchw, (0, 2, 3, 1)).reshape(B, P, cin)
    x_flat = x_flat.astype(jnp.float32)

    inputs = [x_flat, c, w_skip, w0, w1]
    in_specs = [
        pl.BlockSpec((1, P, cin), lambda b: (b, 0, 0)),
        pl.BlockSpec((1, 1, c_pad), lambda b: (b, 0, 0)),
        pl.BlockSpec((cin, c_pad), lambda b: (0, 0)),
        pl.BlockSpec((9 * c_pad, c_pad), lambda b: (0, 0)),
        pl.BlockSpec((9 * c_pad, c_pad), lambda b: (0, 0)),
    ]

    head_dim = cout // num_heads if num_heads > 0 else 0
    if num_heads > 0:
        # Permute qk columns at prep time (q | k, per-head contiguous) and fuse
        # q/k/v into one weight so the kernel does a single N=3*Cout matmul and
        # splits heads with static slices (no strided gathers / transposes).
        w_qk = jnp.transpose(_normalize_prep(params['attn_qk'])[:, :, 0, 0])   # (cout, 2*cout)
        w_v = jnp.transpose(_normalize_prep(params['attn_v'])[:, :, 0, 0])     # (cout, cout)
        w_qkv = jnp.concatenate([w_qk[:, 0::2], w_qk[:, 1::2], w_v], axis=1)   # (cout, 3*cout)
        w_qkv = jnp.pad(w_qkv, ((0, c_pad - cout), (0, 0))).astype(jnp.bfloat16)
        w_proj = jnp.transpose(_normalize_prep(params['attn_proj'])[:, :, 0, 0])
        w_proj = _pad_cols(w_proj, c_pad).reshape(num_heads, head_dim, c_pad)
        w_proj = w_proj.astype(jnp.bfloat16)
        inputs += [w_qkv, w_proj]
        in_specs += [
            pl.BlockSpec((c_pad, 3 * cout), lambda b: (0, 0)),
            pl.BlockSpec((num_heads, head_dim, c_pad), lambda b: (0, 0, 0)),
        ]

    kernel = _make_block_kernel(H, W, cin, cout, c_pad, halo, num_heads,
                                head_dim, res_balance, attn_balance, clip_act)

    out = pl.pallas_call(
        kernel,
        out_shape=jax.ShapeDtypeStruct((B, P, c_pad), jnp.float32),
        grid_spec=pltpu.PrefetchScalarGridSpec(
            num_scalar_prefetch=0,
            grid=(B,),
            in_specs=in_specs,
            out_specs=pl.BlockSpec((1, P, c_pad), lambda b: (b, 0, 0)),
            scratch_shapes=[
                pltpu.VMEM((2 * halo + P, c_pad), jnp.float32),    # conv halo buffer
                pltpu.VMEM((P, 9 * c_pad), jnp.bfloat16),          # im2col buffer
            ]),
        compiler_params=pltpu.CompilerParams(
            dimension_semantics=("parallel",)),   # batch shards across v7x's 2 TCs
    )(*inputs)

    # lane-dense (B, P, c_pad) kernel output -> NCHW (tiny slice+transpose, fused by XLA)
    return jnp.transpose(out[:, :, :cout], (0, 2, 1)).reshape(B, cout, H, W)


# ------------------------------------ main --------------------------------------

if __name__ == "__main__":
    B, Cin, Cout, E, H, W = 2, 16, 32, 24, 8, 8
    channels_per_head = 16
    num_heads = Cout // channels_per_head            # attention=True
    key = jax.random.PRNGKey(0)
    ks = jax.random.split(key, 9)

    params = {
        'conv_res0': jax.random.normal(ks[0], (Cout, Cout, 3, 3), jnp.float32),  # enc: in=out
        'conv_res1': jax.random.normal(ks[1], (Cout, Cout, 3, 3), jnp.float32),
        'emb_linear': jax.random.normal(ks[2], (Cout, E), jnp.float32),
        'conv_skip': jax.random.normal(ks[3], (Cout, Cin, 1, 1), jnp.float32),
        'attn_qk': jax.random.normal(ks[4], (2 * Cout, Cout, 1, 1), jnp.float32),
        'attn_v': jax.random.normal(ks[5], (Cout, Cout, 1, 1), jnp.float32),
        'attn_proj': jax.random.normal(ks[6], (Cout, Cout, 1, 1), jnp.float32),
        'emb_gain': jnp.zeros((), jnp.float32),
    }
    x = jax.random.normal(ks[7], (B, Cin, H, W), jnp.float32)
    emb = jax.random.normal(ks[8], (B, E), jnp.float32)

    out = block_forward(x, emb, params, flavor='enc', res_balance=0.3,
                        attn_balance=0.3, clip_act=256.0, num_heads=num_heads)
    out = jax.block_until_ready(out)
    assert out.shape == (B, Cout, H, W), out.shape
    assert bool(jnp.all(jnp.isfinite(out)))
    print("KERNEL_OK")
</pallas_src>

<mosaic_0001>
module attributes {stable_mosaic.version = 11 : i64} {
  func.func @kernel(%arg0: i32, %arg1: memref<1x64x16xf32, #tpu.memory_space<vmem>>, %arg2: memref<1x1x128xf32, #tpu.memory_space<vmem>>, %arg3: memref<16x128xbf16, #tpu.memory_space<vmem>>, %arg4: memref<1152x128xbf16, #tpu.memory_space<vmem>>, %arg5: memref<1152x128xbf16, #tpu.memory_space<vmem>>, %arg6: memref<128x96xbf16, #tpu.memory_space<vmem>>, %arg7: memref<2x16x128xbf16, #tpu.memory_space<vmem>>, %arg8: memref<1x64x128xf32, #tpu.memory_space<vmem>>, %arg9: memref<96x128xf32, #tpu.memory_space<vmem>>, %arg10: memref<64x1152xbf16, #tpu.memory_space<vmem>>) attributes {dimension_semantics = [#tpu.dimension_semantics<parallel>], iteration_bounds = array<i64: 2>, scalar_prefetch = 0 : i64, scratch_operands = 2 : i64, tpu.core_type = #tpu.core_type<tc>, window_params = [{transform_indices = @transform_0, window_bounds = array<i64: 1, 64, 16>}, {transform_indices = @transform_1, window_bounds = array<i64: 1, 1, 128>}, {pipeline_mode = #tpu.pipeline_mode<synchronous>, transform_indices = @transform_2, window_bounds = array<i64: 16, 128>}, {pipeline_mode = #tpu.pipeline_mode<synchronous>, transform_indices = @transform_3, window_bounds = array<i64: 1152, 128>}, {pipeline_mode = #tpu.pipeline_mode<synchronous>, transform_indices = @transform_4, window_bounds = array<i64: 1152, 128>}, {pipeline_mode = #tpu.pipeline_mode<synchronous>, transform_indices = @transform_5, window_bounds = array<i64: 128, 96>}, {pipeline_mode = #tpu.pipeline_mode<synchronous>, transform_indices = @transform_6, window_bounds = array<i64: 2, 16, 128>}, {transform_indices = @transform_7, window_bounds = array<i64: 1, 64, 128>}]} {
    %cst = arith.constant 0.000000e+00 : f32
    %0 = vector.broadcast %cst : f32 to vector<96x128xf32>
    %c0 = arith.constant 0 : index
    %c0_0 = arith.constant 0 : index
    %1 = vector.load %arg9[%c0, %c0_0] : memref<96x128xf32, #tpu.memory_space<vmem>>, vector<96x128xf32>
    tpu.vector_store %arg9[%c0, %c0_0], %0 {strides = array<i32>} : memref<96x128xf32, #tpu.memory_space<vmem>>, vector<96x128xf32>,
    %2 = tpu.iota {dimensions = array<i32: 0>} : vector<64x1xi32>
    %c8_i32 = arith.constant 8 : i32
    %c0_i32 = arith.constant 0 : i32
    %3 = arith.cmpi eq, %c8_i32, %c0_i32 : i32
    %c1_i32 = arith.constant 1 : i32
    %4 = arith.select %3, %c1_i32, %c8_i32 : i32
    %5 = vector.broadcast %4 : i32 to vector<64x1xi32>
    %6 = arith.remsi %2, %5 : vector<64x1xi32>
    %c0_i32_1 = arith.constant 0 : i32
    %7 = vector.broadcast %c0_i32_1 : i32 to vector<64x1xi32>
    %8 = arith.cmpi ne, %6, %7 : vector<64x1xi32>
    %c0_i32_2 = arith.constant 0 : i32
    %9 = vector.broadcast %c0_i32_2 : i32 to vector<64x1xi32>
    %10 = arith.cmpi slt, %6, %9 : vector<64x1xi32>
    %c0_i32_3 = arith.constant 0 : i32
    %11 = arith.cmpi slt, %4, %c0_i32_3 : i32
    %12 = vector.broadcast %11 : i1 to vector<64x1xi1>
    %13 = vector.broadcast %12 : vector<64x1xi1> to vector<64x1xi1>
    %14 = arith.xori %10, %13 : vector<64x1xi1>
    %15 = arith.andi %14, %8 : vector<64x1xi1>
    %16 = vector.broadcast %4 : i32 to vector<64x1xi32>
    %17 = arith.addi %6, %16 : vector<64x1xi32>
    %18 = arith.select %15, %17, %6 : vector<64x1xi1>, vector<64x1xi32>
    %c1_i32_4 = arith.constant 1 : i32
    %19 = vector.broadcast %c1_i32_4 : i32 to vector<64x1xi32>
    %20 = arith.cmpi sge, %18, %19 : vector<64x1xi32>
    %c7_i32 = arith.constant 7 : i32
    %21 = vector.broadcast %c7_i32 : i32 to vector<64x1xi32>
    %22 = arith.cmpi slt, %18, %21 : vector<64x1xi32>
    %c0_5 = arith.constant 0 : index
    %c0_6 = arith.constant 0 : index
    %c0_7 = arith.constant 0 : index
    %23 = vector.load %arg1[%c0_5, %c0_6, %c0_7] : memref<1x64x16xf32, #tpu.memory_space<vmem>>, vector<1x64x16xf32>
    %24 = vector.shape_cast %23 : vector<1x64x16xf32> to vector<64x16xf32>
    %c0_8 = arith.constant 0 : index
    %c0_9 = arith.constant 0 : index
    %25 = vector.load %arg3[%c0_8, %c0_9] : memref<16x128xbf16, #tpu.memory_space<vmem>>, vector<16x128xbf16>
    %26 = arith.truncf %24 : vector<64x16xf32> to vector<64x16xbf16>
    %cst_10 = arith.constant dense<0.000000e+00> : vector<64x128xf32>
    %27 = tpu.matmul %26, %25, %cst_10 {dimension_numbers = #tpu.dot_dimension_numbers<[1], [0], [0], [1], [0, 0, 1, 1], [], []>} : vector<64x16xbf16>, vector<16x128xbf16>, vector<64x128xf32> -> vector<64x128xf32>
    %28 = arith.mulf %27, %27 : vector<64x128xf32>
    %cst_11 = arith.constant dense<0.000000e+00> : vector<64xf32>
    %29 = vector.multi_reduction <add>, %28, %cst_11 [1] : vector<64x128xf32> to vector<64xf32>
    %30 = vector.shape_cast %29 : vector<64xf32> to vector<64x1xf32>
    %31 = math.sqrt %30 : vector<64x1xf32>
    %cst_12 = arith.constant 0.176776692 : f32
    %32 = vector.broadcast %cst_12 : f32 to vector<64x1xf32>
    %33 = arith.mulf %31, %32 : vector<64x1xf32>
    %cst_13 = arith.constant 9.99999974E-5 : f32
    %34 = vector.broadcast %cst_13 : f32 to vector<64x1xf32>
    %35 = arith.addf %34, %33 : vector<64x1xf32>
    %36 = tpu.reciprocal %35 {approx = true} : vector<64x1xf32> -> vector<64x1xf32>
    %37 = vector.broadcast %36 : vector<64x1xf32> to vector<64x128xf32>
    %38 = arith.mulf %27, %37 : vector<64x128xf32>
    %39 = arith.negf %38 : vector<64x128xf32>
    %40 = math.exp %39 : vector<64x128xf32>
    %cst_14 = arith.constant 1.000000e+00 : f32
    %41 = vector.broadcast %cst_14 : f32 to vector<64x128xf32>
    %42 = arith.addf %41, %40 : vector<64x128xf32>
    %43 = arith.divf %41, %42 : vector<64x128xf32>
    %44 = arith.mulf %38, %43 : vector<64x128xf32>
    %cst_15 = arith.constant 1.67785239 : f32
    %45 = vector.broadcast %cst_15 : f32 to vector<64x128xf32>
    %46 = arith.mulf %44, %45 : vector<64x128xf32>
    %c16 = arith.constant 16 : index
    %c0_16 = arith.constant 0 : index
    %47 = vector.load %arg9[%c16, %c0_16] : memref<96x128xf32, #tpu.memory_space<vmem>>, vector<64x128xf32>
    tpu.vector_store %arg9[%c16, %c0_16], %46 {strides = array<i32>} : memref<96x128xf32, #tpu.memory_space<vmem>>, vector<64x128xf32>,
    %c7 = arith.constant 7 : index
    %c0_17 = arith.constant 0 : index
    %48 = vector.load %arg9[%c7, %c0_17] : memref<96x128xf32, #tpu.memory_space<vmem>>, vector<64x128xf32>
    %cst_18 = arith.constant 0.000000e+00 : f32
    %49 = vector.shape_cast %20 : vector<64x1xi1> to vector<64x1xi1>
    %50 = vector.broadcast %49 : vector<64x1xi1> to vector<64x128xi1>
    %51 = vector.broadcast %cst_18 : f32 to vector<64x128xf32>
    %52 = arith.select %50, %48, %51 : vector<64x128xi1>, vector<64x128xf32>
    %53 = arith.truncf %52 : vector<64x128xf32> to vector<64x128xbf16>
    %c0_19 = arith.constant 0 : index
    %c0_20 = arith.constant 0 : index
    %54 = vector.load %arg10[%c0_19, %c0_20] : memref<64x1152xbf16, #tpu.memory_space<vmem>>, vector<64x128xbf16>
    tpu.vector_store %arg10[%c0_19, %c0_20], %53 {strides = array<i32>} : memref<64x1152xbf16, #tpu.memory_space<vmem>>, vector<64x128xbf16>,
    %c8 = arith.constant 8 : index
    %c0_21 = arith.constant 0 : index
    %55 = vector.load %arg9[%c8, %c0_21] : memref<96x128xf32, #tpu.memory_space<vmem>>, vector<64x128xf32>
    %56 = arith.truncf %55 : vector<64x128xf32> to vector<64x128xbf16>
    %c0_22 = arith.constant 0 : index
    %c128 = arith.constant 128 : index
    %57 = vector.load %arg10[%c0_22, %c128] : memref<64x1152xbf16, #tpu.memory_space<vmem>>, vector<64x128xbf16>
    tpu.vector_store %arg10[%c0_22, %c128], %56 {strides = array<i32>} : memref<64x1152xbf16, #tpu.memory_space<vmem>>, vector<64x128xbf16>,
    %c9 = arith.constant 9 : index
    %c0_23 = arith.constant 0 : index
    %58 = vector.load %arg9[%c9, %c0_23] : memref<96x128xf32, #tpu.memory_space<vmem>>, vector<64x128xf32>
    %cst_24 = arith.constant 0.000000e+00 : f32
    %59 = vector.shape_cast %22 : vector<64x1xi1> to vector<64x1xi1>
    %60 = vector.broadcast %59 : vector<64x1xi1> to vector<64x128xi1>
    %61 = vector.broadcast %cst_24 : f32 to vector<64x128xf32>
    %62 = arith.select %60, %58, %61 : vector<64x128xi1>, vector<64x128xf32>
    %63 = arith.truncf %62 : vector<64x128xf32> to vector<64x128xbf16>
    %c0_25 = arith.constant 0 : index
    %c256 = arith.constant 256 : index
    %64 = vector.load %arg10[%c0_25, %c256] : memref<64x1152xbf16, #tpu.memory_space<vmem>>, vector<64x128xbf16>
    tpu.vector_store %arg10[%c0_25, %c256], %63 {strides = array<i32>} : memref<64x1152xbf16, #tpu.memory_space<vmem>>, vector<64x128xbf16>,
    %c15 = arith.constant 15 : index
    %c0_26 = arith.constant 0 : index
    %65 = vector.load %arg9[%c15, %c0_26] : memref<96x128xf32, #tpu.memory_space<vmem>>, vector<64x128xf32>
    %cst_27 = arith.constant 0.000000e+00 : f32
    %66 = vector.shape_cast %20 : vector<64x1xi1> to vector<64x1xi1>
    %67 = vector.broadcast %66 : vector<64x1xi1> to vector<64x128xi1>
    %68 = vector.broadcast %cst_27 : f32 to vector<64x128xf32>
    %69 = arith.select %67, %65, %68 : vector<64x128xi1>, vector<64x128xf32>
    %70 = arith.truncf %69 : vector<64x128xf32> to vector<64x128xbf16>
    %c0_28 = arith.constant 0 : index
    %c384 = arith.constant 384 : index
    %71 = vector.load %arg10[%c0_28, %c384] : memref<64x1152xbf16, #tpu.memory_space<vmem>>, vector<64x128xbf16>
    tpu.vector_store %arg10[%c0_28, %c384], %70 {strides = array<i32>} : memref<64x1152xbf16, #tpu.memory_space<vmem>>, vector<64x128xbf16>,
    %c16_29 = arith.constant 16 : index
    %c0_30 = arith.constant 0 : index
    %72 = vector.load %arg9[%c16_29, %c0_30] : memref<96x128xf32, #tpu.memory_space<vmem>>, vector<64x128xf32>
    %73 = arith.truncf %72 : vector<64x128xf32> to vector<64x128xbf16>
    %c0_31 = arith.constant 0 : index
    %c512 = arith.constant 512 : index
    %74 = vector.load %arg10[%c0_31, %c512] : memref<64x1152xbf16, #tpu.memory_space<vmem>>, vector<64x128xbf16>
    tpu.vector_store %arg10[%c0_31, %c512], %73 {strides = array<i32>} : memref<64x1152xbf16, #tpu.memory_space<vmem>>, vector<64x128xbf16>,
    %c17 = arith.constant 17 : index
    %c0_32 = arith.constant 0 : index
    %75 = vector.load %arg9[%c17, %c0_32] : memref<96x128xf32, #tpu.memory_space<vmem>>, vector<64x128xf32>
    %cst_33 = arith.constant 0.000000e+00 : f32
    %76 = vector.shape_cast %22 : vector<64x1xi1> to vector<64x1xi1>
    %77 = vector.broadcast %76 : vector<64x1xi1> to vector<64x128xi1>
    %78 = vector.broadcast %cst_33 : f32 to vector<64x128xf32>
    %79 = arith.select %77, %75, %78 : vector<64x128xi1>, vector<64x128xf32>
    %80 = arith.truncf %79 : vector<64x128xf32> to vector<64x128xbf16>
    %c0_34 = arith.constant 0 : index
    %c640 = arith.constant 640 : index
    %81 = vector.load %arg10[%c0_34, %c640] : memref<64x1152xbf16, #tpu.memory_space<vmem>>, vector<64x128xbf16>
    tpu.vector_store %arg10[%c0_34, %c640], %80 {strides = array<i32>} : memref<64x1152xbf16, #tpu.memory_space<vmem>>, vector<64x128xbf16>,
    %c23 = arith.constant 23 : index
    %c0_35 = arith.constant 0 : index
    %82 = vector.load %arg9[%c23, %c0_35] : memref<96x128xf32, #tpu.memory_space<vmem>>, vector<64x128xf32>
    %cst_36 = arith.constant 0.000000e+00 : f32
    %83 = vector.shape_cast %20 : vector<64x1xi1> to vector<64x1xi1>
    %84 = vector.broadcast %83 : vector<64x1xi1> to vector<64x128xi1>
    %85 = vector.broadcast %cst_36 : f32 to vector<64x128xf32>
    %86 = arith.select %84, %82, %85 : vector<64x128xi1>, vector<64x128xf32>
    %87 = arith.truncf %86 : vector<64x128xf32> to vector<64x128xbf16>
    %c0_37 = arith.constant 0 : index
    %c768 = arith.constant 768 : index
    %88 = vector.load %arg10[%c0_37, %c768] : memref<64x1152xbf16, #tpu.memory_space<vmem>>, vector<64x128xbf16>
    tpu.vector_store %arg10[%c0_37, %c768], %87 {strides = array<i32>} : memref<64x1152xbf16, #tpu.memory_space<vmem>>, vector<64x128xbf16>,
    %c24 = arith.constant 24 : index
    %c0_38 = arith.constant 0 : index
    %89 = vector.load %arg9[%c24, %c0_38] : memref<96x128xf32, #tpu.memory_space<vmem>>, vector<64x128xf32>
    %90 = arith.truncf %89 : vector<64x128xf32> to vector<64x128xbf16>
    %c0_39 = arith.constant 0 : index
    %c896 = arith.constant 896 : index
    %91 = vector.load %arg10[%c0_39, %c896] : memref<64x1152xbf16, #tpu.memory_space<vmem>>, vector<64x128xbf16>
    tpu.vector_store %arg10[%c0_39, %c896], %90 {strides = array<i32>} : memref<64x1152xbf16, #tpu.memory_space<vmem>>, vector<64x128xbf16>,
    %c25 = arith.constant 25 : index
    %c0_40 = arith.constant 0 : index
    %92 = vector.load %arg9[%c25, %c0_40] : memref<96x128xf32, #tpu.memory_space<vmem>>, vector<64x128xf32>
    %cst_41 = arith.constant 0.000000e+00 : f32
    %93 = vector.shape_cast %22 : vector<64x1xi1> to vector<64x1xi1>
    %94 = vector.broadcast %93 : vector<64x1xi1> to vector<64x128xi1>
    %95 = vector.broadcast %cst_41 : f32 to vector<64x128xf32>
    %96 = arith.select %94, %92, %95 : vector<64x128xi1>, vector<64x128xf32>
    %97 = arith.truncf %96 : vector<64x128xf32> to vector<64x128xbf16>
    %c0_42 = arith.constant 0 : index
    %c1024 = arith.constant 1024 : index
    %98 = vector.load %arg10[%c0_42, %c1024] : memref<64x1152xbf16, #tpu.memory_space<vmem>>, vector<64x128xbf16>
    tpu.vector_store %arg10[%c0_42, %c1024], %97 {strides = array<i32>} : memref<64x1152xbf16, #tpu.memory_space<vmem>>, vector<64x128xbf16>,
    %c0_43 = arith.constant 0 : index
    %c0_44 = arith.constant 0 : index
    %99 = vector.load %arg10[%c0_43, %c0_44] : memref<64x1152xbf16, #tpu.memory_space<vmem>>, vector<64x1152xbf16>
    %c0_45 = arith.constant 0 : index
    %c0_46 = arith.constant 0 : index
    %100 = vector.load %arg4[%c0_45, %c0_46] : memref<1152x128xbf16, #tpu.memory_space<vmem>>, vector<1152x128xbf16>
    %cst_47 = arith.constant dense<0.000000e+00> : vector<64x128xf32>
    %101 = tpu.matmul %99, %100, %cst_47 {dimension_numbers = #tpu.dot_dimension_numbers<[1], [0], [0], [1], [0, 0, 1, 1], [], []>} : vector<64x1152xbf16>, vector<1152x128xbf16>, vector<64x128xf32> -> vector<64x128xf32>
    %c0_48 = arith.constant 0 : index
    %c0_49 = arith.constant 0 : index
    %c0_50 = arith.constant 0 : index
    %102 = vector.load %arg2[%c0_48, %c0_49, %c0_50] : memref<1x1x128xf32, #tpu.memory_space<vmem>>, vector<1x1x128xf32>
    %103 = vector.shape_cast %102 : vector<1x1x128xf32> to vector<1x128xf32>
    %104 = vector.broadcast %103 : vector<1x128xf32> to vector<64x128xf32>
    %105 = arith.mulf %101, %104 : vector<64x128xf32>
    %106 = arith.negf %105 : vector<64x128xf32>
    %107 = math.exp %106 : vector<64x128xf32>
    %cst_51 = arith.constant 1.000000e+00 : f32
    %108 = vector.broadcast %cst_51 : f32 to vector<64x128xf32>
    %109 = arith.addf %108, %107 : vector<64x128xf32>
    %110 = arith.divf %108, %109 : vector<64x128xf32>
    %111 = arith.mulf %105, %110 : vector<64x128xf32>
    %cst_52 = arith.constant 1.67785239 : f32
    %112 = vector.broadcast %cst_52 : f32 to vector<64x128xf32>
    %113 = arith.mulf %111, %112 : vector<64x128xf32>
    %c16_53 = arith.constant 16 : index
    %c0_54 = arith.constant 0 : index
    %114 = vector.load %arg9[%c16_53, %c0_54] : memref<96x128xf32, #tpu.memory_space<vmem>>, vector<64x128xf32>
    tpu.vector_store %arg9[%c16_53, %c0_54], %113 {strides = array<i32>} : memref<96x128xf32, #tpu.memory_space<vmem>>, vector<64x128xf32>,
    %c7_55 = arith.constant 7 : index
    %c0_56 = arith.constant 0 : index
    %115 = vector.load %arg9[%c7_55, %c0_56] : memref<96x128xf32, #tpu.memory_space<vmem>>, vector<64x128xf32>
    %cst_57 = arith.constant 0.000000e+00 : f32
    %116 = vector.shape_cast %20 : vector<64x1xi1> to vector<64x1xi1>
    %117 = vector.broadcast %116 : vector<64x1xi1> to vector<64x128xi1>
    %118 = vector.broadcast %cst_57 : f32 to vector<64x128xf32>
    %119 = arith.select %117, %115, %118 : vector<64x128xi1>, vector<64x128xf32>
    %120 = arith.truncf %119 : vector<64x128xf32> to vector<64x128xbf16>
    %c0_58 = arith.constant 0 : index
    %c0_59 = arith.constant 0 : index
    %121 = vector.load %arg10[%c0_58, %c0_59] : memref<64x1152xbf16, #tpu.memory_space<vmem>>, vector<64x128xbf16>
    tpu.vector_store %arg10[%c0_58, %c0_59], %120 {strides = array<i32>} : memref<64x1152xbf16, #tpu.memory_space<vmem>>, vector<64x128xbf16>,
    %c8_60 = arith.constant 8 : index
    %c0_61 = arith.constant 0 : index
    %122 = vector.load %arg9[%c8_60, %c0_61] : memref<96x128xf32, #tpu.memory_space<vmem>>, vector<64x128xf32>
    %123 = arith.truncf %122 : vector<64x128xf32> to vector<64x128xbf16>
    %c0_62 = arith.constant 0 : index
    %c128_63 = arith.constant 128 : index
    %124 = vector.load %arg10[%c0_62, %c128_63] : memref<64x1152xbf16, #tpu.memory_space<vmem>>, vector<64x128xbf16>
    tpu.vector_store %arg10[%c0_62, %c128_63], %123 {strides = array<i32>} : memref<64x1152xbf16, #tpu.memory_space<vmem>>, vector<64x128xbf16>,
    %c9_64 = arith.constant 9 : index
    %c0_65 = arith.constant 0 : index
    %125 = vector.load %arg9[%c9_64, %c0_65] : memref<96x128xf32, #tpu.memory_space<vmem>>, vector<64x128xf32>
    %cst_66 = arith.constant 0.000000e+00 : f32
    %126 = vector.shape_cast %22 : vector<64x1xi1> to vector<64x1xi1>
    %127 = vector.broadcast %126 : vector<64x1xi1> to vector<64x128xi1>
    %128 = vector.broadcast %cst_66 : f32 to vector<64x128xf32>
    %129 = arith.select %127, %125, %128 : vector<64x128xi1>, vector<64x128xf32>
    %130 = arith.truncf %129 : vector<64x128xf32> to vector<64x128xbf16>
    %c0_67 = arith.constant 0 : index
    %c256_68 = arith.constant 256 : index
    %131 = vector.load %arg10[%c0_67, %c256_68] : memref<64x1152xbf16, #tpu.memory_space<vmem>>, vector<64x128xbf16>
    tpu.vector_store %arg10[%c0_67, %c256_68], %130 {strides = array<i32>} : memref<64x1152xbf16, #tpu.memory_space<vmem>>, vector<64x128xbf16>,
    %c15_69 = arith.constant 15 : index
    %c0_70 = arith.constant 0 : index
    %132 = vector.load %arg9[%c15_69, %c0_70] : memref<96x128xf32, #tpu.memory_space<vmem>>, vector<64x128xf32>
    %cst_71 = arith.constant 0.000000e+00 : f32
    %133 = vector.shape_cast %20 : vector<64x1xi1> to vector<64x1xi1>
    %134 = vector.broadcast %133 : vector<64x1xi1> to vector<64x128xi1>
    %135 = vector.broadcast %cst_71 : f32 to vector<64x128xf32>
    %136 = arith.select %134, %132, %135 : vector<64x128xi1>, vector<64x128xf32>
    %137 = arith.truncf %136 : vector<64x128xf32> to vector<64x128xbf16>
    %c0_72 = arith.constant 0 : index
    %c384_73 = arith.constant 384 : index
    %138 = vector.load %arg10[%c0_72, %c384_73] : memref<64x1152xbf16, #tpu.memory_space<vmem>>, vector<64x128xbf16>
    tpu.vector_store %arg10[%c0_72, %c384_73], %137 {strides = array<i32>} : memref<64x1152xbf16, #tpu.memory_space<vmem>>, vector<64x128xbf16>,
    %c16_74 = arith.constant 16 : index
    %c0_75 = arith.constant 0 : index
    %139 = vector.load %arg9[%c16_74, %c0_75] : memref<96x128xf32, #tpu.memory_space<vmem>>, vector<64x128xf32>
    %140 = arith.truncf %139 : vector<64x128xf32> to vector<64x128xbf16>
    %c0_76 = arith.constant 0 : index
    %c512_77 = arith.constant 512 : index
    %141 = vector.load %arg10[%c0_76, %c512_77] : memref<64x1152xbf16, #tpu.memory_space<vmem>>, vector<64x128xbf16>
    tpu.vector_store %arg10[%c0_76, %c512_77], %140 {strides = array<i32>} : memref<64x1152xbf16, #tpu.memory_space<vmem>>, vector<64x128xbf16>,
    %c17_78 = arith.constant 17 : index
    %c0_79 = arith.constant 0 : index
    %142 = vector.load %arg9[%c17_78, %c0_79] : memref<96x128xf32, #tpu.memory_space<vmem>>, vector<64x128xf32>
    %cst_80 = arith.constant 0.000000e+00 : f32
    %143 = vector.shape_cast %22 : vector<64x1xi1> to vector<64x1xi1>
    %144 = vector.broadcast %143 : vector<64x1xi1> to vector<64x128xi1>
    %145 = vector.broadcast %cst_80 : f32 to vector<64x128xf32>
    %146 = arith.select %144, %142, %145 : vector<64x128xi1>, vector<64x128xf32>
    %147 = arith.truncf %146 : vector<64x128xf32> to vector<64x128xbf16>
    %c0_81 = arith.constant 0 : index
    %c640_82 = arith.constant 640 : index
    %148 = vector.load %arg10[%c0_81, %c640_82] : memref<64x1152xbf16, #tpu.memory_space<vmem>>, vector<64x128xbf16>
    tpu.vector_store %arg10[%c0_81, %c640_82], %147 {strides = array<i32>} : memref<64x1152xbf16, #tpu.memory_space<vmem>>, vector<64x128xbf16>,
    %c23_83 = arith.constant 23 : index
    %c0_84 = arith.constant 0 : index
    %149 = vector.load %arg9[%c23_83, %c0_84] : memref<96x128xf32, #tpu.memory_space<vmem>>, vector<64x128xf32>
    %cst_85 = arith.constant 0.000000e+00 : f32
    %150 = vector.shape_cast %20 : vector<64x1xi1> to vector<64x1xi1>
    %151 = vector.broadcast %150 : vector<64x1xi1> to vector<64x128xi1>
    %152 = vector.broadcast %cst_85 : f32 to vector<64x128xf32>
    %153 = arith.select %151, %149, %152 : vector<64x128xi1>, vector<64x128xf32>
    %154 = arith.truncf %153 : vector<64x128xf32> to vector<64x128xbf16>
    %c0_86 = arith.constant 0 : index
    %c768_87 = arith.constant 768 : index
    %155 = vector.load %arg10[%c0_86, %c768_87] : memref<64x1152xbf16, #tpu.memory_space<vmem>>, vector<64x128xbf16>
    tpu.vector_store %arg10[%c0_86, %c768_87], %154 {strides = array<i32>} : memref<64x1152xbf16, #tpu.memory_space<vmem>>, vector<64x128xbf16>,
    %c24_88 = arith.constant 24 : index
    %c0_89 = arith.constant 0 : index
    %156 = vector.load %arg9[%c24_88, %c0_89] : memref<96x128xf32, #tpu.memory_space<vmem>>, vector<64x128xf32>
    %157 = arith.truncf %156 : vector<64x128xf32> to vector<64x128xbf16>
    %c0_90 = arith.constant 0 : index
    %c896_91 = arith.constant 896 : index
    %158 = vector.load %arg10[%c0_90, %c896_91] : memref<64x1152xbf16, #tpu.memory_space<vmem>>, vector<64x128xbf16>
    tpu.vector_store %arg10[%c0_90, %c896_91], %157 {strides = array<i32>} : memref<64x1152xbf16, #tpu.memory_space<vmem>>, vector<64x128xbf16>,
    %c25_92 = arith.constant 25 : index
    %c0_93 = arith.constant 0 : index
    %159 = vector.load %arg9[%c25_92, %c0_93] : memref<96x128xf32, #tpu.memory_space<vmem>>, vector<64x128xf32>
    %cst_94 = arith.constant 0.000000e+00 : f32
    %160 = vector.shape_cast %22 : vector<64x1xi1> to vector<64x1xi1>
    %161 = vector.broadcast %160 : vector<64x1xi1> to vector<64x128xi1>
    %162 = vector.broadcast %cst_94 : f32 to vector<64x128xf32>
    %163 = arith.select %161, %159, %162 : vector<64x128xi1>, vector<64x128xf32>
    %164 = arith.truncf %163 : vector<64x128xf32> to vector<64x128xbf16>
    %c0_95 = arith.constant 0 : index
    %c1024_96 = arith.constant 1024 : index
    %165 = vector.load %arg10[%c0_95, %c1024_96] : memref<64x1152xbf16, #tpu.memory_space<vmem>>, vector<64x128xbf16>
    tpu.vector_store %arg10[%c0_95, %c1024_96], %164 {strides = array<i32>} : memref<64x1152xbf16, #tpu.memory_space<vmem>>, vector<64x128xbf16>,
    %c0_97 = arith.constant 0 : index
    %c0_98 = arith.constant 0 : index
    %166 = vector.load %arg10[%c0_97, %c0_98] : memref<64x1152xbf16, #tpu.memory_space<vmem>>, vector<64x1152xbf16>
    %c0_99 = arith.constant 0 : index
    %c0_100 = arith.constant 0 : index
    %167 = vector.load %arg5[%c0_99, %c0_100] : memref<1152x128xbf16, #tpu.memory_space<vmem>>, vector<1152x128xbf16>
    %cst_101 = arith.constant dense<0.000000e+00> : vector<64x128xf32>
    %168 = tpu.matmul %166, %167, %cst_101 {dimension_numbers = #tpu.dot_dimension_numbers<[1], [0], [0], [1], [0, 0, 1, 1], [], []>} : vector<64x1152xbf16>, vector<1152x128xbf16>, vector<64x128xf32> -> vector<64x128xf32>
    %169 = arith.subf %168, %38 : vector<64x128xf32>
    %cst_102 = arith.constant 3.000000e-01 : f32
    %170 = vector.broadcast %cst_102 : f32 to vector<64x128xf32>
    %171 = arith.mulf %170, %169 : vector<64x128xf32>
    %172 = arith.addf %38, %171 : vector<64x128xf32>
    %cst_103 = arith.constant 1.31306434 : f32
    %173 = vector.broadcast %cst_103 : f32 to vector<64x128xf32>
    %174 = arith.mulf %172, %173 : vector<64x128xf32>
    %c0_104 = arith.constant 0 : index
    %c0_105 = arith.constant 0 : index
    %175 = vector.load %arg6[%c0_104, %c0_105] : memref<128x96xbf16, #tpu.memory_space<vmem>>, vector<128x96xbf16>
    %176 = arith.truncf %174 : vector<64x128xf32> to vector<64x128xbf16>
    %cst_106 = arith.constant dense<0.000000e+00> : vector<64x96xf32>
    %177 = tpu.matmul %176, %175, %cst_106 {dimension_numbers = #tpu.dot_dimension_numbers<[1], [0], [0], [1], [0, 0, 1, 1], [], []>} : vector<64x128xbf16>, vector<128x96xbf16>, vector<64x96xf32> -> vector<64x96xf32>
    %cst_107 = arith.constant 0.000000e+00 : f32
    %178 = vector.broadcast %cst_107 : f32 to vector<64x128xf32>
    %179 = vector.extract_strided_slice %177 {offsets = [0, 0], sizes = [64, 16], strides = [1, 1]} : vector<64x96xf32> to vector<64x16xf32>
    %180 = arith.mulf %179, %179 : vector<64x16xf32>
    %cst_108 = arith.constant dense<0.000000e+00> : vector<64xf32>
    %181 = vector.multi_reduction <add>, %180, %cst_108 [1] : vector<64x16xf32> to vector<64xf32>
    %182 = vector.shape_cast %181 : vector<64xf32> to vector<64x1xf32>
    %183 = math.sqrt %182 : vector<64x1xf32>
    %cst_109 = arith.constant 2.500000e-01 : f32
    %184 = vector.broadcast %cst_109 : f32 to vector<64x1xf32>
    %185 = arith.mulf %183, %184 : vector<64x1xf32>
    %cst_110 = arith.constant 9.99999974E-5 : f32
    %186 = vector.broadcast %cst_110 : f32 to vector<64x1xf32>
    %187 = arith.addf %186, %185 : vector<64x1xf32>
    %188 = tpu.reciprocal %187 {approx = true} : vector<64x1xf32> -> vector<64x1xf32>
    %189 = vector.broadcast %188 : vector<64x1xf32> to vector<64x16xf32>
    %190 = arith.mulf %179, %189 : vector<64x16xf32>
    %191 = vector.extract_strided_slice %177 {offsets = [0, 32], sizes = [64, 16], strides = [1, 1]} : vector<64x96xf32> to vector<64x16xf32>
    %192 = arith.mulf %191, %191 : vector<64x16xf32>
    %cst_111 = arith.constant dense<0.000000e+00> : vector<64xf32>
    %193 = vector.multi_reduction <add>, %192, %cst_111 [1] : vector<64x16xf32> to vector<64xf32>
    %194 = vector.shape_cast %193 : vector<64xf32> to vector<64x1xf32>
    %195 = math.sqrt %194 : vector<64x1xf32>
    %cst_112 = arith.constant 2.500000e-01 : f32
    %196 = vector.broadcast %cst_112 : f32 to vector<64x1xf32>
    %197 = arith.mulf %195, %196 : vector<64x1xf32>
    %cst_113 = arith.constant 9.99999974E-5 : f32
    %198 = vector.broadcast %cst_113 : f32 to vector<64x1xf32>
    %199 = arith.addf %198, %197 : vector<64x1xf32>
    %200 = tpu.reciprocal %199 {approx = true} : vector<64x1xf32> -> vector<64x1xf32>
    %201 = vector.broadcast %200 : vector<64x1xf32> to vector<64x16xf32>
    %202 = arith.mulf %191, %201 : vector<64x16xf32>
    %203 = vector.extract_strided_slice %177 {offsets = [0, 64], sizes = [64, 16], strides = [1, 1]} : vector<64x96xf32> to vector<64x16xf32>
    %204 = arith.mulf %203, %203 : vector<64x16xf32>
    %cst_114 = arith.constant dense<0.000000e+00> : vector<64xf32>
    %205 = vector.multi_reduction <add>, %204, %cst_114 [1] : vector<64x16xf32> to vector<64xf32>
    %206 = vector.shape_cast %205 : vector<64xf32> to vector<64x1xf32>
    %207 = math.sqrt %206 : vector<64x1xf32>
    %cst_115 = arith.constant 2.500000e-01 : f32
    %208 = vector.broadcast %cst_115 : f32 to vector<64x1xf32>
    %209 = arith.mulf %207, %208 : vector<64x1xf32>
    %cst_116 = arith.constant 9.99999974E-5 : f32
    %210 = vector.broadcast %cst_116 : f32 to vector<64x1xf32>
    %211 = arith.addf %210, %209 : vector<64x1xf32>
    %212 = tpu.reciprocal %211 {approx = true} : vector<64x1xf32> -> vector<64x1xf32>
    %213 = vector.broadcast %212 : vector<64x1xf32> to vector<64x16xf32>
    %214 = arith.mulf %203, %213 : vector<64x16xf32>
    %215 = arith.truncf %190 : vector<64x16xf32> to vector<64x16xbf16>
    %216 = arith.truncf %202 : vector<64x16xf32> to vector<64x16xbf16>
    %cst_117 = arith.constant dense<0.000000e+00> : vector<64x64xf32>
    %217 = tpu.matmul %215, %216, %cst_117 {dimension_numbers = #tpu.dot_dimension_numbers<[1], [1], [0], [0], [0, 0, 1, 0], [], []>} : vector<64x16xbf16>, vector<64x16xbf16>, vector<64x64xf32> -> vector<64x64xf32>
    %cst_118 = arith.constant 2.500000e-01 : f32
    %218 = vector.broadcast %cst_118 : f32 to vector<64x64xf32>
    %219 = arith.mulf %217, %218 : vector<64x64xf32>
    %cst_119 = arith.constant dense<0xFF800000> : vector<64xf32>
    %220 = vector.multi_reduction <maximumf>, %219, %cst_119 [1] : vector<64x64xf32> to vector<64xf32>
    %221 = vector.shape_cast %220 : vector<64xf32> to vector<64x1xf32>
    %222 = vector.broadcast %221 : vector<64x1xf32> to vector<64x64xf32>
    %223 = arith.subf %219, %222 : vector<64x64xf32>
    %224 = math.exp %223 : vector<64x64xf32>
    %cst_120 = arith.constant dense<0.000000e+00> : vector<64xf32>
    %225 = vector.multi_reduction <add>, %224, %cst_120 [1] : vector<64x64xf32> to vector<64xf32>
    %226 = vector.shape_cast %225 : vector<64xf32> to vector<64x1xf32>
    %227 = tpu.reciprocal %226 {approx = true} : vector<64x1xf32> -> vector<64x1xf32>
    %228 = vector.broadcast %227 : vector<64x1xf32> to vector<64x64xf32>
    %229 = arith.mulf %224, %228 : vector<64x64xf32>
    %230 = arith.truncf %229 : vector<64x64xf32> to vector<64x64xbf16>
    %231 = arith.truncf %214 : vector<64x16xf32> to vector<64x16xbf16>
    %cst_121 = arith.constant dense<0.000000e+00> : vector<64x16xf32>
    %232 = tpu.matmul %230, %231, %cst_121 {dimension_numbers = #tpu.dot_dimension_numbers<[1], [0], [0], [1], [0, 0, 1, 1], [], []>} : vector<64x64xbf16>, vector<64x16xbf16>, vector<64x16xf32> -> vector<64x16xf32>
    %c0_122 = arith.constant 0 : index
    %c0_123 = arith.constant 0 : index
    %c0_124 = arith.constant 0 : index
    %233 = vector.load %arg7[%c0_122, %c0_123, %c0_124] : memref<2x16x128xbf16, #tpu.memory_space<vmem>>, vector<1x16x128xbf16>
    %234 = vector.shape_cast %233 : vector<1x16x128xbf16> to vector<16x128xbf16>
    %235 = arith.truncf %232 : vector<64x16xf32> to vector<64x16xbf16>
    %cst_125 = arith.constant dense<0.000000e+00> : vector<64x128xf32>
    %236 = tpu.matmul %235, %234, %cst_125 {dimension_numbers = #tpu.dot_dimension_numbers<[1], [0], [0], [1], [0, 0, 1, 1], [], []>} : vector<64x16xbf16>, vector<16x128xbf16>, vector<64x128xf32> -> vector<64x128xf32>
    %237 = arith.addf %178, %236 : vector<64x128xf32>
    %238 = vector.extract_strided_slice %177 {offsets = [0, 16], sizes = [64, 16], strides = [1, 1]} : vector<64x96xf32> to vector<64x16xf32>
    %239 = arith.mulf %238, %238 : vector<64x16xf32>
    %cst_126 = arith.constant dense<0.000000e+00> : vector<64xf32>
    %240 = vector.multi_reduction <add>, %239, %cst_126 [1] : vector<64x16xf32> to vector<64xf32>
    %241 = vector.shape_cast %240 : vector<64xf32> to vector<64x1xf32>
    %242 = math.sqrt %241 : vector<64x1xf32>
    %cst_127 = arith.constant 2.500000e-01 : f32
    %243 = vector.broadcast %cst_127 : f32 to vector<64x1xf32>
    %244 = arith.mulf %242, %243 : vector<64x1xf32>
    %cst_128 = arith.constant 9.99999974E-5 : f32
    %245 = vector.broadcast %cst_128 : f32 to vector<64x1xf32>
    %246 = arith.addf %245, %244 : vector<64x1xf32>
    %247 = tpu.reciprocal %246 {approx = true} : vector<64x1xf32> -> vector<64x1xf32>
    %248 = vector.broadcast %247 : vector<64x1xf32> to vector<64x16xf32>
    %249 = arith.mulf %238, %248 : vector<64x16xf32>
    %250 = vector.extract_strided_slice %177 {offsets = [0, 48], sizes = [64, 16], strides = [1, 1]} : vector<64x96xf32> to vector<64x16xf32>
    %251 = arith.mulf %250, %250 : vector<64x16xf32>
    %cst_129 = arith.constant dense<0.000000e+00> : vector<64xf32>
    %252 = vector.multi_reduction <add>, %251, %cst_129 [1] : vector<64x16xf32> to vector<64xf32>
    %253 = vector.shape_cast %252 : vector<64xf32> to vector<64x1xf32>
    %254 = math.sqrt %253 : vector<64x1xf32>
    %cst_130 = arith.constant 2.500000e-01 : f32
    %255 = vector.broadcast %cst_130 : f32 to vector<64x1xf32>
    %256 = arith.mulf %254, %255 : vector<64x1xf32>
    %cst_131 = arith.constant 9.99999974E-5 : f32
    %257 = vector.broadcast %cst_131 : f32 to vector<64x1xf32>
    %258 = arith.addf %257, %256 : vector<64x1xf32>
    %259 = tpu.reciprocal %258 {approx = true} : vector<64x1xf32> -> vector<64x1xf32>
    %260 = vector.broadcast %259 : vector<64x1xf32> to vector<64x16xf32>
    %261 = arith.mulf %250, %260 : vector<64x16xf32>
    %262 = vector.extract_strided_slice %177 {offsets = [0, 80], sizes = [64, 16], strides = [1, 1]} : vector<64x96xf32> to vector<64x16xf32>
    %263 = arith.mulf %262, %262 : vector<64x16xf32>
    %cst_132 = arith.constant dense<0.000000e+00> : vector<64xf32>
    %264 = vector.multi_reduction <add>, %263, %cst_132 [1] : vector<64x16xf32> to vector<64xf32>
    %265 = vector.shape_cast %264 : vector<64xf32> to vector<64x1xf32>
    %266 = math.sqrt %265 : vector<64x1xf32>
    %cst_133 = arith.constant 2.500000e-01 : f32
    %267 = vector.broadcast %cst_133 : f32 to vector<64x1xf32>
    %268 = arith.mulf %266, %267 : vector<64x1xf32>
    %cst_134 = arith.constant 9.99999974E-5 : f32
    %269 = vector.broadcast %cst_134 : f32 to vector<64x1xf32>
    %270 = arith.addf %269, %268 : vector<64x1xf32>
    %271 = tpu.reciprocal %270 {approx = true} : vector<64x1xf32> -> vector<64x1xf32>
    %272 = vector.broadcast %271 : vector<64x1xf32> to vector<64x16xf32>
    %273 = arith.mulf %262, %272 : vector<64x16xf32>
    %274 = arith.truncf %249 : vector<64x16xf32> to vector<64x16xbf16>
    %275 = arith.truncf %261 : vector<64x16xf32> to vector<64x16xbf16>
    %cst_135 = arith.constant dense<0.000000e+00> : vector<64x64xf32>
    %276 = tpu.matmul %274, %275, %cst_135 {dimension_numbers = #tpu.dot_dimension_numbers<[1], [1], [0], [0], [0, 0, 1, 0], [], []>} : vector<64x16xbf16>, vector<64x16xbf16>, vector<64x64xf32> -> vector<64x64xf32>
    %cst_136 = arith.constant 2.500000e-01 : f32
    %277 = vector.broadcast %cst_136 : f32 to vector<64x64xf32>
    %278 = arith.mulf %276, %277 : vector<64x64xf32>
    %cst_137 = arith.constant dense<0xFF800000> : vector<64xf32>
    %279 = vector.multi_reduction <maximumf>, %278, %cst_137 [1] : vector<64x64xf32> to vector<64xf32>
    %280 = vector.shape_cast %279 : vector<64xf32> to vector<64x1xf32>
    %281 = vector.broadcast %280 : vector<64x1xf32> to vector<64x64xf32>
    %282 = arith.subf %278, %281 : vector<64x64xf32>
    %283 = math.exp %282 : vector<64x64xf32>
    %cst_138 = arith.constant dense<0.000000e+00> : vector<64xf32>
    %284 = vector.multi_reduction <add>, %283, %cst_138 [1] : vector<64x64xf32> to vector<64xf32>
    %285 = vector.shape_cast %284 : vector<64xf32> to vector<64x1xf32>
    %286 = tpu.reciprocal %285 {approx = true} : vector<64x1xf32> -> vector<64x1xf32>
    %287 = vector.broadcast %286 : vector<64x1xf32> to vector<64x64xf32>
    %288 = arith.mulf %283, %287 : vector<64x64xf32>
    %289 = arith.truncf %288 : vector<64x64xf32> to vector<64x64xbf16>
    %290 = arith.truncf %273 : vector<64x16xf32> to vector<64x16xbf16>
    %cst_139 = arith.constant dense<0.000000e+00> : vector<64x16xf32>
    %291 = tpu.matmul %289, %290, %cst_139 {dimension_numbers = #tpu.dot_dimension_numbers<[1], [0], [0], [1], [0, 0, 1, 1], [], []>} : vector<64x64xbf16>, vector<64x16xbf16>, vector<64x16xf32> -> vector<64x16xf32>
    %c1 = arith.constant 1 : index
    %c0_140 = arith.constant 0 : index
    %c0_141 = arith.constant 0 : index
    %292 = vector.load %arg7[%c1, %c0_140, %c0_141] : memref<2x16x128xbf16, #tpu.memory_space<vmem>>, vector<1x16x128xbf16>
    %293 = vector.shape_cast %292 : vector<1x16x128xbf16> to vector<16x128xbf16>
    %294 = arith.truncf %291 : vector<64x16xf32> to vector<64x16xbf16>
    %cst_142 = arith.constant dense<0.000000e+00> : vector<64x128xf32>
    %295 = tpu.matmul %294, %293, %cst_142 {dimension_numbers = #tpu.dot_dimension_numbers<[1], [0], [0], [1], [0, 0, 1, 1], [], []>} : vector<64x16xbf16>, vector<16x128xbf16>, vector<64x128xf32> -> vector<64x128xf32>
    %296 = arith.addf %237, %295 : vector<64x128xf32>
    %297 = arith.subf %296, %174 : vector<64x128xf32>
    %cst_143 = arith.constant 3.000000e-01 : f32
    %298 = vector.broadcast %cst_143 : f32 to vector<64x128xf32>
    %299 = arith.mulf %298, %297 : vector<64x128xf32>
    %300 = arith.addf %174, %299 : vector<64x128xf32>
    %cst_144 = arith.constant 1.31306434 : f32
    %301 = vector.broadcast %cst_144 : f32 to vector<64x128xf32>
    %302 = arith.mulf %300, %301 : vector<64x128xf32>
    %cst_145 = arith.constant -2.560000e+02 : f32
    %cst_146 = arith.constant 2.560000e+02 : f32
    %303 = vector.broadcast %cst_145 : f32 to vector<64x128xf32>
    %304 = arith.maximumf %303, %302 : vector<64x128xf32>
    %305 = vector.broadcast %cst_146 : f32 to vector<64x128xf32>
    %306 = arith.minimumf %305, %304 : vector<64x128xf32>
    %c0_147 = arith.constant 0 : index
    %c0_148 = arith.constant 0 : index
    %c0_149 = arith.constant 0 : index
    %307 = vector.load %arg8[%c0_147, %c0_148, %c0_149] : memref<1x64x128xf32, #tpu.memory_space<vmem>>, vector<1x64x128xf32>
    %308 = vector.shape_cast %307 : vector<1x64x128xf32> to vector<64x128xf32>
    %309 = vector.shape_cast %306 : vector<64x128xf32> to vector<1x64x128xf32>
    tpu.vector_store %arg8[%c0_147, %c0_148, %c0_149], %309 {strides = array<i32>} : memref<1x64x128xf32, #tpu.memory_space<vmem>>, vector<1x64x128xf32>,
    return
  }
  func.func @transform_0(%arg0: i32) -> (i32, i32, i32) {
    %c0_i32 = arith.constant 0 : i32
    %c0_i32_0 = arith.constant 0 : i32
    %c0_i32_1 = arith.constant 0 : i32
    return %arg0, %c0_i32, %c0_i32_0 : i32, i32, i32
  }
  func.func @transform_1(%arg0: i32) -> (i32, i32, i32) {
    %c0_i32 = arith.constant 0 : i32
    %c0_i32_0 = arith.constant 0 : i32
    %c0_i32_1 = arith.constant 0 : i32
    return %arg0, %c0_i32, %c0_i32_0 : i32, i32, i32
  }
  func.func @transform_2(%arg0: i32) -> (i32, i32) {
    %c0_i32 = arith.constant 0 : i32
    %c0_i32_0 = arith.constant 0 : i32
    %c0_i32_1 = arith.constant 0 : i32
    return %c0_i32, %c0_i32_0 : i32, i32
  }
  func.func @transform_3(%arg0: i32) -> (i32, i32) {
    %c0_i32 = arith.constant 0 : i32
    %c0_i32_0 = arith.constant 0 : i32
    %c0_i32_1 = arith.constant 0 : i32
    return %c0_i32, %c0_i32_0 : i32, i32
  }
  func.func @transform_4(%arg0: i32) -> (i32, i32) {
    %c0_i32 = arith.constant 0 : i32
    %c0_i32_0 = arith.constant 0 : i32
    %c0_i32_1 = arith.constant 0 : i32
    return %c0_i32, %c0_i32_0 : i32, i32
  }
  func.func @transform_5(%arg0: i32) -> (i32, i32) {
    %c0_i32 = arith.constant 0 : i32
    %c0_i32_0 = arith.constant 0 : i32
    %c0_i32_1 = arith.constant 0 : i32
    return %c0_i32, %c0_i32_0 : i32, i32
  }
  func.func @transform_6(%arg0: i32) -> (i32, i32, i32) {
    %c0_i32 = arith.constant 0 : i32
    %c0_i32_0 = arith.constant 0 : i32
    %c0_i32_1 = arith.constant 0 : i32
    %c0_i32_2 = arith.constant 0 : i32
    return %c0_i32, %c0_i32_0, %c0_i32_1 : i32, i32, i32
  }
  func.func @transform_7(%arg0: i32) -> (i32, i32, i32) {
    %c0_i32 = arith.constant 0 : i32
    %c0_i32_0 = arith.constant 0 : i32
    %c0_i32_1 = arith.constant 0 : i32
    return %arg0, %c0_i32, %c0_i32_0 : i32, i32, i32
  }
}

</mosaic_0001>

<bundles_post_ra>
// kernel: block_forward.1
= control target key start
LH: loop header
LB: loop body
LE: loop exit
PB: predicated region body
PF: predicated region fallthrough
CT: control target
= control target key end

     0   :  { %s7761_s24 = smov 0   ;;  %s9734_s0 = inlined_call_operand.vmem [shape: f32[2,64,16], index: 0, kind: input, shape index: {}]   ;;  %s9735_s1 = inlined_call_operand.vmem [shape: f32[2,1,128], index: 1, kind: input, shape index: {}]   ;;  %s9736_s2 = inlined_call_operand.vmem [shape: bf16[16,128], index: 2, kind: input, shape index: {}]   ;;  %s9737_s3 = inlined_call_operand.vmem [shape: bf16[1152,128], index: 3, kind: input, shape index: {}]   ;;  %s9738_s4 = inlined_call_operand.vmem [shape: bf16[1152,128], index: 4, kind: input, shape index: {}]   ;;  %s9739_s5 = inlined_call_operand.vmem [shape: bf16[128,96], index: 5, kind: input, shape index: {}]   ;;  %s9740_s6 = inlined_call_operand.vmem [shape: bf16[2,16,128], index: 6, kind: input, shape index: {}]   ;;  %s9741_s7 = inlined_call_operand.vmem [shape: f32[2,64,128], index: 7, kind: output, shape index: {}]  }
   0x1 LB: > { %s5935_s25 = sadd.s32 4294967295, %s7712_s24   ;;  %p5939_p0 = scmp.ge.s32.totalorder %s7712_s24, 1  ;;  %s7712_s24 = sphi %s7761_s24, %s17_s24  }
   0x2   : > { %p245_p1 = scmp.lt.s32.totalorder %s7712_s24, 3 }
   0x4   : > { %p246_p2 = pnand %p5939_p0, %p245_p1 }
   0x6   : > { %249 = sbr.rel (%p246_p2) target bundleno = 2899 (0xb53), region = 48 }
   0xb   : > { %v7109_v0 = vld [vmem:[%s9736_s2] sm:$0xff]   ;;  %p280_p3 = scmp.lt.s32.totalorder %s5935_s25, 1  ;;  %vm9742_vm0 = vcmask 130048   ;;  %v7714_v13 = vmov 0.0   ;;  %v7110_v30 = vld [vmem:[%s9737_s3 + $0x78] sm:$0xff]   ;;  %v7112_v32 = vld [vmem:[%s9737_s3 + $0x70] sm:$0xff]   ;;  %v306_v42 = vlaneseq }
   0xc   : > { %6921 = vmatprep.subr.bf16.mxu0 %v7109_v0  ;;  %294 = vst [vmem:[#allocation2] sm:$0xff] %v7714_v13  ;;  %295 = vst [vmem:[#allocation2 + $0x8] sm:$0xff] %v7714_v13  ;;  %v7111_v31 = vld [vmem:[%s9737_s3 + $0x38] sm:$0xff]   ;;  %6523 = vmatprep.subr.bf16.mxu1 %v7110_v30  ;;  %v7113_v34 = vld [vmem:[%s9737_s3 + $0x30] sm:$0xff]   ;;  %v9791_v53 = vmov 0  ;;  %v7715_v61 = vmov 0.0|0.0  }
   0xd   : > { %s9967_s25 = smov (!%p280_p3, %s5935_s25), 1  ;;  %6922 = vmatpush3.bf16.msra.mxu0 %v7109_v0  ;;  %304 = vst [vmem:[#allocation2 + $0x50] sm:$0xff] %v7714_v13  ;;  %305 = vst [vmem:[#allocation2 + $0x58] sm:$0xff] %v7714_v13  ;;  %6524 = vmatpush3.bf16.msra.mxu1 %v7111_v31  ;;  %v7114_v33 = vld [vmem:[%s9737_s3 + $0xf8] sm:$0xff]   ;;  %v7116_v36 = vld [vmem:[%s9737_s3 + $0x68] sm:$0xff]   ;;  %v7864_v47 = vshrl.u32 %v306_v42, 7 }
   0xe   : > { %s6372_s28 = sshll.u32 %s9967_s25, 6  ;;  %v7115_v35 = vld [vmem:[%s9737_s3 + $0xb8] sm:$0xff]   ;;  %6525 = vmatprep.subr.bf16.mxu1 %v7112_v32  ;;  %6563 = vmatprep.subr.bf16.mxu0 %v7114_v33  ;;  %v7118_v37 = vld [vmem:[%s9737_s3 + $0xf0] sm:$0xff]   ;;  %v7117_v38 = vld [vmem:[%s9737_s3 + $0x28] sm:$0xff]   ;;  %821 = vst [vmem:[#allocation3 + $0x4] sm:$0xf] %v7715_v61  ;;  %s287_s23 = scalar_lea.vmem %s9735_s1, %s9967_s25 }
   0xf   : > { %s284_s8 = scalar_lea.vmem %s9734_s0, %s6372_s28  ;;  %v7119_v39 = vld [vmem:[%s9737_s3 + $0xb0] sm:$0xff]   ;;  %v7120_v40 = vld [vmem:[%s9737_s3 + $0x60] sm:$0xff]   ;;  %v7122_v41 = vld [vmem:[%s9737_s3 + $0xe8] sm:$0xff]   ;;  %v319_v50 = vand.u32 7, %v7864_v47  ;;  %1164 = vst [vmem:[#allocation3 + $0x118] sm:$0xf] %v7715_v61  ;;  %s9711_s30 = scalar_lea.vmem %s9741_s7, %s6372_s28 }
  0x10   : > { %v427_v1 = vld [vmem:[%s284_s8] sm:$0xff]  ;;  %v428_v2 = vld [vmem:[%s284_s8 + $0x8] sm:$0xff]  ;;  %v429_v3 = vld [vmem:[%s284_s8 + $0x10] sm:$0xff]  ;;  %s7716_s16 = smov 96   ;;  %s7717_s17 = smov 80  }
  0x11   : > { %v437_v4 = vpack.c.bf16 %v428_v2, %v427_v1  ;;  %v430_v5 = vld [vmem:[%s284_s8 + $0x18] sm:$0xff]  ;;  %v431_v6 = vld [vmem:[%s284_s8 + $0x20] sm:$0xff]  ;;  %v432_v7 = vld [vmem:[%s284_s8 + $0x28] sm:$0xff]  ;;  %6526 = vmatpush3.bf16.msra.mxu1 %v7113_v34  ;;  %vm7881_vm1 = vcmp.ge.s32.totalorder %v319_v50, 1  ;;  %s7718_s18 = smov 112   ;;  %s7719_s19 = smov 64  }
  0x12   : > { %v438_v8 = vpack.c.bf16 %v430_v5, %v429_v3  ;;  %v439_v9 = vpack.c.bf16 %v432_v7, %v431_v6  ;;  %v433_v10 = vld [vmem:[%s284_s8 + $0x30] sm:$0xff]  ;;  %v434_v11 = vld [vmem:[%s284_s8 + $0x38] sm:$0xff]  ;;  %6527 = vmatprep.subr.bf16.mxu1 %v7116_v36  ;;  %v7121_v43 = vld [vmem:[%s9737_s3 + $0x20] sm:$0xff]   ;;  %v9792_v53 = vsel %vm7881_vm1, 4294967295, %v9791_v53  ;;  %s7720_s20 = smov 48  }
  0x13   : > { %6923 = vmatprep.mubr.msk.bf16.mxu0 %vm9742_vm0, %v437_v4  ;;  %v440_v12 = vpack.c.bf16 %v434_v11, %v433_v10  ;;  %v7123_v44 = vld [vmem:[%s9737_s3 + $0xa8] sm:$0xff]   ;;  %v7124_v45 = vld [vmem:[%s9737_s3 + $0x58] sm:$0xff]   ;;  %v7126_v46 = vld [vmem:[%s9737_s3 + $0xe0] sm:$0xff]   ;;  %9793 = vst [vmem:[#allocation4_spill] sm:$0xff] %v9792_v53  ;;  %v9794_v10 = vmov 0 }
  0x14   : > { %6924 = vmatmul.mubr.msk.bf16.vlgmr.msra.gmra.mxu0 %vm9742_vm0, %v438_v8  ;;  %v7125_v48 = vld [vmem:[%s9737_s3 + $0x18] sm:$0xff]   ;;  %v7127_v49 = vld [vmem:[%s9737_s3 + $0xa0] sm:$0xff]   ;;  %v7128_v51 = vld [vmem:[%s9737_s3 + $0x50] sm:$0xff]   ;;  %v7935_v8 = vadd.s32 56, %v7864_v47 }
  0x15   : > { %6927 = vmatprep.mubr.msk.bf16.mxu0 %vm9742_vm0, %v439_v9  ;;  %6564 = vmatpush3.bf16.msra.mxu0 %v7115_v35  ;;  %v7130_v52 = vld [vmem:[%s9737_s3 + $0xd8] sm:$0xff]   ;;  %v709_v54 = vld [vmem:[#allocation2 + $0x7] sm:$0xff]  ;;  %v7129_v55 = vld [vmem:[%s9737_s3 + $0x10] sm:$0xff]  }
  0x16   : > { %6565 = vmatprep.subr.bf16.mxu0 %v7118_v37  ;;  %6528 = vmatpush3.bf16.msra.mxu1 %v7117_v38  ;;  %v7131_v56 = vld [vmem:[%s9737_s3 + $0x98] sm:$0xff]   ;;  %v733_v57 = vsel %vm7881_vm1, %v709_v54, 0.0  ;;  %v7132_v59 = vld [vmem:[%s9737_s3 + $0x48] sm:$0xff]   ;;  %v7134_v60 = vld [vmem:[%s9737_s3 + $0xd0] sm:$0xff]   ;;  %v368_v9 = vand.u32 7, %v7935_v8 }
  0x17   : > { %6529 = vmatprep.subr.bf16.mxu1 %v7120_v40  ;;  %v7893_v58 = vpack.c.bf16 %v733_v57, %v733_v57  ;;  %v7133_v62 = vld [vmem:[%s9737_s3 + $0x8] sm:$0xff]   ;;  %v7135_v63 = vld [vmem:[%s9737_s3 + $0x90] sm:$0xff]   ;;  %v7136_v0 = vld [vmem:[%s9737_s3 + $0x40] sm:$0xff]  }
  0x18   : > { %v7138_v1 = vld [vmem:[%s9737_s3 + $0xc8] sm:$0xff]   ;;  %v7137_v2 = vld [vmem:[%s9737_s3] sm:$0xff]   ;;  %v7142_v4 = vld [vmem:[%s9737_s3 + $0x178] sm:$0xff]   ;;  %vm7940_vm2 = vcmp.lt.s32.totalorder %v368_v9, 7 }
  0x19   : > { %6566 = vmatpush3.bf16.msra.mxu0 %v7119_v39  ;;  %773 = vst [vmem:[#allocation3] sm:$0xf] %v7893_v58  ;;  %v7139_v3 = vld [vmem:[%s9737_s3 + $0x88] sm:$0xff]   ;;  %v7143_v5 = vld [vmem:[%s9737_s3 + $0xc0] sm:$0xff]   ;;  %v7153_v7 = vld [vmem:[%s9737_s3 + $0x1f8] sm:$0xff]   ;;  %v9795_v10 = vsel %vm7940_vm2, 4294967295, %v9794_v10 }
  0x1a   : > { %6567 = vmatprep.subr.bf16.mxu0 %v7122_v41  ;;  %6530 = vmatpush3.bf16.msra.mxu1 %v7121_v43  ;;  %v7145_v6 = vld [vmem:[%s9737_s3 + $0x80] sm:$0xff]   ;;  %9796 = vst [vmem:[#allocation5_spill] sm:$0xff] %v9795_v10  ;;  %v1172_v11 = vld [vmem:[#allocation2 + $0x51] sm:$0xff] }
  0x1b   : > { %6531 = vmatprep.subr.bf16.mxu1 %v7124_v45 }
  0x1c   : > { %6928 = vmatmul.mubr.msk.bf16.gmra.mxu0 %vm9742_vm0, %v440_v12  ;;  %v1180_v12 = vsel %vm7940_vm2, %v1172_v11, 0.0 }
  0x1d   : > { %6568 = vmatpush3.bf16.msra.mxu0 %v7123_v44  ;;  %v7946_v13 = vpack.c.bf16 %v1180_v12, %v1180_v12 }
  0x1e   : > { %6569 = vmatprep.subr.bf16.mxu0 %v7126_v46  ;;  %6532 = vmatpush3.bf16.msra.mxu1 %v7125_v48 }
  0x1f   : > { %6533 = vmatprep.subr.bf16.mxu1 %v7128_v51  ;;  %1220 = vst [vmem:[#allocation3 + $0x11c] sm:$0xf] %v7946_v13 }
  0x21   : > { %6570 = vmatpush3.bf16.msra.mxu0 %v7127_v49 }
  0x22   : > { %6571 = vmatprep.subr.bf16.mxu0 %v7130_v52  ;;  %6534 = vmatpush3.bf16.msra.mxu1 %v7129_v55 }
  0x23   : > { %6535 = vmatprep.subr.bf16.mxu1 %v7132_v59 }
  0x25   : > { %6572 = vmatpush3.bf16.msra.mxu0 %v7131_v56 }
  0x26   : > { %6573 = vmatprep.subr.bf16.mxu0 %v7134_v60  ;;  %6536 = vmatpush3.bf16.msra.mxu1 %v7133_v62 }
  0x27   : > { %6537 = vmatprep.subr.bf16.mxu1 %v7136_v0 }
  0x29   : > { %6574 = vmatpush3.bf16.msra.mxu0 %v7135_v63 }
  0x2a   : > { %6575 = vmatprep.subr.bf16.mxu0 %v7138_v1  ;;  %6538 = vmatpush3.bf16.msra.mxu1 %v7137_v2 }
  0x2b   : > { %6603 = vmatprep.subr.bf16.mxu1 %v7142_v4 }
  0x2d   : > { %6576 = vmatpush3.bf16.msra.mxu0 %v7139_v3 }
  0x2e   : > { %6577 = vmatprep.subr.bf16.mxu0 %v7143_v5 }
  0x31   : > { %6578 = vmatpush3.bf16.msra.mxu0 %v7145_v6 }
  0x32   : > { %6643 = vmatprep.subr.bf16.mxu0 %v7153_v7 }
  0xd4   : > { %v7784_v14 = vpop.f32.mrf.mxu0 }
  0xd5   : > { %v527_v15 = vmul.f32 %v7784_v14, %v7784_v14 }
  0xd6   : > { %v7788_v16 = vpop.f32.mrf.mxu0 }
  0xd7   : > { %537 = vadd.xlane.f32.xlu1 %v527_v15  ;;  %v525_v17 = vmul.f32 %v7788_v16, %v7788_v16 }
  0xd8   : > { %v7792_v18 = vpop.f32.mrf.mxu0 }
  0xd9   : > { %533 = vadd.xlane.f32.xlu0 %v525_v17  ;;  %v528_v19 = vmul.f32 %v7792_v18, %v7792_v18 }
  0xda   : > { %v7796_v20 = vpop.f32.mrf.mxu0 }
  0xdb   : > { %539 = vadd.xlane.f32.xlu1 %v528_v19  ;;  %v526_v21 = vmul.f32 %v7796_v20, %v7796_v20 }
  0xdc   : > { %v7800_v22 = vpop.f32.mrf.mxu0 }
  0xdd   : > { %535 = vadd.xlane.f32.xlu0 %v526_v21  ;;  %v531_v26 = vmul.f32 %v7800_v22, %v7800_v22 }
  0xde   : > { %v7802_v23 = vpop.f32.mrf.mxu0 }
  0xdf   : > { %v529_v24 = vmul.f32 %v7802_v23, %v7802_v23 }
  0xe0   : > { %v7806_v25 = vpop.f32.mrf.mxu0 }
  0xe1   : > { %541 = vadd.xlane.f32.xlu0 %v529_v24  ;;  %v532_v29 = vmul.f32 %v7806_v25, %v7806_v25 }
  0xe2   : > { %v7810_v27 = vpop.f32.mrf.mxu0 }
  0xe3   : > { %v530_v28 = vmul.f32 %v7810_v27, %v7810_v27 }
  0xe5   : > { %545 = vadd.xlane.f32.xlu0 %v531_v26  ;;  %543 = vadd.xlane.f32.xlu1 %v530_v28 }
  0xe9   : > { %547 = vadd.xlane.f32.xlu1 %v532_v29 }
 0x160   : > { %v538_v15 = vpop.xlane.xlu1 %537 }
 0x161   : > { %7353 = vrsqrt.f32 %v538_v15  ;;  %vm565_vm3 = vcmp.eq.f32.partialorder %v538_v15, inf  ;;  %v568_v32 = vand.u32 2147483648, %v538_v15  ;;  %vm567_vm4 = vcmp.eq.f32.partialorder %v538_v15, 0.0 }
 0x162   : > { %v534_v17 = vpop.xlane.xlu0 %533 }
 0x163   : > { %7355 = vrsqrt.f32 %v534_v17  ;;  %vm551_vm5 = vcmp.eq.f32.partialorder %v534_v17, inf  ;;  %vm553_vm6 = vcmp.eq.f32.partialorder %v534_v17, 0.0  ;;  %v554_v37 = vand.u32 2147483648, %v534_v17 }
 0x164   : > { %v540_v19 = vpop.xlane.xlu1 %539 }
 0x165   : > { %7357 = vrsqrt.f32 %v540_v19  ;;  %vm572_vm7 = vcmp.eq.f32.partialorder %v540_v19, inf  ;;  %vm574_vm8 = vcmp.eq.f32.partialorder %v540_v19, 0.0  ;;  %v575_v44 = vand.u32 2147483648, %v540_v19 }
 0x166   : > { %v536_v21 = vpop.xlane.xlu0 %535 }
 0x167   : > { %7359 = vrsqrt.f32 %v536_v21  ;;  %vm558_vm9 = vcmp.eq.f32.partialorder %v536_v21, inf  ;;  %vm560_vm10 = vcmp.eq.f32.partialorder %v536_v21, 0.0  ;;  %v561_v52 = vand.u32 2147483648, %v536_v21 }
 0x16a   : > { %v542_v24 = vpop.xlane.xlu0 %541 }
 0x16b   : > { %7361 = vrsqrt.f32 %v542_v24  ;;  %vm579_vm11 = vcmp.eq.f32.partialorder %v542_v24, inf  ;;  %v582_v0 = vand.u32 2147483648, %v542_v24  ;;  %vm581_vm12 = vcmp.eq.f32.partialorder %v542_v24, 0.0 }
 0x16e   : > { %v7354_v26 = vpop.eup %7353  ;;  %v7949_v28 = vpop.xlane.xlu0 %545 }
 0x16f   : > { %v7951_v29 = vpop.xlane.xlu1 %543  ;;  %v564_v30 = vmul.f32 %v7354_v26, %v538_v15  ;;  %7363 = vrsqrt.f32 %v7949_v28  ;;  %vm593_vm13 = vcmp.eq.f32.partialorder %v7949_v28, inf  ;;  %vm595_vm14 = vcmp.eq.f32.partialorder %v7949_v28, 0.0 }
 0x170   : > { %v7356_v31 = vpop.eup %7355  ;;  %7365 = vrsqrt.f32 %v7951_v29  ;;  %v596_v11 = vand.u32 2147483648, %v7949_v28  ;;  %vm586_vm15 = vcmp.eq.f32.partialorder %v7951_v29, inf }
 0x171   : > { %v566_v33 = vsel %vm565_vm3, %v538_v15, %v564_v30  ;;  %v550_v34 = vmul.f32 %v7356_v31, %v534_v17  ;;  %vm588_vm3 = vcmp.eq.f32.partialorder %v7951_v29, 0.0 }
 0x172   : > { %v7358_v35 = vpop.eup %7357  ;;  %v569_v36 = vsel %vm567_vm4, %v568_v32, %v566_v33 }
 0x173   : > { %v7955_v38 = vpop.xlane.xlu1 %547  ;;  %v607_v39 = vmul.f32 0.17677669, %v569_v36  ;;  %v552_v40 = vsel %vm551_vm5, %v534_v17, %v550_v34  ;;  %v571_v41 = vmul.f32 %v7358_v35, %v540_v19 }
 0x174   : > { %7367 = vrsqrt.f32 %v7955_v38  ;;  %v7360_v42 = vpop.eup %7359  ;;  %v555_v43 = vsel %vm553_vm6, %v554_v37, %v552_v40  ;;  %vm600_vm4 = vcmp.eq.f32.partialorder %v7955_v38, inf  ;;  %vm602_vm5 = vcmp.eq.f32.partialorder %v7955_v38, 0.0 }
 0x175   : > { %v615_v45 = vadd.f32 0.0001, %v607_v39  ;;  %v605_v46 = vmul.f32 0.17677669, %v555_v43  ;;  %v573_v48 = vsel %vm572_vm7, %v540_v19, %v571_v41  ;;  %v557_v49 = vmul.f32 %v7360_v42, %v536_v21 }
 0x176   : > { %v576_v51 = vsel %vm574_vm8, %v575_v44, %v573_v48  ;;  %v589_v19 = vand.u32 2147483648, %v7951_v29  ;;  %vm8022_vm7 = vcmp.lt.s32.totalorder %v319_v50, 7 }
 0x177   : > { %7369 = vrcp.f32 %v615_v45  ;;  %v613_v54 = vadd.f32 0.0001, %v605_v46  ;;  %v608_v55 = vmul.f32 0.17677669, %v576_v51  ;;  %v559_v56 = vsel %vm558_vm9, %v536_v21, %v557_v49 }
 0x178   : > { %v7362_v57 = vpop.eup %7361  ;;  %v562_v59 = vsel %vm560_vm10, %v561_v52, %v559_v56 }
 0x179   : > { %7371 = vrcp.f32 %v613_v54  ;;  %v616_v60 = vadd.f32 0.0001, %v608_v55  ;;  %v606_v62 = vmul.f32 0.17677669, %v562_v59  ;;  %v578_v63 = vmul.f32 %v7362_v57, %v542_v24 }
 0x17b   : > { %7373 = vrcp.f32 %v616_v60  ;;  %v614_v1 = vadd.f32 0.0001, %v606_v62  ;;  %v580_v2 = vsel %vm579_vm11, %v542_v24, %v578_v63 }
 0x17c   : > { %v7364_v3 = vpop.eup %7363  ;;  %v583_v4 = vsel %vm581_vm12, %v582_v0, %v580_v2 }
 0x17d   : > { %v7366_v5 = vpop.eup %7365  ;;  %7375 = vrcp.f32 %v614_v1  ;;  %v609_v6 = vmul.f32 0.17677669, %v583_v4  ;;  %v592_v7 = vmul.f32 %v7364_v3, %v7949_v28 }
 0x17e   : > { %v585_v12 = vmul.f32 %v7366_v5, %v7951_v29 }
 0x17f   : > { %v617_v15 = vadd.f32 0.0001, %v609_v6  ;;  %v594_v17 = vsel %vm593_vm13, %v7949_v28, %v592_v7  ;;  %v603_v28 = vand.u32 2147483648, %v7955_v38 }
 0x180   : > { %v597_v24 = vsel %vm595_vm14, %v596_v11, %v594_v17  ;;  %v587_v26 = vsel %vm586_vm15, %v7951_v29, %v585_v12 }
 0x181   : > { %v7368_v21 = vpop.eup %7367  ;;  %7377 = vrcp.f32 %v617_v15  ;;  %v611_v30 = vmul.f32 0.17677669, %v597_v24  ;;  %v590_v31 = vsel %vm588_vm3, %v589_v19, %v587_v26 }
 0x182   : > { %v599_v32 = vmul.f32 %v7368_v21, %v7955_v38  ;;  %v610_v33 = vmul.f32 0.17677669, %v590_v31 }
 0x183   : > { %v619_v34 = vadd.f32 0.0001, %v611_v30 }
 0x184   : > { %v601_v35 = vsel %vm600_vm4, %v7955_v38, %v599_v32  ;;  %v7370_v36 = vpop.eup %7369  ;;  %v618_v37 = vadd.f32 0.0001, %v610_v33  ;;  %v308_v32 = vadd.s32 8, %v7864_v47  ;;  %v309_v33 = vadd.s32 16, %v7864_v47 }
 0x185   : > { %v604_v39 = vsel %vm602_vm5, %v603_v28, %v601_v35  ;;  %v7974_v29 = vmul.f32 %v7370_v36, %v7784_v14  ;;  %7379 = vrcp.f32 %v619_v34  ;;  %v310_v28 = vadd.s32 24, %v7864_v47 }
 0x186   : > { %v612_v40 = vmul.f32 0.17677669, %v604_v39  ;;  %v7372_v41 = vpop.eup %7371  ;;  %7381 = vrcp.f32 %v618_v37  ;;  %v311_v39 = vadd.s32 32, %v7864_v47  ;;  %vm8098_vm5 = vcmp.ge.s32.totalorder %v368_v9, 1 }
 0x187   : > { %9797 = vst [vmem:[#allocation6_spill] sm:$0xff] %v7974_v29  ;;  %v5951_v42 = vmul.f32 -1.442695, %v7974_v29  ;;  %v7978_v43 = vmul.f32 %v7372_v41, %v7788_v16  ;;  %v9844_v9 = vmov 0 }
 0x188   : > { %v620_v44 = vadd.f32 0.0001, %v612_v40  ;;  %v7374_v45 = vpop.eup %7373  ;;  %v312_v40 = vadd.s32 40, %v7864_v47 }
 0x189   : > { %9798 = vst [vmem:[#allocation7_spill] sm:$0xff] %v7978_v43  ;;  %7383 = vpow2.f32 %v5951_v42  ;;  %v5949_v38 = vmul.f32 -1.442695, %v7978_v43  ;;  %v7982_v46 = vmul.f32 %v7374_v45, %v7792_v18  ;;  %v326_v45 = vand.u32 7, %v308_v32 }
 0x18a   : > { %v7376_v48 = vpop.eup %7375  ;;  %7385 = vrcp.f32 %v620_v44 }
 0x18b   : > { %9799 = vst [vmem:[#allocation8_spill] sm:$0xff] %v7982_v46  ;;  %7387 = vpow2.f32 %v5949_v38  ;;  %v5952_v14 = vmul.f32 -1.442695, %v7982_v46  ;;  %v7986_v49 = vmul.f32 %v7376_v48, %v7796_v20  ;;  %v333_v38 = vand.u32 7, %v309_v33 }
 0x18c   : > { %v340_v48 = vand.u32 7, %v310_v28  ;;  %vm8016_vm6 = vcmp.ge.s32.totalorder %v326_v45, 1  ;;  %vm8036_vm10 = vcmp.lt.s32.totalorder %v326_v45, 7 }
 0x18d   : > { %9800 = vst [vmem:[#allocation9_spill] sm:$0xff] %v7986_v49  ;;  %7389 = vpow2.f32 %v5952_v14  ;;  %v5950_v16 = vmul.f32 -1.442695, %v7986_v49  ;;  %vm8026_vm8 = vcmp.ge.s32.totalorder %v333_v38, 1  ;;  %vm8044_vm12 = vcmp.lt.s32.totalorder %v333_v38, 7 }
 0x18e   : > { %v7378_v51 = vpop.eup %7377  ;;  %vm8030_vm9 = vcmp.ge.s32.totalorder %v340_v48, 1  ;;  %vm8040_vm11 = vcmp.lt.s32.totalorder %v340_v48, 7  ;;  %v9838_v48 = vmov 0 }
 0x18f   : > { %7391 = vpow2.f32 %v5950_v16  ;;  %v7990_v52 = vmul.f32 %v7378_v51, %v7802_v23 }
 0x191   : > { %9801 = vst [vmem:[#allocation10_spill] sm:$0xff] %v7990_v52  ;;  %v5953_v54 = vmul.f32 -1.442695, %v7990_v52 }
 0x192   : > { %v7380_v18 = vpop.eup %7379 }
 0x193   : > { %v7382_v55 = vpop.eup %7381  ;;  %7393 = vpow2.f32 %v5953_v54  ;;  %v7994_v56 = vmul.f32 %v7380_v18, %v7800_v22  ;;  %v347_v54 = vand.u32 7, %v311_v39  ;;  %v354_v18 = vand.u32 7, %v312_v40 }
 0x194   : > { %v7997_v57 = vmul.f32 %v7382_v55, %v7810_v27  ;;  %v313_v55 = vadd.s32 48, %v7864_v47  ;;  %v9820_v47 = vmov 0 }
 0x195   : > { %9802 = vst [vmem:[#allocation11_spill] sm:$0xff] %v7994_v56  ;;  %v5955_v20 = vmul.f32 -1.442695, %v7994_v56  ;;  %v9821_v47 = vsel %vm8040_vm11, 4294967295, %v9820_v47  ;;  %vm8048_vm13 = vcmp.ge.s32.totalorder %v347_v54, 1  ;;  %vm8052_vm14 = vcmp.ge.s32.totalorder %v354_v18, 1 }
 0x196   : > { %9803 = vst [vmem:[#allocation12_spill] sm:$0xff] %v7997_v57  ;;  %v7384_v59 = vpop.eup %7383  ;;  %v5954_v60 = vmul.f32 -1.442695, %v7997_v57  ;;  %9822 = vst [vmem:[#allocation19_spill] sm:$0xff] %v9821_v47  ;;  %vm8056_vm15 = vcmp.lt.s32.totalorder %v347_v54, 7  ;;  %vm8084_vm3 = vcmp.lt.s32.totalorder %v354_v18, 7 }
 0x197   : > { %v7386_v62 = vpop.eup %7385  ;;  %v663_v63 = vadd.f32 1.0, %v7384_v59  ;;  %7395 = vpow2.f32 %v5955_v20 }
 0x198   : > { %v7388_v23 = vpop.eup %7387  ;;  %7397 = vpow2.f32 %v5954_v60  ;;  %v8002_v0 = vmul.f32 %v7386_v62, %v7806_v25  ;;  %v9805_v60 = vmov 0  ;;  %v9808_v62 = vmov 0 }
 0x199   : > { %7399 = vrcp.f32 %v663_v63  ;;  %v661_v1 = vadd.f32 1.0, %v7388_v23  ;;  %v9806_v60 = vsel %vm8016_vm6, 4294967295, %v9805_v60  ;;  %v9809_v62 = vsel %vm8022_vm7, 4294967295, %v9808_v62 }
 0x19a   : > { %9804 = vst [vmem:[#allocation13_spill] sm:$0xff] %v8002_v0  ;;  %v7390_v22 = vpop.eup %7389  ;;  %v5956_v2 = vmul.f32 -1.442695, %v8002_v0  ;;  %9807 = vst [vmem:[#allocation14_spill] sm:$0xff] %v9806_v60  ;;  %v9811_v63 = vmov 0  ;;  %v9814_v23 = vmov 0 }
 0x19b   : > { %7401 = vrcp.f32 %v661_v1  ;;  %v664_v27 = vadd.f32 1.0, %v7390_v22  ;;  %9810 = vst [vmem:[#allocation15_spill] sm:$0xff] %v9809_v62  ;;  %v9812_v63 = vsel %vm8026_vm8, 4294967295, %v9811_v63  ;;  %v9815_v23 = vsel %vm8030_vm9, 4294967295, %v9814_v23 }
 0x19c   : > { %v7392_v3 = vpop.eup %7391  ;;  %7403 = vpow2.f32 %v5956_v2  ;;  %9813 = vst [vmem:[#allocation16_spill] sm:$0xff] %v9812_v63  ;;  %9816 = vst [vmem:[#allocation17_spill] sm:$0xff] %v9815_v23  ;;  %v9817_v2 = vmov 0 }
 0x19d   : > { %7405 = vrcp.f32 %v664_v27  ;;  %v662_v4 = vadd.f32 1.0, %v7392_v3  ;;  %v9818_v2 = vsel %vm8036_vm10, 4294967295, %v9817_v2 }
 0x19e   : > { %9819 = vst [vmem:[#allocation18_spill] sm:$0xff] %v9818_v2 }
 0x19f   : > { %7407 = vrcp.f32 %v662_v4 }
 0x1a0   : > { %v7394_v5 = vpop.eup %7393 }
 0x1a1   : > { %v665_v6 = vadd.f32 1.0, %v7394_v5  ;;  %v9823_v5 = vmov 0 }
 0x1a2   : > { %v9824_v5 = vsel %vm8044_vm12, 4294967295, %v9823_v5 }
 0x1a3   : > { %7409 = vrcp.f32 %v665_v6  ;;  %9825 = vst [vmem:[#allocation20_spill] sm:$0xff] %v9824_v5  ;;  %v9826_v6 = vmov 0 }
 0x1a4   : > { %v7396_v7 = vpop.eup %7395  ;;  %v9827_v6 = vsel %vm8048_vm13, 4294967295, %v9826_v6 }
 0x1a5   : > { %v7398_v11 = vpop.eup %7397  ;;  %v667_v12 = vadd.f32 1.0, %v7396_v7  ;;  %9828 = vst [vmem:[#allocation21_spill] sm:$0xff] %v9827_v6  ;;  %v9829_v7 = vmov 0 }
 0x1a6   : > { %v7400_v25 = vpop.eup %7399  ;;  %v666_v15 = vadd.f32 1.0, %v7398_v11  ;;  %v9830_v7 = vsel %vm8052_vm14, 4294967295, %v9829_v7  ;;  %v9832_v11 = vmov 0 }
 0x1a7   : > { %v687_v17 = vmul.f32 %v7400_v25, %v7974_v29  ;;  %7411 = vrcp.f32 %v667_v12  ;;  %9831 = vst [vmem:[#allocation22_spill] sm:$0xff] %v9830_v7  ;;  %v9833_v11 = vsel %vm8056_vm15, 4294967295, %v9832_v11  ;;  %v361_v12 = vand.u32 7, %v313_v55 }
 0x1a8   : > { %v7402_v19 = vpop.eup %7401  ;;  %7413 = vrcp.f32 %v666_v15  ;;  %9834 = vst [vmem:[#allocation23_spill] sm:$0xff] %v9833_v11 }
 0x1a9   : > { %v7404_v21 = vpop.eup %7403  ;;  %v695_v24 = vmul.f32 1.6778524, %v687_v17  ;;  %v685_v26 = vmul.f32 %v7402_v19, %v7978_v43  ;;  %vm8092_vm4 = vcmp.ge.s32.totalorder %v361_v12, 1  ;;  %vm8114_vm0 = vcmp.lt.s32.totalorder %v361_v12, 7 }
 0x1aa   : > { %v7406_v30 = vpop.eup %7405  ;;  %v668_v31 = vadd.f32 1.0, %v7404_v21  ;;  %v9839_v48 = vsel %vm8092_vm4, 4294967295, %v9838_v48  ;;  %v9845_v9 = vsel %vm8114_vm0, 4294967295, %v9844_v9 }
 0x1ab   : > { %703 = vst [vmem:[#allocation2 + $0x20] sm:$0xff] %v695_v24  ;;  %v693_v34 = vmul.f32 1.6778524, %v685_v26  ;;  %v688_v35 = vmul.f32 %v7406_v30, %v7982_v46  ;;  %v6385_v36 = vpack.c.bf16 %v695_v24, %v695_v24  ;;  %9840 = vst [vmem:[#allocation25_spill] sm:$0xff] %v9839_v48 }
 0x1ac   : > { %v7408_v37 = vpop.eup %7407  ;;  %7415 = vrcp.f32 %v668_v31  ;;  %9846 = vst [vmem:[#allocation27_spill] sm:$0xff] %v9845_v9 }
 0x1ad   : > { %701 = vst [vmem:[#allocation2 + $0x10] sm:$0xff] %v693_v34  ;;  %v696_v41 = vmul.f32 1.6778524, %v688_v35  ;;  %v686_v42 = vmul.f32 %v7408_v37, %v7986_v49  ;;  %v6383_v44 = vpack.c.bf16 %v693_v34, %v693_v34  ;;  %824 = vst [vmem:[#allocation3 + $0x70] sm:$0xf] %v6385_v36  ;;  %v9835_v37 = vmov 0 }
 0x1ae   : > { %v9836_v37 = vsel %vm8084_vm3, 4294967295, %v9835_v37 }
 0x1af   : > { %704 = vst [vmem:[#allocation2 + $0x28] sm:$0xff] %v696_v41  ;;  %v694_v14 = vmul.f32 1.6778524, %v686_v42  ;;  %822 = vst [vmem:[#allocation3 + $0x28] sm:$0xf] %v6383_v44  ;;  %v6386_v16 = vpack.c.bf16 %v696_v41, %v696_v41 }
 0x1b0   : > { %v7410_v51 = vpop.eup %7409  ;;  %9837 = vst [vmem:[#allocation24_spill] sm:$0xff] %v9836_v37 }
 0x1b1   : > { %702 = vst [vmem:[#allocation2 + $0x18] sm:$0xff] %v694_v14  ;;  %v689_v20 = vmul.f32 %v7410_v51, %v7990_v52  ;;  %v6384_v59 = vpack.c.bf16 %v694_v14, %v694_v14  ;;  %825 = vst [vmem:[#allocation3 + $0x94] sm:$0xf] %v6386_v16  ;;  %v9841_v14 = vmov 0 }
 0x1b2   : > { %v1118_v1 = vld [vmem:[#allocation2 + $0x20] sm:$0xff]  ;;  %v9842_v14 = vsel %vm8098_vm5, 4294967295, %v9841_v14 }
 0x1b3   : > { %v8034_v22 = vmul.f32 1.6778524, %v689_v20  ;;  %823 = vst [vmem:[#allocation3 + $0x4c] sm:$0xf] %v6384_v59  ;;  %v6431_v50 = vpack.c.bf16 %v1118_v1, %v1118_v1  ;;  %9843 = vst [vmem:[#allocation26_spill] sm:$0xff] %v9842_v14 }
 0x1b4   : > { %v7412_v27 = vpop.eup %7411  ;;  %v710_v3 = vld [vmem:[#allocation2 + $0xf] sm:$0xff] }
 0x1b5   : > { %v829_v4 = vld [vmem:[#allocation2 + $0x9] sm:$0xff]  ;;  %v7414_v25 = vpop.eup %7413  ;;  %705 = vst [vmem:[#allocation2 + $0x30] sm:$0xff] %v8034_v22  ;;  %v691_v15 = vmul.f32 %v7412_v27, %v7994_v56  ;;  %v734_v17 = vsel %vm8016_vm6, %v710_v3, 0.0  ;;  %v909_v21 = vsel %vm7881_vm1, %v710_v3, 0.0  ;;  %1158 = vst [vmem:[#allocation3 + $0x40] sm:$0xf] %v6431_v50 }
 0x1b6   : > { %v853_v19 = vsel %vm8022_vm7, %v829_v4, 0.0  ;;  %999 = vst [vmem:[#allocation3 + $0x58] sm:$0xf] %v6431_v50  ;;  %v690_v24 = vmul.f32 %v7414_v25, %v7997_v57  ;;  %v6375_v26 = vpack.c.bf16 %v734_v17, %v734_v17  ;;  %v6398_v31 = vpack.c.bf16 %v909_v21, %v909_v21  ;;  %v8069_v32 = vld [vmem:[#allocation2 + $0x21] sm:$0xff] }
 0x1b7   : > { %v6390_v30 = vpack.c.bf16 %v853_v19, %v853_v19  ;;  %v8071_v33 = vld [vmem:[#allocation2 + $0x27] sm:$0xff]  ;;  %v8073_v28 = vmul.f32 1.6778524, %v691_v15  ;;  %v856_v34 = vsel %vm8040_vm11, %v8069_v32, 0.0 }
 0x1b8   : > { %v912_v35 = vsel %vm8030_vm9, %v8071_v33, 0.0  ;;  %v737_v36 = vsel %vm8048_vm13, %v8071_v33, 0.0  ;;  %v8088_v39 = vmul.f32 1.6778524, %v690_v24  ;;  %774 = vst [vmem:[#allocation3 + $0x24] sm:$0xf] %v6375_v26  ;;  %v6393_v44 = vpack.c.bf16 %v856_v34, %v856_v34 }
 0x1b9   : > { %893 = vst [vmem:[#allocation3 + $0x8] sm:$0xf] %v6390_v30  ;;  %949 = vst [vmem:[#allocation3 + $0xc] sm:$0xf] %v6398_v31  ;;  %v1005_v40 = vld [vmem:[#allocation2 + $0x11] sm:$0xff]  ;;  %v8090_v42 = vld [vmem:[#allocation2 + $0x19] sm:$0xff]  ;;  %v6401_v45 = vpack.c.bf16 %v912_v35, %v912_v35  ;;  %v6378_v38 = vpack.c.bf16 %v737_v36, %v737_v36  ;;  %v7416_v16 = vpop.eup %7415  ;;  %v6387_v35 = vpack.c.bf16 %v8034_v22, %v8034_v22 }
 0x1ba   : > { %v1061_v41 = vld [vmem:[#allocation2 + $0x17] sm:$0xff]  ;;  %707 = vst [vmem:[#allocation2 + $0x40] sm:$0xff] %v8073_v28  ;;  %v1013_v51 = vsel %vm8022_vm7, %v1005_v40, 0.0  ;;  %v1173_v18 = vsel %vm8022_vm7, %v8090_v42, 0.0  ;;  %v8110_v55 = vld [vmem:[#allocation2 + $0x1f] sm:$0xff]  ;;  %706 = vst [vmem:[#allocation2 + $0x38] sm:$0xff] %v8088_v39  ;;  %v692_v20 = vmul.f32 %v7416_v16, %v8002_v0 }
 0x1bb   : > { %v1069_v54 = vsel %vm7881_vm1, %v1061_v41, 0.0  ;;  %v735_v8 = vsel %vm8026_vm8, %v1061_v41, 0.0  ;;  %v6414_v59 = vpack.c.bf16 %v1013_v51, %v1013_v51  ;;  %v6438_v50 = vpack.c.bf16 %v1173_v18, %v1173_v18  ;;  %896 = vst [vmem:[#allocation3 + $0x74] sm:$0xf] %v6393_v44  ;;  %952 = vst [vmem:[#allocation3 + $0x78] sm:$0xf] %v6401_v45 }
 0x1bc   : > { %v6422_v1 = vpack.c.bf16 %v1069_v54, %v1069_v54  ;;  %777 = vst [vmem:[#allocation3 + $0x90] sm:$0xf] %v6378_v38  ;;  %v736_v27 = vsel %vm8030_vm9, %v8110_v55, 0.0  ;;  %v6376_v3 = vpack.c.bf16 %v735_v8, %v735_v8  ;;  %v854_v4 = vsel %vm8036_vm10, %v1005_v40, 0.0  ;;  %v8127_v21 = vld [vmem:[#allocation2 + $0x2f] sm:$0xff]  ;;  %v1221_v26 = vld [vmem:[#allocation3] sm:$0xff] }
 0x1bd   : > { %v910_v12 = vsel %vm8016_vm6, %v1061_v41, 0.0  ;;  %v700_v25 = vmul.f32 1.6778524, %v692_v20  ;;  %1053 = vst [vmem:[#allocation3 + $0x14] sm:$0xf] %v6414_v59  ;;  %v6377_v15 = vpack.c.bf16 %v736_v27, %v736_v27  ;;  %v6391_v17 = vpack.c.bf16 %v854_v4, %v854_v4  ;;  %v8129_v24 = vld [vmem:[#allocation2 + $0x29] sm:$0xff] }
 0x1be   : > { %1109 = vst [vmem:[#allocation3 + $0x18] sm:$0xf] %v6422_v1  ;;  %1213 = vst [vmem:[#allocation3 + $0x20] sm:$0xf] %v6438_v50  ;;  %v6399_v19 = vpack.c.bf16 %v910_v12, %v910_v12  ;;  %v855_v30 = vsel %vm8044_vm12, %v8090_v42, 0.0  ;;  %v911_v31 = vsel %vm8026_vm8, %v8110_v55, 0.0  ;;  %v6388_v20 = vpack.c.bf16 %v8088_v39, %v8088_v39 }
 0x1bf   : > { %775 = vst [vmem:[#allocation3 + $0x48] sm:$0xf] %v6376_v3  ;;  %v738_v34 = vsel %vm8052_vm14, %v8127_v21, 0.0  ;;  %v957_v36 = vld [vmem:[#allocation2 + $0x10] sm:$0xff]  ;;  %v958_v40 = vld [vmem:[#allocation2 + $0x18] sm:$0xff]  ;;  %708 = vst [vmem:[#allocation2 + $0x48] sm:$0xff] %v700_v25  ;;  %v6392_v44 = vpack.c.bf16 %v855_v30, %v855_v30  ;;  %v6400_v45 = vpack.c.bf16 %v911_v31, %v911_v31  ;;  %v6389_v59 = vpack.c.bf16 %v8073_v28, %v8073_v28 }
 0x1c0   : > { %v7144_v41 = vld [vmem:[%s9737_s3 + $0x138] sm:$0xff]   ;;  %776 = vst [vmem:[#allocation3 + $0x6c] sm:$0xf] %v6377_v15  ;;  %894 = vst [vmem:[#allocation3 + $0x2c] sm:$0xf] %v6391_v17  ;;  %v6379_v38 = vpack.c.bf16 %v738_v34, %v738_v34  ;;  %v857_v16 = vsel %vm8056_vm15, %v8129_v24, 0.0  ;;  %v6406_v3 = vpack.c.bf16 %v957_v36, %v957_v36  ;;  %v6407_v4 = vpack.c.bf16 %v958_v40, %v958_v40 }
 0x1c1   : > { %950 = vst [vmem:[#allocation3 + $0x30] sm:$0xf] %v6399_v19  ;;  %v960_v51 = vld [vmem:[#allocation2 + $0x28] sm:$0xff]  ;;  %826 = vst [vmem:[#allocation3 + $0xb8] sm:$0xf] %v6387_v35  ;;  %v6394_v18 = vpack.c.bf16 %v857_v16, %v857_v16  ;;  %v913_v8 = vsel %vm8048_vm13, %v8127_v21, 0.0 }
 0x1c2   : > { %v1226_v54 = vld [vmem:[#allocation3 + $0x24] sm:$0xff]  ;;  %2481 = vst [vmem:[#allocation3] sm:$0xf] %v7893_v58  ;;  %v7150_v50 = vld [vmem:[%s9737_s3 + $0x170] sm:$0xff]   ;;  %895 = vst [vmem:[#allocation3 + $0x50] sm:$0xf] %v6392_v44  ;;  %v6402_v27 = vpack.c.bf16 %v913_v8, %v913_v8  ;;  %v6409_v12 = vpack.c.bf16 %v960_v51, %v960_v51 }
 0x1c3   : > { %v7140_v22 = vld [vmem:[#allocation3 + $0x4] ss:$36 sps:$4 sm:$0xff]   ;;  %v6029_v1 = vcombine.low %v1221_v26, %v1226_v54  ;;  %951 = vst [vmem:[#allocation3 + $0x54] sm:$0xf] %v6400_v45  ;;  %778 = vst [vmem:[#allocation3 + $0xb4] sm:$0xf] %v6379_v38 }
 0x1c4   : > { %2529 = vst [vmem:[#allocation3 + $0x4] sm:$0xf] %v7715_v61  ;;  %2053 = vmatprep.mubr.bf16.mxu1 %v7140_v22  ;;  %v7152_v28 = vld [vmem:[%s9737_s3 + $0x130] sm:$0xff]   ;;  %897 = vst [vmem:[#allocation3 + $0x98] sm:$0xf] %v6394_v18  ;;  %v1014_v58 = vsel %vm8036_vm10, %v8090_v42, 0.0 }
 0x1c5   : > { %v8163_v39 = vld [vmem:[#allocation2 + $0x31] sm:$0xff]  ;;  %827 = vst [vmem:[#allocation3 + $0xdc] sm:$0xf] %v6388_v20  ;;  %828 = vst [vmem:[#allocation3 + $0x100] sm:$0xf] %v6389_v59  ;;  %v1070_v61 = vsel %vm8016_vm6, %v8110_v55, 0.0  ;;  %2054 = vmatmul.mubr.bf16.vlgmr.msra.gmra.mxu1 %v6029_v1  ;;  %v6415_v55 = vpack.c.bf16 %v1014_v58, %v1014_v58 }
 0x1c6   : > { %v1015_v25 = vsel %vm8044_vm12, %v8069_v32, 0.0  ;;  %v858_v15 = vsel %vm8084_vm3, %v8163_v39, 0.0  ;;  %v8177_v17 = vld [vmem:[#allocation2 + $0x37] sm:$0xff]  ;;  %953 = vst [vmem:[#allocation3 + $0x9c] sm:$0xf] %v6402_v27  ;;  %v8179_v19 = vld [vmem:[#allocation2 + $0x3f] sm:$0xff]  ;;  %v6423_v26 = vpack.c.bf16 %v1070_v61, %v1070_v61  ;;  %6604 = vmatpush3.bf16.msra.mxu1 %v7144_v41 }
 0x1c7   : > { %v8181_v42 = vld [vmem:[#allocation2 + $0x39] sm:$0xff]  ;;  %997 = vst [vmem:[#allocation3 + $0x10] sm:$0xf] %v6406_v3  ;;  %998 = vst [vmem:[#allocation3 + $0x34] sm:$0xf] %v6407_v4  ;;  %v1016_v30 = vsel %vm8040_vm11, %v8129_v24, 0.0  ;;  %v6395_v31 = vpack.c.bf16 %v858_v15, %v858_v15  ;;  %6605 = vmatprep.subr.bf16.mxu1 %v7150_v50  ;;  %v6416_v1 = vpack.c.bf16 %v1015_v25, %v1015_v25 }
 0x1c8   : > { %1157 = vst [vmem:[#allocation3 + $0x1c] sm:$0xf] %v6407_v4  ;;  %v914_v34 = vsel %vm8052_vm14, %v8177_v17, 0.0  ;;  %v739_v35 = vsel %vm8092_vm4, %v8177_v17, 0.0  ;;  %v740_v36 = vsel %vm8098_vm5, %v8179_v19, 0.0  ;;  %v1120_v40 = vld [vmem:[#allocation2 + $0x30] sm:$0xff]  ;;  %v6417_v50 = vpack.c.bf16 %v1016_v30, %v1016_v30 }
 0x1c9   : > { %1000 = vst [vmem:[#allocation3 + $0x7c] sm:$0xf] %v6409_v12  ;;  %1159 = vst [vmem:[#allocation3 + $0x64] sm:$0xf] %v6409_v12  ;;  %v8195_v44 = vld [vmem:[#allocation3 + $0x48] sm:$0xff]  ;;  %v7156_v41 = vld [vmem:[%s9737_s3 + $0x1b8] sm:$0xff]   ;;  %v6403_v38 = vpack.c.bf16 %v914_v34, %v914_v34  ;;  %v6380_v16 = vpack.c.bf16 %v739_v35, %v739_v35  ;;  %v6381_v51 = vpack.c.bf16 %v740_v36, %v740_v36 }
 0x1ca   : > { %v7157_v45 = vld [vmem:[%s9737_s3 + $0x168] sm:$0xff]   ;;  %v859_v54 = vsel %vm8114_vm0, %v8181_v42, 0.0  ;;  %1054 = vst [vmem:[#allocation3 + $0x38] sm:$0xf] %v6415_v55  ;;  %1110 = vst [vmem:[#allocation3 + $0x3c] sm:$0xf] %v6423_v26  ;;  %v6433_v15 = vpack.c.bf16 %v1120_v40, %v1120_v40  ;;  %6606 = vmatpush3.bf16.msra.mxu1 %v7152_v28 }
 0x1cb   : > { %v962_v22 = vld [vmem:[#allocation2 + $0x38] sm:$0xff]  ;;  %v1236_v18 = vld [vmem:[#allocation3 + $0x6c] sm:$0xff]  ;;  %898 = vst [vmem:[#allocation3 + $0xbc] sm:$0xf] %v6395_v31  ;;  %v6396_v20 = vpack.c.bf16 %v859_v54, %v859_v54  ;;  %v915_v59 = vsel %vm8092_vm4, %v8179_v19, 0.0  ;;  %v8212_v58 = vld [vmem:[#allocation2 + $0x41] sm:$0xff]  ;;  %6607 = vmatprep.subr.bf16.mxu1 %v7157_v45 }
 0x1cc   : > { %v7146_v8 = vld [vmem:[#allocation3 + $0x4c] ss:$36 sps:$4 sm:$0xff]   ;;  %954 = vst [vmem:[#allocation3 + $0xc0] sm:$0xf] %v6403_v38  ;;  %779 = vst [vmem:[#allocation3 + $0xd8] sm:$0xf] %v6380_v16  ;;  %v6404_v61 = vpack.c.bf16 %v915_v59, %v915_v59  ;;  %v6038_v34 = vcombine.low %v8195_v44, %v1236_v18 }
 0x1cd   : > { %v7148_v27 = vld [vmem:[#allocation3 + $0xc] ss:$36 sps:$4 sm:$0xff]   ;;  %780 = vst [vmem:[#allocation3 + $0xfc] sm:$0xf] %v6381_v51  ;;  %v1071_v12 = vsel %vm8026_vm8, %v8071_v33, 0.0  ;;  %2061 = vmatprep.mubr.bf16.mxu1 %v7146_v8  ;;  %v860_v55 = vsel %vm7940_vm2, %v8212_v58, 0.0  ;;  %v6411_v33 = vpack.c.bf16 %v962_v22, %v962_v22 }
 0x1ce   : > { %v7151_v3 = vld [vmem:[#allocation3 + $0x8] ss:$36 sps:$4 sm:$0xff]   ;;  %v7159_v25 = vld [vmem:[%s9737_s3 + $0x1f0] sm:$0xff]   ;;  %899 = vst [vmem:[#allocation3 + $0xe0] sm:$0xf] %v6396_v20  ;;  %v1072_v26 = vsel %vm8030_vm9, %v8127_v21, 0.0  ;;  %v6424_v30 = vpack.c.bf16 %v1071_v12, %v1071_v12  ;;  %2118 = vmatprep.mubr.bf16.mxu0 %v7148_v27  ;;  %v6397_v40 = vpack.c.bf16 %v860_v55, %v860_v55  ;;  %2062 = vmatmul.mubr.bf16.gmra.mxu1 %v6038_v34 }
 0x1cf   : > { %v7158_v4 = vld [vmem:[%s9737_s3 + $0x128] sm:$0xff]   ;;  %1055 = vst [vmem:[#allocation3 + $0x5c] sm:$0xf] %v6416_v1  ;;  %1056 = vst [vmem:[#allocation3 + $0x80] sm:$0xf] %v6417_v50  ;;  %v1122_v31 = vld [vmem:[#allocation2 + $0x40] sm:$0xff]  ;;  %v6425_v16 = vpack.c.bf16 %v1072_v26, %v1072_v26  ;;  %2119 = vmatmul.mubr.bf16.vlgmr.msra.gmra.mxu0 %v7151_v3 }
 0x1d0   : > { %v7154_v28 = vld [vmem:[#allocation3 + $0x54] ss:$36 sps:$4 sm:$0xff]   ;;  %v908_v38 = vld [vmem:[#allocation2 + $0x47] sm:$0xff]  ;;  %955 = vst [vmem:[#allocation3 + $0xe4] sm:$0xf] %v6404_v61  ;;  %v1017_v21 = vsel %vm8056_vm15, %v8163_v39, 0.0  ;;  %6644 = vmatpush3.bf16.msra.mxu0 %v7156_v41  ;;  %v6435_v3 = vpack.c.bf16 %v1122_v31, %v1122_v31  ;;  %6608 = vmatpush3.bf16.msra.mxu1 %v7158_v4 }
 0x1d1   : > { %v7160_v35 = vld [vmem:[#allocation3 + $0x94] ss:$36 sps:$4 sm:$0xff]   ;;  %1160 = vst [vmem:[#allocation3 + $0x88] sm:$0xf] %v6433_v15  ;;  %1001 = vst [vmem:[#allocation3 + $0xa0] sm:$0xf] %v6433_v15  ;;  %v6418_v54 = vpack.c.bf16 %v1017_v21, %v1017_v21  ;;  %2126 = vmatprep.mubr.bf16.mxu0 %v7154_v28  ;;  %6645 = vmatprep.subr.bf16.mxu0 %v7159_v25 }
 0x1d2   : > { %v7162_v36 = vld [vmem:[%s9737_s3 + $0x1b0] sm:$0xff]   ;;  %v7163_v44 = vld [vmem:[%s9737_s3 + $0x160] sm:$0xff]   ;;  %v916_v45 = vsel %vm8098_vm5, %v908_v38, 0.0  ;;  %1111 = vst [vmem:[#allocation3 + $0x60] sm:$0xf] %v6424_v30  ;;  %v1018_v51 = vsel %vm8084_vm3, %v8181_v42, 0.0  ;;  %2069 = vmatprep.mubr.bf16.mxu1 %v7160_v35 }
 0x1d3   : > { %1002 = vst [vmem:[#allocation3 + $0xc4] sm:$0xf] %v6411_v33  ;;  %v1073_v22 = vsel %vm8048_vm13, %v8177_v17, 0.0  ;;  %1161 = vst [vmem:[#allocation3 + $0xac] sm:$0xf] %v6411_v33  ;;  %v6405_v18 = vpack.c.bf16 %v916_v45, %v916_v45  ;;  %v6419_v8 = vpack.c.bf16 %v1018_v51, %v1018_v51  ;;  %v1074_v20 = vsel %vm8052_vm14, %v8179_v19, 0.0  ;;  %6609 = vmatprep.subr.bf16.mxu1 %v7163_v44 }
 0x1d4   : > { %900 = vst [vmem:[#allocation3 + $0x104] sm:$0xf] %v6397_v40  ;;  %1112 = vst [vmem:[#allocation3 + $0x84] sm:$0xf] %v6425_v16  ;;  %v6426_v59 = vpack.c.bf16 %v1073_v22, %v1073_v22  ;;  %v964_v1 = vld [vmem:[#allocation2 + $0x48] sm:$0xff]  ;;  %v6427_v41 = vpack.c.bf16 %v1074_v20, %v1074_v20  ;;  %v1019_v12 = vsel %vm8114_vm0, %v8212_v58, 0.0  ;;  %6646 = vmatpush3.bf16.msra.mxu0 %v7162_v36 }
 0x1d5   : > { %v1012_v50 = vld [vmem:[#allocation2 + $0x49] sm:$0xff]  ;;  %1057 = vst [vmem:[#allocation3 + $0xa4] sm:$0xf] %v6418_v54  ;;  %v6413_v61 = vpack.c.bf16 %v964_v1, %v964_v1  ;;  %v7165_v19 = vld [vmem:[%s9737_s3 + $0x120] sm:$0xff]   ;;  %956 = vst [vmem:[#allocation3 + $0x108] sm:$0xf] %v6405_v18  ;;  %v6420_v25 = vpack.c.bf16 %v1019_v12, %v1019_v12 }
 0x1d6   : > { %v1068_v27 = vld [vmem:[#allocation2 + $0x4f] sm:$0xff]  ;;  %1058 = vst [vmem:[#allocation3 + $0xc8] sm:$0xf] %v6419_v8  ;;  %1113 = vst [vmem:[#allocation3 + $0xa8] sm:$0xf] %v6426_v59  ;;  %v1020_v15 = vsel %vm7940_vm2, %v1012_v50, 0.0  ;;  %6610 = vmatpush3.bf16.msra.mxu1 %v7165_v19 }
 0x1d7   : > { %v7166_v17 = vld [vmem:[%s9737_s3 + $0x1e8] sm:$0xff]   ;;  %v1075_v55 = vsel %vm8092_vm4, %v908_v38, 0.0  ;;  %v7170_v26 = vld [vmem:[%s9737_s3 + $0x158] sm:$0xff]   ;;  %1114 = vst [vmem:[#allocation3 + $0xcc] sm:$0xf] %v6427_v41  ;;  %v6421_v30 = vpack.c.bf16 %v1020_v15, %v1020_v15  ;;  %v1076_v33 = vsel %vm8098_vm5, %v1068_v27, 0.0 }
 0x1d8   : > { %v7169_v4 = vld [vmem:[%s9737_s3 + $0x1a8] sm:$0xff]   ;;  %1162 = vst [vmem:[#allocation3 + $0xd0] sm:$0xf] %v6435_v3  ;;  %1003 = vst [vmem:[#allocation3 + $0xe8] sm:$0xf] %v6435_v3  ;;  %v6428_v31 = vpack.c.bf16 %v1075_v55, %v1075_v55  ;;  %v1174_v28 = vsel %vm8036_vm10, %v8069_v32, 0.0  ;;  %v6429_v38 = vpack.c.bf16 %v1076_v33, %v1076_v33  ;;  %6647 = vmatprep.subr.bf16.mxu0 %v7166_v17  ;;  %6611 = vmatprep.subr.bf16.mxu1 %v7170_v26 }
 0x1d9   : > { %1004 = vst [vmem:[#allocation3 + $0x10c] sm:$0xf] %v6413_v61  ;;  %1163 = vst [vmem:[#allocation3 + $0xf4] sm:$0xf] %v6413_v61  ;;  %v1246_v34 = vld [vmem:[#allocation3 + $0xb4] sm:$0xff]  ;;  %v7172_v40 = vld [vmem:[%s9737_s3 + $0x1e0] sm:$0xff]   ;;  %v6439_v16 = vpack.c.bf16 %v1174_v28, %v1174_v28  ;;  %6648 = vmatpush3.bf16.msra.mxu0 %v7169_v4 }
 0x1da   : > { %v7171_v35 = vld [vmem:[%s9737_s3 + $0x118] sm:$0xff]   ;;  %1059 = vst [vmem:[#allocation3 + $0xec] sm:$0xf] %v6420_v25  ;;  %v1175_v21 = vsel %vm8044_vm12, %v8129_v24, 0.0  ;;  %v1241_v44 = vld [vmem:[#allocation3 + $0x90] sm:$0xff]  ;;  %v1176_v32 = vsel %vm8040_vm11, %v8163_v39, 0.0  ;;  %6649 = vmatprep.subr.bf16.mxu0 %v7172_v40 }
 0x1db   : > { %v7164_v45 = vld [vmem:[#allocation3 + $0x50] ss:$36 sps:$4 sm:$0xff]   ;;  %1060 = vst [vmem:[#allocation3 + $0x110] sm:$0xf] %v6421_v30  ;;  %1115 = vst [vmem:[#allocation3 + $0xf0] sm:$0xf] %v6428_v31  ;;  %v6440_v36 = vpack.c.bf16 %v1175_v21, %v1175_v21  ;;  %v6441_v22 = vpack.c.bf16 %v1176_v32, %v1176_v32  ;;  %v6047_v8 = vcombine.low %v1241_v44, %v1246_v34  ;;  %6612 = vmatpush3.bf16.msra.mxu1 %v7171_v35 }
 0x1dc   : > { %v1177_v51 = vsel %vm8056_vm15, %v8181_v42, 0.0  ;;  %v7167_v54 = vld [vmem:[#allocation3 + $0x9c] ss:$36 sps:$4 sm:$0xff]   ;;  %1116 = vst [vmem:[#allocation3 + $0x114] sm:$0xf] %v6429_v38  ;;  %v1178_v24 = vsel %vm8084_vm3, %v8212_v58, 0.0  ;;  %2127 = vmatmul.mubr.bf16.gmra.mxu0 %v7164_v45 }
 0x1dd   : > { %1214 = vst [vmem:[#allocation3 + $0x44] sm:$0xf] %v6439_v16  ;;  %v6442_v18 = vpack.c.bf16 %v1177_v51, %v1177_v51  ;;  %v7176_v39 = vld [vmem:[%s9737_s3 + $0x150] sm:$0xff]   ;;  %1215 = vst [vmem:[#allocation3 + $0x68] sm:$0xf] %v6440_v36  ;;  %v6443_v20 = vpack.c.bf16 %v1178_v24, %v1178_v24  ;;  %v1179_v42 = vsel %vm8114_vm0, %v1012_v50, 0.0  ;;  %2134 = vmatprep.mubr.bf16.mxu0 %v7167_v54  ;;  %2070 = vmatmul.mubr.bf16.gmra.mxu1 %v6047_v8 }
 0x1de   : > { %v7173_v59 = vld [vmem:[#allocation3 + $0xdc] ss:$36 sps:$4 sm:$0xff]   ;;  %1216 = vst [vmem:[#allocation3 + $0x8c] sm:$0xf] %v6441_v22  ;;  %v6444_v1 = vpack.c.bf16 %v1179_v42, %v1179_v42  ;;  %v7178_v50 = vld [vmem:[%s9737_s3 + $0x110] sm:$0xff]   ;;  %6613 = vmatprep.subr.bf16.mxu1 %v7176_v39  ;;  %v7183_v61 = vld [vmem:[%s9737_s3 + $0x148] sm:$0xff]  }
 0x1df   : > { %v7175_v58 = vld [vmem:[%s9737_s3 + $0x1a0] sm:$0xff]   ;;  %1217 = vst [vmem:[#allocation3 + $0xb0] sm:$0xf] %v6442_v18  ;;  %v7179_v27 = vld [vmem:[%s9737_s3 + $0x1d8] sm:$0xff]   ;;  %1218 = vst [vmem:[#allocation3 + $0xd4] sm:$0xf] %v6443_v20  ;;  %2077 = vmatprep.mubr.bf16.mxu1 %v7173_v59  ;;  %6614 = vmatpush3.bf16.msra.mxu1 %v7178_v50 }
 0x1e0   : > { %v7705_v17 = vld [vmem:[#allocation2] sm:$0xff]  ;;  %1219 = vst [vmem:[#allocation3 + $0xf8] sm:$0xf] %v6444_v1  ;;  %v7182_v3 = vld [vmem:[%s9737_s3 + $0x198] sm:$0xff]   ;;  %6650 = vmatpush3.bf16.msra.mxu0 %v7175_v58  ;;  %v7184_v15 = vld [vmem:[%s9737_s3 + $0x108] sm:$0xff]   ;;  %6615 = vmatprep.subr.bf16.mxu1 %v7183_v61 }
 0x1e1   : > { %v6509_v41 = vpack.c.bf16 %v7705_v17, %v7705_v17  ;;  %v1251_v12 = vld [vmem:[#allocation3 + $0xd8] sm:$0xff]  ;;  %6651 = vmatprep.subr.bf16.mxu0 %v7179_v27  ;;  %v7185_v55 = vld [vmem:[%s9737_s3 + $0x1d0] sm:$0xff]   ;;  %v7180_v26 = vld [vmem:[#allocation3 + $0xe4] ss:$36 sps:$4 sm:$0xff]  }
 0x1e2   : > { %v1256_v19 = vld [vmem:[#allocation3 + $0xfc] sm:$0xff]  ;;  %v8315_v4 = vld [vmem:[#allocation3 + $0xf4] ss:$36 sps:$4 sm:$0xff]   ;;  %v7192_v34 = vld [vmem:[%s9737_s3 + $0x1c8] sm:$0xff]  }
 0x1e3   : > { %v7177_v25 = vld [vmem:[#allocation3 + $0x98] ss:$36 sps:$4 sm:$0xff]   ;;  %2856 = vst [vmem:[#allocation3 + $0x118] sm:$0xf] %v6509_v41  ;;  %v6056_v30 = vcombine.low %v1251_v12, %v1256_v19  ;;  %v7189_v33 = vld [vmem:[%s9737_s3 + $0x140] sm:$0xff]   ;;  %v7188_v28 = vld [vmem:[%s9737_s3 + $0x190] sm:$0xff]   ;;  %6616 = vmatpush3.bf16.msra.mxu1 %v7184_v15 }
 0x1e4   : > { %2135 = vmatmul.mubr.bf16.gmra.mxu0 %v7177_v25  ;;  %v7186_v31 = vld [vmem:[#allocation3 + $0x14] ss:$36 sps:$4 sm:$0xff]   ;;  %v7191_v40 = vld [vmem:[%s9737_s3 + $0x100] sm:$0xff]   ;;  %6617 = vmatprep.subr.bf16.mxu1 %v7189_v33  ;;  %v7193_v44 = vld [vmem:[%s9737_s3 + $0x188] sm:$0xff]  }
 0x1e5   : > { %2142 = vmatprep.mubr.bf16.mxu0 %v7180_v26  ;;  %6652 = vmatpush3.bf16.msra.mxu0 %v7182_v3  ;;  %v7196_v38 = vld [vmem:[%s9737_s3 + $0x238] sm:$0xff]   ;;  %v1223_v16 = vld [vmem:[#allocation3 + $0x10] sm:$0xff]  ;;  %v7190_v45 = vld [vmem:[#allocation3 + $0xe0] ss:$36 sps:$4 sm:$0xff]  }
 0x1e6   : > { %2078 = vmatmul.mubr.bf16.gmra.mxu1 %v6056_v30  ;;  %6653 = vmatprep.subr.bf16.mxu0 %v7185_v55  ;;  %v1228_v21 = vld [vmem:[#allocation3 + $0x34] sm:$0xff]  ;;  %v7197_v32 = vld [vmem:[%s9737_s3 + $0x1c0] sm:$0xff]   ;;  %v7205_v24 = vld [vmem:[%s9737_s3 + $0x228] sm:$0xff]  }
 0x1e7   : > { %v8326_v35 = vld [vmem:[#allocation3 + $0xf8] ss:$36 sps:$4 sm:$0xff]   ;;  %2183 = vmatprep.mubr.bf16.mxu1 %v7186_v31  ;;  %6618 = vmatpush3.bf16.msra.mxu1 %v7191_v40  ;;  %v6033_v36 = vcombine.low %v1223_v16, %v1228_v21  ;;  %v7201_v51 = vld [vmem:[%s9737_s3 + $0x230] sm:$0xff]   ;;  %v7200_v22 = vld [vmem:[%s9737_s3 + $0x180] sm:$0xff]  }
 0x1e8   : > { %2912 = vst [vmem:[#allocation3 + $0x11c] sm:$0xf] %v7946_v13  ;;  %v7194_v13 = vld [vmem:[#allocation3 + $0x1c] ss:$36 sps:$4 sm:$0xff]   ;;  %6931 = vmatprep.subr.bf16.mxu1 %v7196_v38  ;;  %v7203_v20 = vld [vmem:[#allocation3 + $0x64] ss:$36 sps:$4 sm:$0xff]  }
 0x1e9   : > { %6654 = vmatpush3.bf16.msra.mxu0 %v7188_v28  ;;  %v7198_v54 = vld [vmem:[#allocation3 + $0x5c] ss:$36 sps:$4 sm:$0xff]   ;;  %v7206_v58 = vld [vmem:[#allocation3 + $0xa4] ss:$36 sps:$4 sm:$0xff]   ;;  %v7210_v41 = vld [vmem:[#allocation3 + $0xac] ss:$36 sps:$4 sm:$0xff]  }
 0x1ea   : > { %6655 = vmatprep.subr.bf16.mxu0 %v7192_v34  ;;  %v1238_v18 = vld [vmem:[#allocation3 + $0x7c] sm:$0xff]  ;;  %v1248_v50 = vld [vmem:[#allocation3 + $0xc4] sm:$0xff]  ;;  %v7215_v61 = vld [vmem:[%s9737_s3 + $0x210] sm:$0xff]  }
 0x1eb   : > { %v7202_v8 = vld [vmem:[#allocation3 + $0x18] ss:$36 sps:$4 sm:$0xff]   ;;  %v7208_v59 = vld [vmem:[%s9737_s3 + $0x220] sm:$0xff]   ;;  %v7213_v12 = vld [vmem:[#allocation3 + $0xec] ss:$36 sps:$4 sm:$0xff]  }
 0x1ec   : > { %2143 = vmatmul.mubr.bf16.gmra.mxu0 %v7190_v45  ;;  %v1233_v39 = vld [vmem:[#allocation3 + $0x58] sm:$0xff]  ;;  %v1243_v27 = vld [vmem:[#allocation3 + $0xa0] sm:$0xff]  ;;  %v7219_v19 = vld [vmem:[%s9737_s3 + $0x208] sm:$0xff]  }
 0x1ed   : > { %6656 = vmatpush3.bf16.msra.mxu0 %v7193_v44  ;;  %2248 = vmatprep.mubr.bf16.mxu0 %v7194_v13  ;;  %v6042_v42 = vcombine.low %v1233_v39, %v1238_v18  ;;  %v7212_v1 = vld [vmem:[%s9737_s3 + $0x218] sm:$0xff]   ;;  %v7209_v17 = vld [vmem:[#allocation3 + $0x60] ss:$36 sps:$4 sm:$0xff]   ;;  %v6051_v3 = vcombine.low %v1243_v27, %v1248_v50  ;;  %v1253_v15 = vld [vmem:[#allocation3 + $0xe8] sm:$0xff] }
 0x1ee   : > { %2184 = vmatmul.mubr.bf16.vlgmr.msra.gmra.mxu1 %v6033_v36  ;;  %6657 = vmatprep.subr.bf16.mxu0 %v7197_v32  ;;  %v1258_v25 = vld [vmem:[#allocation3 + $0x10c] sm:$0xff]  ;;  %v7221_v30 = vld [vmem:[%s9737_s3 + $0x200] sm:$0xff]   ;;  %v1259_v28 = vld [vmem:[#allocation3 + $0x114] sm:$0xff] }
 0x1ef   : > { %6932 = vmatpush3.bf16.msra.mxu1 %v7196_v38  ;;  %2191 = vmatprep.mubr.bf16.mxu1 %v7198_v54  ;;  %v7216_v55 = vld [vmem:[#allocation3 + $0xa8] ss:$36 sps:$4 sm:$0xff]   ;;  %v6060_v26 = vcombine.low %v1253_v15, %v1258_v25  ;;  %v7220_v33 = vld [vmem:[#allocation3 + $0x20] ss:$36 sps:$4 sm:$0xff]   ;;  %v1254_v31 = vld [vmem:[#allocation3 + $0xf0] sm:$0xff] }
 0x1f0   : > { %6933 = vmatprep.subr.bf16.mxu1 %v7201_v51  ;;  %v6062_v34 = vcombine.low %v1254_v31, %v1259_v28  ;;  %v7222_v40 = vld [vmem:[#allocation3 + $0x68] ss:$36 sps:$4 sm:$0xff]   ;;  %v7223_v38 = vld [vmem:[#allocation3 + $0xb0] ss:$36 sps:$4 sm:$0xff]   ;;  %v7226_v16 = vld [vmem:[%s9738_s4 + $0x38] sm:$0xff]  }
 0x1f1   : > { %6658 = vmatpush3.bf16.msra.mxu0 %v7200_v22  ;;  %v7227_v21 = vld [vmem:[%s9738_s4 + $0x70] sm:$0xff]   ;;  %v7230_v45 = vld [vmem:[%s9738_s4 + $0xb8] sm:$0xff]   ;;  %v7231_v32 = vld [vmem:[%s9738_s4 + $0x68] sm:$0xff]  }
 0x1f2   : > { %v7228_v44 = vld [vmem:[%s9738_s4 + $0x30] sm:$0xff]   ;;  %v7237_v54 = vld [vmem:[%s9738_s4 + $0xe8] sm:$0xff]   ;;  %v7235_v22 = vld [vmem:[%s9738_s4 + $0x60] sm:$0xff]  }
 0x1f3   : > { %6934 = vmatpush3.bf16.msra.mxu1 %v7201_v51  ;;  %v7233_v13 = vld [vmem:[%s9738_s4 + $0xf0] sm:$0xff]   ;;  %v7232_v51 = vld [vmem:[%s9738_s4 + $0x28] sm:$0xff]   ;;  %v7241_v39 = vld [vmem:[%s9738_s4 + $0xe0] sm:$0xff]  }
 0x1f4   : > { %2249 = vmatmul.mubr.bf16.vlgmr.msra.gmra.mxu0 %v7202_v8  ;;  %6935 = vmatprep.subr.bf16.mxu1 %v7205_v24  ;;  %v7234_v36 = vld [vmem:[%s9738_s4 + $0xb0] sm:$0xff]   ;;  %v7236_v8 = vld [vmem:[%s9738_s4 + $0x20] sm:$0xff]   ;;  %v7245_v27 = vld [vmem:[%s9738_s4 + $0xd8] sm:$0xff]  }
 0x1f5   : > { %2256 = vmatprep.mubr.bf16.mxu0 %v7203_v20  ;;  %v7239_v20 = vld [vmem:[%s9738_s4 + $0x58] sm:$0xff]   ;;  %v7243_v50 = vld [vmem:[%s9738_s4 + $0x50] sm:$0xff]   ;;  %v7247_v25 = vld [vmem:[%s9738_s4 + $0x48] sm:$0xff]  }
 0x1f6   : > { %2192 = vmatmul.mubr.bf16.gmra.mxu1 %v6042_v42  ;;  %v7253_v31 = vld [vmem:[%s9738_s4 + $0xc8] sm:$0xff]  }
 0x1f7   : > { %6936 = vmatpush3.bf16.msra.mxu1 %v7205_v24  ;;  %2199 = vmatprep.mubr.bf16.mxu1 %v7206_v58  ;;  %v7238_v24 = vld [vmem:[%s9738_s4 + $0xa8] sm:$0xff]  }
 0x1f8   : > { %6937 = vmatprep.subr.bf16.mxu1 %v7208_v59 }
 0x1fb   : > { %6938 = vmatpush3.bf16.msra.mxu1 %v7208_v59  ;;  %v7242_v59 = vld [vmem:[%s9738_s4 + $0xa0] sm:$0xff]  }
 0x1fc   : > { %2257 = vmatmul.mubr.bf16.gmra.mxu0 %v7209_v17  ;;  %6939 = vmatprep.subr.bf16.mxu1 %v7212_v1 }
 0x1fd   : > { %2264 = vmatprep.mubr.bf16.mxu0 %v7210_v41 }
 0x1fe   : > { %2200 = vmatmul.mubr.bf16.gmra.mxu1 %v6051_v3  ;;  %v7246_v3 = vld [vmem:[%s9738_s4 + $0x98] sm:$0xff]  }
 0x1ff   : > { %6940 = vmatpush3.bf16.msra.mxu1 %v7212_v1  ;;  %2207 = vmatprep.mubr.bf16.mxu1 %v7213_v12  ;;  %v7240_v1 = vld [vmem:[%s9738_s4 + $0x18] sm:$0xff]   ;;  %v7249_v12 = vld [vmem:[%s9738_s4 + $0xd0] sm:$0xff]  }
 0x200   : > { %6941 = vmatprep.subr.bf16.mxu1 %v7215_v61 }
 0x203   : > { %6942 = vmatpush3.bf16.msra.mxu1 %v7215_v61  ;;  %v7244_v61 = vld [vmem:[%s9738_s4 + $0x10] sm:$0xff]  }
 0x204   : > { %2265 = vmatmul.mubr.bf16.gmra.mxu0 %v7216_v55  ;;  %6943 = vmatprep.subr.bf16.mxu1 %v7219_v19 }
 0x205   : > { %2272 = vmatprep.mubr.bf16.mxu0 %v8315_v4  ;;  %v7225_v4 = vld [vmem:[%s9738_s4 + $0x78] sm:$0xff]  }
 0x206   : > { %2208 = vmatmul.mubr.bf16.gmra.mxu1 %v6060_v26  ;;  %6695 = vmatprep.subr.bf16.mxu0 %v7225_v4 }
 0x207   : > { %6944 = vmatpush3.bf16.msra.mxu1 %v7219_v19  ;;  %6947 = vmatprep.mubr.bf16.mxu1 %v7220_v33  ;;  %v7248_v33 = vld [vmem:[%s9738_s4 + $0x8] sm:$0xff]  }
 0x208   : > { %6945 = vmatprep.subr.bf16.mxu1 %v7221_v30  ;;  %6696 = vmatpush3.bf16.msra.mxu0 %v7226_v16  ;;  %v7254_v16 = vld [vmem:[%s9738_s4 + $0x88] sm:$0xff]  }
 0x209   : > { %6697 = vmatprep.subr.bf16.mxu0 %v7227_v21  ;;  %v7252_v21 = vld [vmem:[%s9738_s4] sm:$0xff]  }
 0x20b   : > { %6946 = vmatpush3.bf16.msra.mxu1 %v7221_v30  ;;  %v7250_v30 = vld [vmem:[%s9738_s4 + $0x90] sm:$0xff]  }
 0x20c   : > { %2273 = vmatmul.mubr.bf16.gmra.mxu0 %v6062_v34 }
 0x20d   : > { %6698 = vmatpush3.bf16.msra.mxu0 %v7228_v44  ;;  %v7259_v44 = vld [vmem:[%s9738_s4 + $0xc0] sm:$0xff]  }
 0x20e   : > { %6948 = vmatmul.mubr.bf16.vlgmr.msra.gmra.mxu1 %v7222_v40  ;;  %6699 = vmatprep.subr.bf16.mxu0 %v7231_v32  ;;  %v7251_v40 = vld [vmem:[%s9738_s4 + $0x40] sm:$0xff]   ;;  %v7258_v32 = vld [vmem:[%s9738_s4 + $0x178] sm:$0xff]  }
 0x20f   : > { %6951 = vmatprep.mubr.bf16.mxu1 %v7223_v38 }
 0x211   : > { %6700 = vmatpush3.bf16.msra.mxu0 %v7232_v51  ;;  %v7261_v51 = vld [vmem:[%s9738_s4 + $0x80] sm:$0xff]  }
 0x212   : > { %6701 = vmatprep.subr.bf16.mxu0 %v7235_v22 }
 0x215   : > { %6702 = vmatpush3.bf16.msra.mxu0 %v7236_v8 }
 0x216   : > { %6952 = vmatmul.mubr.bf16.gmra.mxu1 %v8326_v35  ;;  %v7229_v35 = vld [vmem:[%s9738_s4 + $0xf8] sm:$0xff]   ;;  %6703 = vmatprep.subr.bf16.mxu0 %v7239_v20 }
 0x217   : > { %6735 = vmatprep.subr.bf16.mxu1 %v7229_v35 }
 0x218   : > { %6736 = vmatpush3.bf16.msra.mxu1 %v7230_v45 }
 0x219   : > { %6737 = vmatprep.subr.bf16.mxu1 %v7233_v13  ;;  %6704 = vmatpush3.bf16.msra.mxu0 %v7240_v1 }
 0x21a   : > { %6705 = vmatprep.subr.bf16.mxu0 %v7243_v50 }
 0x21c   : > { %6738 = vmatpush3.bf16.msra.mxu1 %v7234_v36 }
 0x21d   : > { %6739 = vmatprep.subr.bf16.mxu1 %v7237_v54  ;;  %6706 = vmatpush3.bf16.msra.mxu0 %v7244_v61  ;;  %v7269_v54 = vld [vmem:[%s9738_s4 + $0x1f8] sm:$0xff]  }
 0x21e   : > { %6707 = vmatprep.subr.bf16.mxu0 %v7247_v25 }
 0x220   : > { %6740 = vmatpush3.bf16.msra.mxu1 %v7238_v24 }
 0x221   : > { %6741 = vmatprep.subr.bf16.mxu1 %v7241_v39  ;;  %6708 = vmatpush3.bf16.msra.mxu0 %v7248_v33 }
 0x222   : > { %6709 = vmatprep.subr.bf16.mxu0 %v7251_v40 }
 0x224   : > { %6742 = vmatpush3.bf16.msra.mxu1 %v7242_v59 }
 0x225   : > { %6743 = vmatprep.subr.bf16.mxu1 %v7245_v27  ;;  %6710 = vmatpush3.bf16.msra.mxu0 %v7252_v21 }
 0x226   : > { %6775 = vmatprep.subr.bf16.mxu0 %v7258_v32 }
 0x228   : > { %6744 = vmatpush3.bf16.msra.mxu1 %v7246_v3 }
 0x229   : > { %6745 = vmatprep.subr.bf16.mxu1 %v7249_v12 }
 0x22c   : > { %6746 = vmatpush3.bf16.msra.mxu1 %v7250_v30 }
 0x22d   : > { %6747 = vmatprep.subr.bf16.mxu1 %v7253_v31 }
 0x230   : > { %6748 = vmatpush3.bf16.msra.mxu1 %v7254_v16 }
 0x231   : > { %6749 = vmatprep.subr.bf16.mxu1 %v7259_v44 }
 0x234   : > { %6750 = vmatpush3.bf16.msra.mxu1 %v7261_v51 }
 0x235   : > { %6815 = vmatprep.subr.bf16.mxu1 %v7269_v54 }
 0x285   : > { %v8406_v18 = vpop.f32.mrf.mxu1 }
 0x287   : > { %v8417_v42 = vpop.f32.mrf.mxu1 }
 0x288   : > { %v6541_v47 = vadd.f32 %v8417_v42, %v8406_v18 }
 0x289   : > { %v8422_v58 = vpop.f32.mrf.mxu1 }
 0x28b   : > { %v8433_v17 = vpop.f32.mrf.mxu1 }
 0x28e   : > { %v8448_v15 = vpop.f32.mrf.mxu1 }
 0x28f   : > { %v8435_v41 = vpop.f32.mrf.mxu0 }
 0x290   : > { %v8455_v26 = vpop.f32.mrf.mxu1 }
 0x291   : > { %v8446_v19 = vpop.f32.mrf.mxu0  ;;  %v6547_v63 = vadd.f32 %v8455_v26, %v8448_v15 }
 0x292   : > { %v8468_v34 = vpop.f32.mrf.mxu1  ;;  %v6581_v7 = vadd.f32 %v8446_v19, %v8435_v41  ;;  %v6544_v41 = vadd.f32 %v8433_v17, %v8422_v58 }
 0x293   : > { %v8453_v55 = vpop.f32.mrf.mxu0 }
 0x294   : > { %v8473_v4 = vpop.f32.mrf.mxu1  ;;  %v2121_v15 = vadd.f32 %v6581_v7, %v6541_v47 }
 0x295   : > { %v8466_v28 = vpop.f32.mrf.mxu0 }
 0x296   : > { %v6584_v6 = vadd.f32 %v8466_v28, %v8453_v55  ;;  %v6550_v55 = vadd.f32 %v8473_v4, %v8468_v34 }
 0x298   : > { %v2124_v26 = vadd.f32 %v6584_v6, %v6544_v41 }
 0x29c   : > { %v6585_v38 = vpop.f32.mrf.mxu0 }
 0x29d   : > { %v8484_v45 = vpop.f32.mrf.mxu1 }
 0x29e   : > { %v6586_v35 = vpop.f32.mrf.mxu0 }
 0x29f   : > { %v8489_v36 = vpop.f32.mrf.mxu1  ;;  %v6587_v11 = vadd.f32 %v6586_v35, %v6585_v38 }
 0x2a0   : > { %v6588_v13 = vpop.f32.mrf.mxu0 }
 0x2a1   : > { %v8497_v24 = vpop.f32.mrf.mxu1  ;;  %v2129_v19 = vadd.f32 %v6587_v11, %v6547_v63 }
 0x2a2   : > { %v6589_v22 = vpop.f32.mrf.mxu0 }
 0x2a3   : > { %v6555_v39 = vpop.f32.mrf.mxu1  ;;  %v6590_v53 = vadd.f32 %v6589_v22, %v6588_v13 }
 0x2a4   : > { %v6591_v8 = vpop.f32.mrf.mxu0 }
 0x2a5   : > { %v2132_v63 = vadd.f32 %v6590_v53, %v6550_v55 }
 0x2a6   : > { %v6592_v20 = vpop.f32.mrf.mxu0  ;;  %v8499_v59 = vpop.f32.mrf.mxu1 }
 0x2a7   : > { %v6593_v62 = vadd.f32 %v6592_v20, %v6591_v8 }
 0x2a8   : > { %v8501_v1 = vpop.f32.mrf.mxu0  ;;  %v8503_v27 = vpop.f32.mrf.mxu1 }
 0x2a9   : > { %v6559_v6 = vadd.f32 %v8503_v27, %v8499_v59 }
 0x2aa   : > { %v8505_v50 = vpop.f32.mrf.mxu0  ;;  %v8507_v3 = vpop.f32.mrf.mxu1 }
 0x2ac   : > { %v6597_v61 = vpop.f32.mrf.mxu0  ;;  %v8509_v12 = vpop.f32.mrf.mxu1 }
 0x2ae   : > { %v6598_v25 = vpop.f32.mrf.mxu0  ;;  %v6619_v30 = vpop.f32.mrf.mxu1 }
 0x2af   : > { %v6599_v47 = vadd.f32 %v6598_v25, %v6597_v61 }
 0x2b0   : > { %v6600_v33 = vpop.f32.mrf.mxu0  ;;  %v6620_v31 = vpop.f32.mrf.mxu1 }
 0x2b1   : > { %v6621_v35 = vadd.f32 %v6620_v31, %v6619_v30 }
 0x2b2   : > { %v6601_v40 = vpop.f32.mrf.mxu0  ;;  %v6622_v16 = vpop.f32.mrf.mxu1 }
 0x2b3   : > { %v2186_v58 = vadd.f32 %v6621_v35, %v2121_v15 }
 0x2b4   : > { %v6659_v21 = vpop.f32.mrf.mxu0  ;;  %v6623_v44 = vpop.f32.mrf.mxu1 }
 0x2b5   : > { %v6624_v17 = vadd.f32 %v6623_v44, %v6622_v16 }
 0x2b6   : > { %v6660_v32 = vpop.f32.mrf.mxu0  ;;  %v6625_v51 = vpop.f32.mrf.mxu1 }
 0x2b7   : > { %v6661_v28 = vadd.f32 %v6660_v32, %v6659_v21  ;;  %v2189_v61 = vadd.f32 %v6624_v17, %v2124_v26 }
 0x2b8   : > { %v6662_v54 = vpop.f32.mrf.mxu0  ;;  %v6626_v57 = vpop.f32.mrf.mxu1 }
 0x2b9   : > { %v6627_v23 = vadd.f32 %v6626_v57, %v6625_v51  ;;  %v6553_v57 = vadd.f32 %v8489_v36, %v8484_v45  ;;  %v8540_v36 = vld [vmem:[%s287_s23] ss:$0 sm:$0xff] }
 0x2ba   : > { %v6663_v0 = vpop.f32.mrf.mxu0  ;;  %v6628_v52 = vpop.f32.mrf.mxu1 }
 0x2bb   : > { %v2194_v13 = vadd.f32 %v6627_v23, %v2129_v19 }
 0x2bc   : > { %v6665_v56 = vpop.f32.mrf.mxu0  ;;  %v6629_v49 = vpop.f32.mrf.mxu1 }
 0x2bd   : > { %v6630_v22 = vadd.f32 %v6629_v49, %v6628_v52  ;;  %v6596_v49 = vadd.f32 %v8505_v50, %v8501_v1  ;;  %v6602_v52 = vadd.f32 %v6601_v40, %v6600_v33 }
 0x2be   : > { %v6666_v46 = vpop.f32.mrf.mxu0  ;;  %v6631_v43 = vpop.f32.mrf.mxu1 }
 0x2c0   : > { %v6668_v29 = vpop.f32.mrf.mxu0  ;;  %v6632_v9 = vpop.f32.mrf.mxu1 }
 0x2c2   : > { %v6669_v48 = vpop.f32.mrf.mxu0  ;;  %v8511_v37 = vpop.f32.mrf.mxu1 }
 0x2c3   : > { %v6670_v34 = vadd.f32 %v6669_v48, %v6668_v29  ;;  %v6562_v29 = vadd.f32 %v8509_v12, %v8507_v3  ;;  %v6633_v48 = vadd.f32 %v6632_v9, %v6631_v43 }
 0x2c4   : > { %v6671_v14 = vpop.f32.mrf.mxu0  ;;  %v8513_v10 = vpop.f32.mrf.mxu1 }
 0x2c5   : > { %9847 = vst [vmem:[#allocation28_spill] sm:$0xff] %v8513_v10  ;;  %v6667_v10 = vadd.f32 %v6666_v46, %v6665_v56  ;;  %v6556_v46 = vadd.f32 %v6555_v39, %v8497_v24  ;;  %v2137_v56 = vadd.f32 %v6593_v62, %v6553_v57  ;;  %v6664_v62 = vadd.f32 %v6663_v0, %v6662_v54 }
 0x2c6   : > { %v6672_v5 = vpop.f32.mrf.mxu0  ;;  %v6637_v2 = vpop.f32.mrf.mxu1  ;;  %v2197_v24 = vadd.f32 %v6630_v22, %v2132_v63  ;;  %v2251_v39 = vadd.f32 %v6661_v28, %v2186_v58  ;;  %v2148_v25 = vadd.f32 %v6602_v52, %v6562_v29 }
 0x2c7   : > { %v2259_v4 = vadd.f32 %v6667_v10, %v2194_v13  ;;  %v2145_v10 = vadd.f32 %v6599_v47, %v6559_v6  ;;  %v6673_v30 = vadd.f32 %v6672_v5, %v6671_v14  ;;  %v2254_v9 = vadd.f32 %v6664_v62, %v2189_v61 }
 0x2c8   : > { %v8523_v60 = vpop.f32.mrf.mxu0  ;;  %v6638_v38 = vpop.f32.mrf.mxu1  ;;  %v2262_v50 = vadd.f32 %v6670_v34, %v2197_v24  ;;  %v2202_v12 = vadd.f32 %v6633_v48, %v2137_v56  ;;  %v2140_v41 = vadd.f32 %v6596_v49, %v6556_v46 }
 0x2c9   : > { %v6639_v23 = vadd.f32 %v6638_v38, %v6637_v2 }
 0x2ca   : > { %v6675_v18 = vpop.f32.mrf.mxu0  ;;  %v6640_v42 = vpop.f32.mrf.mxu1  ;;  %v2267_v55 = vadd.f32 %v6673_v30, %v2202_v12 }
 0x2cb   : > { %v2210_v0 = vadd.f32 %v6639_v23, %v2145_v10  ;;  %v6676_v19 = vadd.f32 %v6675_v18, %v8523_v60 }
 0x2cc   : > { %v6677_v7 = vpop.f32.mrf.mxu0  ;;  %v6641_v11 = vpop.f32.mrf.mxu1  ;;  %v9848_v21 = vld [vmem:[#allocation28_spill] sm:$0xff] }
 0x2cd   : > { %v6642_v33 = vadd.f32 %v6641_v11, %v6640_v42  ;;  %v6636_v44 = vadd.f32 %v9848_v21, %v8511_v37 }
 0x2ce   : > { %v6678_v45 = vpop.f32.mrf.mxu0  ;;  %v6949_v53 = vpop.f32.mrf.mxu1 }
 0x2cf   : > { %v2324_v8 = vadd.f32 %v6949_v53, %v2259_v4  ;;  %v6679_v20 = vadd.f32 %v6678_v45, %v6677_v7  ;;  %v2213_v35 = vadd.f32 %v6642_v33, %v2148_v25  ;;  %v2205_v26 = vadd.f32 %v6636_v44, %v2140_v41 }
 0x2d0   : > { %v6680_v59 = vpop.f32.mrf.mxu0  ;;  %v2315_v27 = vpop.f32.mrf.mxu1 }
 0x2d1   : > { %v8545_v1 = vmul.f32 %v8540_v36, %v2324_v8  ;;  %v2316_v2 = vadd.f32 %v2315_v27, %v2251_v39  ;;  %v2275_v54 = vadd.f32 %v6679_v20, %v2210_v0  ;;  %v2270_v18 = vadd.f32 %v6676_v19, %v2205_v26 }
 0x2d2   : > { %v6681_v31 = vpop.f32.mrf.mxu0  ;;  %v6950_v40 = vpop.f32.mrf.mxu1 }
 0x2d3   : > { %v6140_v16 = vmul.f32 -1.442695, %v8545_v1  ;;  %v8549_v3 = vmul.f32 %v8540_v36, %v2316_v2  ;;  %v2327_v43 = vadd.f32 %v6950_v40, %v2262_v50  ;;  %v6682_v32 = vadd.f32 %v6681_v31, %v6680_v59 }
 0x2d4   : > { %v2318_v51 = vpop.f32.mrf.mxu1 }
 0x2d5   : > { %7417 = vpow2.f32 %v6140_v16  ;;  %v6138_v5 = vmul.f32 -1.442695, %v8549_v3  ;;  %v8555_v14 = vmul.f32 %v8540_v36, %v2327_v43  ;;  %v2319_v38 = vadd.f32 %v2318_v51, %v2254_v9 }
 0x2d6   : > { %v6953_v15 = vpop.f32.mrf.mxu1  ;;  %v2278_v13 = vadd.f32 %v6682_v32, %v2213_v35 }
 0x2d7   : > { %7419 = vpow2.f32 %v6138_v5  ;;  %v6141_v57 = vmul.f32 -1.442695, %v8555_v14  ;;  %v8560_v37 = vmul.f32 %v8540_v36, %v2319_v38  ;;  %v2340_v42 = vadd.f32 %v6953_v15, %v2275_v54 }
 0x2d8   : > { %v2331_v28 = vpop.f32.mrf.mxu1 }
 0x2d9   : > { %7421 = vpow2.f32 %v6141_v57  ;;  %v6139_v22 = vmul.f32 -1.442695, %v8560_v37  ;;  %v2359_v63 = vmul.f32 %v8540_v36, %v2340_v42  ;;  %v2332_v46 = vadd.f32 %v2331_v28, %v2267_v55 }
 0x2da   : > { %v6954_v60 = vpop.f32.mrf.mxu1 }
 0x2db   : > { %7423 = vpow2.f32 %v6139_v22  ;;  %v6144_v56 = vmul.f32 -1.442695, %v2359_v63  ;;  %v8565_v47 = vmul.f32 %v8540_v36, %v2332_v46  ;;  %v2343_v7 = vadd.f32 %v6954_v60, %v2278_v13  ;;  %v7268_v13 = vld [vmem:[%s9738_s4 + $0x130] sm:$0xff]  }
 0x2dc   : > { %v2334_v11 = vpop.f32.mrf.mxu1 }
 0x2dd   : > { %7425 = vpow2.f32 %v6144_v56  ;;  %v6142_v58 = vmul.f32 -1.442695, %v8565_v47  ;;  %v8569_v17 = vmul.f32 %v8540_v36, %v2343_v7  ;;  %v2335_v34 = vadd.f32 %v2334_v11, %v2270_v18 }
 0x2df   : > { %7427 = vpow2.f32 %v6142_v58  ;;  %v6145_v4 = vmul.f32 -1.442695, %v8569_v17  ;;  %v8573_v6 = vmul.f32 %v8540_v36, %v2335_v34 }
 0x2e1   : > { %7429 = vpow2.f32 %v6145_v4  ;;  %v6143_v49 = vmul.f32 -1.442695, %v8573_v6 }
 0x2e2   : > { %v7418_v52 = vpop.eup %7417 }
 0x2e3   : > { %v2387_v23 = vadd.f32 1.0, %v7418_v52  ;;  %7431 = vpow2.f32 %v6143_v49 }
 0x2e4   : > { %v7420_v45 = vpop.eup %7419 }
 0x2e5   : > { %7433 = vrcp.f32 %v2387_v23  ;;  %v2385_v53 = vadd.f32 1.0, %v7420_v45 }
 0x2e6   : > { %v7422_v62 = vpop.eup %7421 }
 0x2e7   : > { %7435 = vrcp.f32 %v2385_v53  ;;  %v2388_v24 = vadd.f32 1.0, %v7422_v62 }
 0x2e8   : > { %v7424_v8 = vpop.eup %7423 }
 0x2e9   : > { %7437 = vrcp.f32 %v2388_v24  ;;  %v2386_v39 = vadd.f32 1.0, %v7424_v8 }
 0x2ea   : > { %v7426_v29 = vpop.eup %7425 }
 0x2eb   : > { %7439 = vrcp.f32 %v2386_v39  ;;  %v2391_v10 = vadd.f32 1.0, %v7426_v29 }
 0x2ec   : > { %v7428_v36 = vpop.eup %7427 }
 0x2ed   : > { %7441 = vrcp.f32 %v2391_v10  ;;  %v2389_v48 = vadd.f32 1.0, %v7428_v36 }
 0x2ee   : > { %v7430_v20 = vpop.eup %7429 }
 0x2ef   : > { %7443 = vrcp.f32 %v2389_v48  ;;  %v2392_v59 = vadd.f32 1.0, %v7430_v20 }
 0x2f0   : > { %v7432_v27 = vpop.eup %7431 }
 0x2f1   : > { %7445 = vrcp.f32 %v2392_v59  ;;  %v2390_v61 = vadd.f32 1.0, %v7432_v27 }
 0x2f2   : > { %v7434_v2 = vpop.eup %7433 }
 0x2f3   : > { %v2411_v50 = vmul.f32 %v7434_v2, %v8545_v1  ;;  %7447 = vrcp.f32 %v2390_v61 }
 0x2f4   : > { %v7436_v25 = vpop.eup %7435 }
 0x2f5   : > { %v2419_v30 = vmul.f32 1.6778524, %v2411_v50  ;;  %v2409_v0 = vmul.f32 %v7436_v25, %v8549_v3 }
 0x2f6   : > { %v7438_v33 = vpop.eup %7437 }
 0x2f7   : > { %2427 = vst [vmem:[#allocation2 + $0x20] sm:$0xff] %v2419_v30  ;;  %v2417_v31 = vmul.f32 1.6778524, %v2409_v0  ;;  %v2412_v40 = vmul.f32 %v7438_v33, %v8555_v14  ;;  %v6457_v16 = vpack.c.bf16 %v2419_v30, %v2419_v30  ;;  %v7287_v33 = vld [vmem:[%s9738_s4 + $0x118] sm:$0xff]  }
 0x2f8   : > { %v7440_v43 = vpop.eup %7439 }
 0x2f9   : > { %2425 = vst [vmem:[#allocation2 + $0x10] sm:$0xff] %v2417_v31  ;;  %v2420_v9 = vmul.f32 1.6778524, %v2412_v40  ;;  %v2410_v12 = vmul.f32 %v7440_v43, %v8560_v37  ;;  %v6455_v21 = vpack.c.bf16 %v2417_v31, %v2417_v31  ;;  %2532 = vst [vmem:[#allocation3 + $0x70] sm:$0xf] %v6457_v16 }
 0x2fa   : > { %v7442_v44 = vpop.eup %7441 }
 0x2fb   : > { %2428 = vst [vmem:[#allocation2 + $0x28] sm:$0xff] %v2420_v9  ;;  %v2418_v1 = vmul.f32 1.6778524, %v2410_v12  ;;  %v2415_v32 = vmul.f32 %v7442_v44, %v2359_v63  ;;  %2530 = vst [vmem:[#allocation3 + $0x28] sm:$0xf] %v6455_v21  ;;  %v6458_v51 = vpack.c.bf16 %v2420_v9, %v2420_v9 }
 0x2fc   : > { %2689 = vst [vmem:[#allocation3 + $0x10] sm:$0xf] %v6455_v21  ;;  %v7444_v3 = vpop.eup %7443 }
 0x2fd   : > { %2426 = vst [vmem:[#allocation2 + $0x18] sm:$0xff] %v2418_v1  ;;  %v2423_v54 = vmul.f32 1.6778524, %v2415_v32  ;;  %v2413_v5 = vmul.f32 %v7444_v3, %v8565_v47  ;;  %v6456_v14 = vpack.c.bf16 %v2418_v1, %v2418_v1  ;;  %2533 = vst [vmem:[#allocation3 + $0x94] sm:$0xf] %v6458_v51 }
 0x2fe   : > { %v7446_v38 = vpop.eup %7445  ;;  %v2810_v41 = vld [vmem:[#allocation2 + $0x20] sm:$0xff] }
 0x2ff   : > { %2431 = vst [vmem:[#allocation2 + $0x40] sm:$0xff] %v2423_v54  ;;  %v2421_v19 = vmul.f32 1.6778524, %v2413_v5  ;;  %v2416_v35 = vmul.f32 %v7446_v38, %v8569_v17  ;;  %2531 = vst [vmem:[#allocation3 + $0x4c] sm:$0xf] %v6456_v14  ;;  %v6461_v15 = vpack.c.bf16 %v2423_v54, %v2423_v54  ;;  %v6503_v55 = vpack.c.bf16 %v2810_v41, %v2810_v41  ;;  %v7260_v54 = vld [vmem:[%s9738_s4 + $0x138] sm:$0xff]  }
 0x300   : > { %2690 = vst [vmem:[#allocation3 + $0x34] sm:$0xf] %v6456_v14  ;;  %2849 = vst [vmem:[#allocation3 + $0x1c] sm:$0xf] %v6456_v14  ;;  %v7448_v57 = vpop.eup %7447  ;;  %v2434_v37 = vld [vmem:[#allocation2 + $0xf] sm:$0xff] }
 0x301   : > { %v2537_v42 = vld [vmem:[#allocation2 + $0x9] sm:$0xff]  ;;  %2429 = vst [vmem:[#allocation2 + $0x30] sm:$0xff] %v2421_v19  ;;  %v2424_v26 = vmul.f32 1.6778524, %v2416_v35  ;;  %v2414_v28 = vmul.f32 %v7448_v57, %v8573_v6  ;;  %v2442_v22 = vsel %vm8016_vm6, %v2434_v37, 0.0  ;;  %v2601_v47 = vsel %vm7881_vm1, %v2434_v37, 0.0 }
 0x302   : > { %v2545_v46 = vsel %vm8022_vm7, %v2537_v42, 0.0  ;;  %2536 = vst [vmem:[#allocation3 + $0x100] sm:$0xf] %v6461_v15  ;;  %2850 = vst [vmem:[#allocation3 + $0x40] sm:$0xf] %v6503_v55  ;;  %v6447_v60 = vpack.c.bf16 %v2442_v22, %v2442_v22  ;;  %v8589_v7 = vld [vmem:[#allocation2 + $0x21] sm:$0xff]  ;;  %v6459_v58 = vpack.c.bf16 %v2421_v19, %v2421_v19  ;;  %v6470_v4 = vpack.c.bf16 %v2601_v47, %v2601_v47 }
 0x303   : > { %2691 = vst [vmem:[#allocation3 + $0x58] sm:$0xf] %v6503_v55  ;;  %v6462_v18 = vpack.c.bf16 %v2545_v46, %v2545_v46  ;;  %v8591_v11 = vld [vmem:[#allocation2 + $0x27] sm:$0xff]  ;;  %2432 = vst [vmem:[#allocation2 + $0x48] sm:$0xff] %v2424_v26  ;;  %v2422_v34 = vmul.f32 1.6778524, %v2414_v28 }
 0x304   : > { %v2652_v17 = vld [vmem:[#allocation2 + $0x28] sm:$0xff]  ;;  %v2548_v49 = vsel %vm8040_vm11, %v8589_v7, 0.0  ;;  %v2604_v23 = vsel %vm8030_vm9, %v8591_v11, 0.0  ;;  %2482 = vst [vmem:[#allocation3 + $0x24] sm:$0xf] %v6447_v60  ;;  %v8599_v45 = vld [vmem:[#allocation2 + $0x17] sm:$0xff] }
 0x305   : > { %v8601_v53 = vld [vmem:[#allocation2 + $0x1f] sm:$0xff]  ;;  %v2538_v62 = vld [vmem:[#allocation2 + $0x11] sm:$0xff]  ;;  %2585 = vst [vmem:[#allocation3 + $0x8] sm:$0xf] %v6462_v18  ;;  %v6465_v24 = vpack.c.bf16 %v2548_v49, %v2548_v49  ;;  %v6473_v8 = vpack.c.bf16 %v2604_v23, %v2604_v23  ;;  %v2445_v29 = vsel %vm8048_vm13, %v8591_v11, 0.0  ;;  %v6481_v10 = vpack.c.bf16 %v2652_v17, %v2652_v17  ;;  %2430 = vst [vmem:[#allocation2 + $0x38] sm:$0xff] %v2422_v34 }
 0x306   : > { %2534 = vst [vmem:[#allocation3 + $0xb8] sm:$0xf] %v6459_v58  ;;  %v2443_v48 = vsel %vm8026_vm8, %v8599_v45, 0.0  ;;  %v2444_v20 = vsel %vm8030_vm9, %v8601_v53, 0.0  ;;  %v2546_v27 = vsel %vm8036_vm10, %v2538_v62, 0.0  ;;  %v2602_v61 = vsel %vm8016_vm6, %v8599_v45, 0.0 }
 0x307   : > { %2641 = vst [vmem:[#allocation3 + $0xc] sm:$0xf] %v6470_v4  ;;  %v8617_v2 = vld [vmem:[#allocation2 + $0x19] sm:$0xff]  ;;  %v6448_v50 = vpack.c.bf16 %v2443_v48, %v2443_v48  ;;  %v6449_v25 = vpack.c.bf16 %v2444_v20, %v2444_v20  ;;  %v6463_v30 = vpack.c.bf16 %v2546_v27, %v2546_v27  ;;  %v6471_v0 = vpack.c.bf16 %v2602_v61, %v2602_v61  ;;  %v7267_v15 = vld [vmem:[%s9738_s4 + $0x170] sm:$0xff]   ;;  %v7257_v60 = vld [vmem:[#allocation3 + $0x4] ss:$36 sps:$4 sm:$0xff]  }
 0x308   : > { %2588 = vst [vmem:[#allocation3 + $0x74] sm:$0xf] %v6465_v24  ;;  %2644 = vst [vmem:[#allocation3 + $0x78] sm:$0xf] %v6473_v8  ;;  %v2547_v31 = vsel %vm8044_vm12, %v8617_v2, 0.0  ;;  %v2603_v40 = vsel %vm8026_vm8, %v8601_v53, 0.0  ;;  %v6450_v16 = vpack.c.bf16 %v2445_v29, %v2445_v29  ;;  %v6460_v43 = vpack.c.bf16 %v2422_v34, %v2422_v34  ;;  %3745 = vmatprep.mubr.bf16.mxu0 %v7257_v60 }
 0x309   : > { %2692 = vst [vmem:[#allocation3 + $0x7c] sm:$0xf] %v6481_v10  ;;  %2851 = vst [vmem:[#allocation3 + $0x64] sm:$0xf] %v6481_v10  ;;  %v2814_v9 = vld [vmem:[#allocation2 + $0x40] sm:$0xff]  ;;  %v6464_v12 = vpack.c.bf16 %v2547_v31, %v2547_v31  ;;  %v6472_v21 = vpack.c.bf16 %v2603_v40, %v2603_v40  ;;  %v8625_v44 = vld [vmem:[#allocation2 + $0x2f] sm:$0xff] }
 0x30a   : > { %2483 = vst [vmem:[#allocation3 + $0x48] sm:$0xf] %v6448_v50  ;;  %2484 = vst [vmem:[#allocation3 + $0x6c] sm:$0xf] %v6449_v25  ;;  %v8627_v1 = vld [vmem:[#allocation2 + $0x29] sm:$0xff]  ;;  %v2705_v32 = vsel %vm8022_vm7, %v2538_v62, 0.0  ;;  %v6507_v17 = vpack.c.bf16 %v2814_v9, %v2814_v9 }
 0x30b   : > { %2586 = vst [vmem:[#allocation3 + $0x2c] sm:$0xf] %v6463_v30  ;;  %2642 = vst [vmem:[#allocation3 + $0x30] sm:$0xf] %v6471_v0  ;;  %v2706_v51 = vsel %vm8036_vm10, %v8617_v2, 0.0  ;;  %v2812_v3 = vld [vmem:[#allocation2 + $0x30] sm:$0xff]  ;;  %v6486_v35 = vpack.c.bf16 %v2705_v32, %v2705_v32 }
 0x30c   : > { %v2446_v14 = vsel %vm8052_vm14, %v8625_v44, 0.0  ;;  %2485 = vst [vmem:[#allocation3 + $0x90] sm:$0xf] %v6450_v16  ;;  %v2549_v41 = vsel %vm8056_vm15, %v8627_v1, 0.0  ;;  %v2605_v19 = vsel %vm8048_vm13, %v8625_v44, 0.0  ;;  %v8649_v42 = vld [vmem:[#allocation2 + $0x41] sm:$0xff]  ;;  %v6487_v28 = vpack.c.bf16 %v2706_v51, %v2706_v51 }
 0x30d   : > { %2535 = vst [vmem:[#allocation3 + $0xdc] sm:$0xf] %v6460_v43  ;;  %2694 = vst [vmem:[#allocation3 + $0xc4] sm:$0xf] %v6460_v43  ;;  %v6451_v55 = vpack.c.bf16 %v2446_v14, %v2446_v14  ;;  %v6466_v57 = vpack.c.bf16 %v2549_v41, %v2549_v41  ;;  %v6474_v37 = vpack.c.bf16 %v2605_v19, %v2605_v19  ;;  %v8651_v26 = vld [vmem:[#allocation2 + $0x47] sm:$0xff]  ;;  %v2552_v47 = vsel %vm7940_vm2, %v8649_v42, 0.0 }
 0x30e   : > { %2587 = vst [vmem:[#allocation3 + $0x50] sm:$0xf] %v6464_v12  ;;  %2643 = vst [vmem:[#allocation3 + $0x54] sm:$0xf] %v6472_v21  ;;  %v2656_v22 = vld [vmem:[#allocation2 + $0x48] sm:$0xff]  ;;  %v6505_v58 = vpack.c.bf16 %v2812_v3, %v2812_v3  ;;  %v8656_v4 = vld [vmem:[#allocation2 + $0x31] sm:$0xff]  ;;  %v6469_v23 = vpack.c.bf16 %v2552_v47, %v2552_v47 }
 0x30f   : > { %v7255_v46 = vld [vmem:[#allocation3] ss:$36 sps:$4 sm:$0xff]   ;;  %2745 = vst [vmem:[#allocation3 + $0x14] sm:$0xf] %v6486_v35  ;;  %v6485_v34 = vpack.c.bf16 %v2656_v22, %v2656_v22  ;;  %2486 = vst [vmem:[#allocation3 + $0xb4] sm:$0xf] %v6451_v55 }
 0x310   : > { %2589 = vst [vmem:[#allocation3 + $0x98] sm:$0xf] %v6466_v57  ;;  %v8658_v49 = vld [vmem:[#allocation2 + $0x37] sm:$0xff]  ;;  %2645 = vst [vmem:[#allocation3 + $0x9c] sm:$0xf] %v6474_v37  ;;  %v2608_v24 = vsel %vm8098_vm5, %v8651_v26, 0.0  ;;  %3746 = vmatmul.mubr.bf16.vlgmr.msra.gmra.mxu0 %v7255_v46 }
 0x311   : > { %2746 = vst [vmem:[#allocation3 + $0x38] sm:$0xf] %v6487_v28  ;;  %v2761_v8 = vsel %vm7881_vm1, %v8599_v45, 0.0  ;;  %v2762_v29 = vsel %vm8016_vm6, %v8601_v53, 0.0  ;;  %v2550_v48 = vsel %vm8084_vm3, %v8656_v4, 0.0  ;;  %v2606_v20 = vsel %vm8052_vm14, %v8658_v49, 0.0  ;;  %6776 = vmatpush3.bf16.msra.mxu0 %v7260_v54 }
 0x312   : > { %v8675_v27 = vld [vmem:[#allocation2 + $0x3f] sm:$0xff]  ;;  %v2447_v56 = vsel %vm8092_vm4, %v8658_v49, 0.0  ;;  %v6477_v50 = vpack.c.bf16 %v2608_v24, %v2608_v24  ;;  %2852 = vst [vmem:[#allocation3 + $0x88] sm:$0xf] %v6505_v58  ;;  %2693 = vst [vmem:[#allocation3 + $0xa0] sm:$0xf] %v6505_v58  ;;  %v6467_v25 = vpack.c.bf16 %v2550_v48, %v2550_v48  ;;  %v6475_v30 = vpack.c.bf16 %v2606_v20, %v2606_v20 }
 0x313   : > { %v8680_v45 = vld [vmem:[#allocation2 + $0x39] sm:$0xff]  ;;  %2854 = vst [vmem:[#allocation3 + $0xd0] sm:$0xf] %v6507_v17  ;;  %2695 = vst [vmem:[#allocation3 + $0xe8] sm:$0xf] %v6507_v17  ;;  %v2448_v0 = vsel %vm8098_vm5, %v8675_v27, 0.0  ;;  %v6452_v31 = vpack.c.bf16 %v2447_v56, %v2447_v56  ;;  %v6494_v3 = vpack.c.bf16 %v2761_v8, %v2761_v8  ;;  %6777 = vmatprep.subr.bf16.mxu0 %v7267_v15 }
 0x314   : > { %2696 = vst [vmem:[#allocation3 + $0x10c] sm:$0xf] %v6485_v34  ;;  %2855 = vst [vmem:[#allocation3 + $0xf4] sm:$0xf] %v6485_v34  ;;  %v7272_v53 = vld [vmem:[%s9738_s4 + $0x1b8] sm:$0xff]   ;;  %v7273_v43 = vld [vmem:[%s9738_s4 + $0x168] sm:$0xff]   ;;  %v6453_v12 = vpack.c.bf16 %v2448_v0, %v2448_v0  ;;  %v6495_v35 = vpack.c.bf16 %v2762_v29, %v2762_v29 }
 0x315   : > { %2592 = vst [vmem:[#allocation3 + $0x104] sm:$0xf] %v6469_v23  ;;  %v2813_v40 = vld [vmem:[#allocation2 + $0x38] sm:$0xff]  ;;  %v7262_v16 = vld [vmem:[#allocation3 + $0x4c] ss:$36 sps:$4 sm:$0xff]   ;;  %v2551_v32 = vsel %vm8114_vm0, %v8680_v45, 0.0  ;;  %6778 = vmatpush3.bf16.msra.mxu0 %v7268_v13 }
 0x316   : > { %v7275_v9 = vld [vmem:[%s9738_s4 + $0x1f0] sm:$0xff]   ;;  %v2607_v51 = vsel %vm8092_vm4, %v8675_v27, 0.0  ;;  %2648 = vst [vmem:[#allocation3 + $0x108] sm:$0xf] %v6477_v50  ;;  %v7264_v54 = vld [vmem:[#allocation3 + $0x8] ss:$36 sps:$4 sm:$0xff]   ;;  %v6468_v41 = vpack.c.bf16 %v2551_v32, %v2551_v32  ;;  %3753 = vmatprep.mubr.bf16.mxu0 %v7262_v16  ;;  %v6506_v15 = vpack.c.bf16 %v2813_v40, %v2813_v40  ;;  %6779 = vmatprep.subr.bf16.mxu0 %v7273_v43 }
 0x317   : > { %v7266_v14 = vld [vmem:[#allocation3 + $0xc] ss:$36 sps:$4 sm:$0xff]   ;;  %2590 = vst [vmem:[#allocation3 + $0xbc] sm:$0xf] %v6467_v25  ;;  %2646 = vst [vmem:[#allocation3 + $0xc0] sm:$0xf] %v6475_v30  ;;  %v6476_v19 = vpack.c.bf16 %v2607_v51, %v2607_v51 }
 0x318   : > { %2487 = vst [vmem:[#allocation3 + $0xd8] sm:$0xf] %v6452_v31  ;;  %v2923_v55 = vld [vmem:[#allocation3 + $0x48] sm:$0xff]  ;;  %2488 = vst [vmem:[#allocation3 + $0xfc] sm:$0xf] %v6453_v12  ;;  %v2707_v37 = vsel %vm8044_vm12, %v8589_v7, 0.0  ;;  %3810 = vmatprep.mubr.bf16.mxu1 %v7266_v14 }
 0x319   : > { %v2928_v57 = vld [vmem:[#allocation3 + $0x6c] sm:$0xff]  ;;  %2801 = vst [vmem:[#allocation3 + $0x18] sm:$0xf] %v6494_v3  ;;  %v2708_v28 = vsel %vm8040_vm11, %v8627_v1, 0.0  ;;  %v7270_v22 = vld [vmem:[#allocation3 + $0x54] ss:$36 sps:$4 sm:$0xff]   ;;  %v6488_v46 = vpack.c.bf16 %v2707_v37, %v2707_v37  ;;  %3811 = vmatmul.mubr.bf16.vlgmr.msra.gmra.mxu1 %v7264_v54 }
 0x31a   : > { %2591 = vst [vmem:[#allocation3 + $0xe0] sm:$0xf] %v6468_v41  ;;  %2647 = vst [vmem:[#allocation3 + $0xe4] sm:$0xf] %v6476_v19  ;;  %v6489_v60 = vpack.c.bf16 %v2708_v28, %v2708_v28  ;;  %v2763_v47 = vsel %vm8026_vm8, %v8591_v11, 0.0  ;;  %v2764_v58 = vsel %vm8030_vm9, %v8625_v44, 0.0  ;;  %3818 = vmatprep.mubr.bf16.mxu1 %v7270_v22  ;;  %6816 = vmatpush3.bf16.msra.mxu1 %v7272_v53 }
 0x31b   : > { %2802 = vst [vmem:[#allocation3 + $0x3c] sm:$0xf] %v6495_v35  ;;  %v8715_v17 = vld [vmem:[#allocation2 + $0x49] sm:$0xff]  ;;  %v6496_v24 = vpack.c.bf16 %v2763_v47, %v2763_v47  ;;  %v6497_v8 = vpack.c.bf16 %v2764_v58, %v2764_v58  ;;  %v2709_v11 = vsel %vm8056_vm15, %v8656_v4, 0.0  ;;  %v2710_v52 = vsel %vm8084_vm3, %v8680_v45, 0.0  ;;  %v7279_v44 = vld [vmem:[%s9738_s4 + $0x160] sm:$0xff]   ;;  %6817 = vmatprep.subr.bf16.mxu1 %v7275_v9 }
 0x31c   : > { %v7274_v34 = vld [vmem:[%s9738_s4 + $0x128] sm:$0xff]   ;;  %v7278_v23 = vld [vmem:[%s9738_s4 + $0x1b0] sm:$0xff]   ;;  %2853 = vst [vmem:[#allocation3 + $0xac] sm:$0xf] %v6506_v15  ;;  %v6227_v36 = vcombine.low %v2923_v55, %v2928_v57  ;;  %2747 = vst [vmem:[#allocation3 + $0x5c] sm:$0xf] %v6488_v46  ;;  %v6490_v29 = vpack.c.bf16 %v2709_v11, %v2709_v11  ;;  %v6491_v48 = vpack.c.bf16 %v2710_v52, %v2710_v52 }
 0x31d   : > { %2748 = vst [vmem:[#allocation3 + $0x80] sm:$0xf] %v6489_v60  ;;  %v2765_v20 = vsel %vm8048_vm13, %v8658_v49, 0.0  ;;  %v2760_v56 = vld [vmem:[#allocation2 + $0x4f] sm:$0xff]  ;;  %2803 = vst [vmem:[#allocation3 + $0x60] sm:$0xf] %v6496_v24  ;;  %6780 = vmatpush3.bf16.msra.mxu0 %v7274_v34 }
 0x31e   : > { %v7276_v50 = vld [vmem:[#allocation3 + $0x94] ss:$36 sps:$4 sm:$0xff]   ;;  %v7282_v13 = vld [vmem:[%s9738_s4 + $0x1e8] sm:$0xff]   ;;  %2804 = vst [vmem:[#allocation3 + $0x84] sm:$0xf] %v6497_v8  ;;  %v2766_v53 = vsel %vm8052_vm14, %v8675_v27, 0.0  ;;  %v6498_v25 = vpack.c.bf16 %v2765_v20, %v2765_v20  ;;  %3754 = vmatmul.mubr.bf16.gmra.mxu0 %v6227_v36  ;;  %6818 = vmatpush3.bf16.msra.mxu1 %v7278_v23 }
 0x31f   : > { %v2711_v39 = vsel %vm8114_vm0, %v8649_v42, 0.0  ;;  %v2712_v49 = vsel %vm7940_vm2, %v8715_v17, 0.0  ;;  %2749 = vst [vmem:[#allocation3 + $0xa4] sm:$0xf] %v6490_v29  ;;  %2750 = vst [vmem:[#allocation3 + $0xc8] sm:$0xf] %v6491_v48  ;;  %v6499_v30 = vpack.c.bf16 %v2766_v53, %v2766_v53  ;;  %3761 = vmatprep.mubr.bf16.mxu0 %v7276_v50  ;;  %6781 = vmatprep.subr.bf16.mxu0 %v7279_v44 }
 0x320   : > { %v6492_v0 = vpack.c.bf16 %v2711_v39, %v2711_v39  ;;  %v6493_v31 = vpack.c.bf16 %v2712_v49, %v2712_v49  ;;  %v2767_v5 = vsel %vm8092_vm4, %v8651_v26, 0.0  ;;  %v7281_v27 = vld [vmem:[%s9738_s4 + $0x120] sm:$0xff]   ;;  %2805 = vst [vmem:[#allocation3 + $0xa8] sm:$0xf] %v6498_v25  ;;  %v2768_v18 = vsel %vm8098_vm5, %v2760_v56, 0.0  ;;  %v7285_v26 = vld [vmem:[%s9738_s4 + $0x1a8] sm:$0xff]   ;;  %6819 = vmatprep.subr.bf16.mxu1 %v7282_v13 }
 0x321   : > { %v6500_v40 = vpack.c.bf16 %v2767_v5, %v2767_v5  ;;  %v2865_v16 = vsel %vm8022_vm7, %v8617_v2, 0.0  ;;  %v7286_v61 = vld [vmem:[%s9738_s4 + $0x158] sm:$0xff]   ;;  %v7288_v62 = vld [vmem:[%s9738_s4 + $0x1e0] sm:$0xff]   ;;  %2806 = vst [vmem:[#allocation3 + $0xcc] sm:$0xf] %v6499_v30  ;;  %v6501_v43 = vpack.c.bf16 %v2768_v18, %v2768_v18  ;;  %v2866_v63 = vsel %vm8036_vm10, %v8589_v7, 0.0  ;;  %6782 = vmatpush3.bf16.msra.mxu0 %v7281_v27 }
 0x322   : > { %2751 = vst [vmem:[#allocation3 + $0xec] sm:$0xf] %v6492_v0  ;;  %2752 = vst [vmem:[#allocation3 + $0x110] sm:$0xf] %v6493_v31  ;;  %v6510_v2 = vpack.c.bf16 %v2865_v16, %v2865_v16  ;;  %v2938_v9 = vld [vmem:[#allocation3 + $0xb4] sm:$0xff]  ;;  %v6511_v32 = vpack.c.bf16 %v2866_v63, %v2866_v63  ;;  %v2867_v51 = vsel %vm8044_vm12, %v8627_v1, 0.0  ;;  %6820 = vmatpush3.bf16.msra.mxu1 %v7285_v26  ;;  %6783 = vmatprep.subr.bf16.mxu0 %v7286_v61 }
 0x323   : > { %v7280_v12 = vld [vmem:[#allocation3 + $0x50] ss:$36 sps:$4 sm:$0xff]   ;;  %2807 = vst [vmem:[#allocation3 + $0xf0] sm:$0xf] %v6500_v40  ;;  %v7283_v3 = vld [vmem:[#allocation3 + $0x9c] ss:$36 sps:$4 sm:$0xff]   ;;  %v6512_v14 = vpack.c.bf16 %v2867_v51, %v2867_v51  ;;  %6821 = vmatprep.subr.bf16.mxu1 %v7288_v62 }
 0x324   : > { %2808 = vst [vmem:[#allocation3 + $0x114] sm:$0xf] %v6501_v43  ;;  %2905 = vst [vmem:[#allocation3 + $0x20] sm:$0xf] %v6510_v2  ;;  %v2868_v54 = vsel %vm8040_vm11, %v8656_v4, 0.0  ;;  %v2869_v7 = vsel %vm8056_vm15, %v8680_v45, 0.0  ;;  %3819 = vmatmul.mubr.bf16.gmra.mxu1 %v7280_v12 }
 0x325   : > { %v2933_v59 = vld [vmem:[#allocation3 + $0x90] sm:$0xff]  ;;  %v7291_v1 = vld [vmem:[%s9738_s4 + $0x1a0] sm:$0xff]   ;;  %2906 = vst [vmem:[#allocation3 + $0x44] sm:$0xf] %v6511_v32  ;;  %v6513_v41 = vpack.c.bf16 %v2868_v54, %v2868_v54  ;;  %v2870_v6 = vsel %vm8084_vm3, %v8649_v42, 0.0  ;;  %v6514_v4 = vpack.c.bf16 %v2869_v7, %v2869_v7  ;;  %v2871_v38 = vsel %vm8114_vm0, %v8715_v17, 0.0  ;;  %3826 = vmatprep.mubr.bf16.mxu1 %v7283_v3  ;;  %6784 = vmatpush3.bf16.msra.mxu0 %v7287_v33 }
 0x326   : > { %v6236_v45 = vcombine.low %v2933_v59, %v2938_v9  ;;  %v7292_v19 = vld [vmem:[%s9738_s4 + $0x150] sm:$0xff]   ;;  %2907 = vst [vmem:[#allocation3 + $0x68] sm:$0xf] %v6512_v14  ;;  %v6515_v35 = vpack.c.bf16 %v2870_v6, %v2870_v6  ;;  %v6516_v55 = vpack.c.bf16 %v2871_v38, %v2871_v38  ;;  %v7289_v57 = vld [vmem:[#allocation3 + $0xdc] ss:$36 sps:$4 sm:$0xff]   ;;  %v7299_v37 = vld [vmem:[%s9738_s4 + $0x148] sm:$0xff]   ;;  %6822 = vmatpush3.bf16.msra.mxu1 %v7291_v1 }
 0x327   : > { %v7295_v42 = vld [vmem:[%s9738_s4 + $0x1d8] sm:$0xff]   ;;  %2908 = vst [vmem:[#allocation3 + $0x8c] sm:$0xf] %v6513_v41  ;;  %2909 = vst [vmem:[#allocation3 + $0xb0] sm:$0xf] %v6514_v4  ;;  %v7294_v10 = vld [vmem:[%s9738_s4 + $0x110] sm:$0xff]   ;;  %6785 = vmatprep.subr.bf16.mxu0 %v7292_v19 }
 0x328   : > { %3762 = vmatmul.mubr.bf16.gmra.mxu0 %v6236_v45  ;;  %2910 = vst [vmem:[#allocation3 + $0xd4] sm:$0xf] %v6515_v35  ;;  %2911 = vst [vmem:[#allocation3 + $0xf8] sm:$0xf] %v6516_v55  ;;  %v7298_v21 = vld [vmem:[%s9738_s4 + $0x198] sm:$0xff]   ;;  %v7301_v22 = vld [vmem:[%s9738_s4 + $0x1d0] sm:$0xff]   ;;  %6823 = vmatprep.subr.bf16.mxu1 %v7295_v42 }
 0x329   : > { %3769 = vmatprep.mubr.bf16.mxu0 %v7289_v57  ;;  %v2943_v28 = vld [vmem:[#allocation3 + $0xd8] sm:$0xff]  ;;  %v7300_v60 = vld [vmem:[%s9738_s4 + $0x108] sm:$0xff]   ;;  %6786 = vmatpush3.bf16.msra.mxu0 %v7294_v10  ;;  %v7305_v58 = vld [vmem:[%s9738_s4 + $0x190] sm:$0xff]   ;;  %vm9889_vm0 = vcmask 130048  }
 0x32a   : > { %v2948_v15 = vld [vmem:[#allocation3 + $0xfc] sm:$0xff]  ;;  %v7296_v47 = vld [vmem:[#allocation3 + $0xe4] ss:$36 sps:$4 sm:$0xff]   ;;  %6824 = vmatpush3.bf16.msra.mxu1 %v7298_v21  ;;  %6787 = vmatprep.subr.bf16.mxu0 %v7299_v37  ;;  %v7304_v24 = vld [vmem:[#allocation3 + $0x14] ss:$36 sps:$4 sm:$0xff]  }
 0x32b   : > { %v7293_v46 = vld [vmem:[#allocation3 + $0x98] ss:$36 sps:$4 sm:$0xff]   ;;  %v7306_v17 = vld [vmem:[%s9738_s4 + $0x140] sm:$0xff]   ;;  %v6245_v34 = vcombine.low %v2943_v28, %v2948_v15  ;;  %v7309_v23 = vld [vmem:[%s9738_s4 + $0x1c8] sm:$0xff]   ;;  %6825 = vmatprep.subr.bf16.mxu1 %v7301_v22 }
 0x32c   : > { %3827 = vmatmul.mubr.bf16.gmra.mxu1 %v7293_v46  ;;  %v7308_v8 = vld [vmem:[%s9738_s4 + $0x100] sm:$0xff]   ;;  %v7310_v11 = vld [vmem:[%s9738_s4 + $0x188] sm:$0xff]   ;;  %v7314_v36 = vld [vmem:[%s9738_s4 + $0x238] sm:$0xff]  }
 0x32d   : > { %3834 = vmatprep.mubr.bf16.mxu1 %v7296_v47  ;;  %6788 = vmatpush3.bf16.msra.mxu0 %v7300_v60  ;;  %v7307_v52 = vld [vmem:[#allocation3 + $0xe0] ss:$36 sps:$4 sm:$0xff]   ;;  %v7302_v48 = vld [vmem:[#allocation3 + $0x10] ss:$36 sps:$4 sm:$0xff]   ;;  %v7322_v13 = vld [vmem:[%s9738_s4 + $0x228] sm:$0xff]  }
 0x32e   : > { %6826 = vmatpush3.bf16.msra.mxu1 %v7305_v58  ;;  %6789 = vmatprep.subr.bf16.mxu0 %v7306_v17  ;;  %v7315_v44 = vld [vmem:[%s9738_s4 + $0x1c0] sm:$0xff]   ;;  %v7319_v56 = vld [vmem:[%s9738_s4 + $0x230] sm:$0xff]   ;;  %v7311_v53 = vld [vmem:[#allocation3 + $0x18] ss:$36 sps:$4 sm:$0xff]  }
 0x32f   : > { %6827 = vmatprep.subr.bf16.mxu1 %v7309_v23  ;;  %v7313_v29 = vld [vmem:[#allocation3 + $0x1c] ss:$36 sps:$4 sm:$0xff]   ;;  %v7320_v39 = vld [vmem:[#allocation3 + $0x64] ss:$36 sps:$4 sm:$0xff]   ;;  %v7327_v16 = vld [vmem:[#allocation3 + $0xac] ss:$36 sps:$4 sm:$0xff]  }
 0x330   : > { %3770 = vmatmul.mubr.bf16.gmra.mxu0 %v6245_v34  ;;  %v7318_v20 = vld [vmem:[%s9738_s4 + $0x180] sm:$0xff]   ;;  %v2925_v49 = vld [vmem:[#allocation3 + $0x58] sm:$0xff]  ;;  %v7332_v61 = vld [vmem:[%s9738_s4 + $0x210] sm:$0xff]  }
 0x331   : > { %3875 = vmatprep.mubr.bf16.mxu0 %v7304_v24  ;;  %6790 = vmatpush3.bf16.msra.mxu0 %v7308_v8  ;;  %v7316_v50 = vld [vmem:[#allocation3 + $0x5c] ss:$36 sps:$4 sm:$0xff]   ;;  %v7323_v31 = vld [vmem:[#allocation3 + $0xa4] ss:$36 sps:$4 sm:$0xff]   ;;  %v7330_v62 = vld [vmem:[#allocation3 + $0xec] ss:$36 sps:$4 sm:$0xff]  }
 0x332   : > { %6828 = vmatpush3.bf16.msra.mxu1 %v7310_v11  ;;  %6955 = vmatprep.subr.bf16.mxu0 %v7314_v36  ;;  %v2930_v25 = vld [vmem:[#allocation3 + $0x7c] sm:$0xff]  ;;  %v2940_v18 = vld [vmem:[#allocation3 + $0xc4] sm:$0xff]  ;;  %v2950_v2 = vld [vmem:[#allocation3 + $0x10c] sm:$0xff] }
 0x333   : > { %6829 = vmatprep.subr.bf16.mxu1 %v7315_v44  ;;  %v6231_v30 = vcombine.low %v2925_v49, %v2930_v25  ;;  %v7325_v0 = vld [vmem:[%s9738_s4 + $0x220] sm:$0xff]   ;;  %v7329_v5 = vld [vmem:[%s9738_s4 + $0x218] sm:$0xff]   ;;  %v7336_v43 = vld [vmem:[%s9738_s4 + $0x208] sm:$0xff]  }
 0x334   : > { %3835 = vmatmul.mubr.bf16.gmra.mxu1 %v7307_v52  ;;  %v2935_v27 = vld [vmem:[#allocation3 + $0xa0] sm:$0xff]  ;;  %v2945_v63 = vld [vmem:[#allocation3 + $0xe8] sm:$0xff]  ;;  %v7334_v12 = vld [vmem:[#allocation3 + $0xf4] ss:$36 sps:$4 sm:$0xff]  }
 0x335   : > { %3940 = vmatprep.mubr.bf16.mxu1 %v7313_v29  ;;  %v7326_v40 = vld [vmem:[#allocation3 + $0x60] ss:$36 sps:$4 sm:$0xff]   ;;  %v6240_v26 = vcombine.low %v2935_v27, %v2940_v18  ;;  %v7333_v9 = vld [vmem:[#allocation3 + $0xa8] ss:$36 sps:$4 sm:$0xff]   ;;  %v6249_v32 = vcombine.low %v2945_v63, %v2950_v2  ;;  %v7339_v54 = vld [vmem:[#allocation3 + $0xf0] ss:$36 sps:$4 sm:$0xff]  }
 0x336   : > { %6830 = vmatpush3.bf16.msra.mxu1 %v7318_v20  ;;  %v7338_v51 = vld [vmem:[%s9738_s4 + $0x200] sm:$0xff]   ;;  %v7340_v14 = vld [vmem:[#allocation3 + $0x68] ss:$36 sps:$4 sm:$0xff]   ;;  %v7341_v7 = vld [vmem:[#allocation3 + $0xb0] ss:$36 sps:$4 sm:$0xff]  }
 0x337   : > { %v7337_v3 = vld [vmem:[#allocation3 + $0x20] ss:$36 sps:$4 sm:$0xff]   ;;  %v7342_v59 = vld [vmem:[#allocation3 + $0xf8] ss:$36 sps:$4 sm:$0xff]   ;;  %v7344_v1 = vld [vmem:[%s9739_s5 + $0x30] sm:$0xff]  }
 0x338   : > { %3876 = vmatmul.mubr.bf16.vlgmr.msra.gmra.mxu0 %v7302_v48  ;;  %v7343_v33 = vld [vmem:[%s9739_s5 + $0x38] sm:$0xff]   ;;  %v7345_v41 = vld [vmem:[%s9739_s5 + $0x28] sm:$0xff]   ;;  %v7346_v6 = vld [vmem:[%s9739_s5 + $0x20] sm:$0xff]  }
 0x339   : > { %6956 = vmatpush3.bf16.msra.mxu0 %v7314_v36  ;;  %3883 = vmatprep.mubr.bf16.mxu0 %v7316_v50  ;;  %v7347_v4 = vld [vmem:[%s9739_s5 + $0x18] sm:$0xff]   ;;  %v7348_v38 = vld [vmem:[%s9739_s5 + $0x10] sm:$0xff]   ;;  %v7349_v45 = vld [vmem:[%s9739_s5 + $0x8] sm:$0xff]  }
 0x33a   : > { %6957 = vmatprep.subr.bf16.mxu0 %v7319_v56  ;;  %6979 = vmatprep.subr.bf16.mxu1 %v7343_v33  ;;  %v7350_v19 = vld [vmem:[%s9739_s5] sm:$0xff]   ;;  %vm9890_vm1 = vmmov %vm9889_vm0 }
 0x33b   : > { %vm9891_vm2 = vmmov %vm9889_vm0 }
 0x33c   : > { %3941 = vmatmul.mubr.bf16.vlgmr.msra.gmra.mxu1 %v7311_v53  ;;  %vm9892_vm6 = vmmov %vm9889_vm0 }
 0x33d   : > { %6958 = vmatpush3.bf16.msra.mxu0 %v7319_v56  ;;  %3948 = vmatprep.mubr.bf16.mxu1 %v7320_v39  ;;  %vm9893_vm7 = vmmov %vm9889_vm0 }
 0x33e   : > { %6959 = vmatprep.subr.bf16.mxu0 %v7322_v13  ;;  %6980 = vmatpush3.bf16.msra.mxu1 %v7343_v33  ;;  %vm9894_vm8 = vmmov %vm9889_vm0 }
 0x33f   : > { %6981 = vmatprep.subr.bf16.mxu1 %v7344_v1  ;;  %vm9895_vm9 = vmmov %vm9889_vm0 }
 0x340   : > { %3884 = vmatmul.mubr.bf16.gmra.mxu0 %v6231_v30  ;;  %vm9896_vm10 = vmmov %vm9889_vm0 }
 0x341   : > { %6960 = vmatpush3.bf16.msra.mxu0 %v7322_v13  ;;  %3891 = vmatprep.mubr.bf16.mxu0 %v7323_v31  ;;  %vm9897_vm11 = vmmov %vm9889_vm0 }
 0x342   : > { %6961 = vmatprep.subr.bf16.mxu0 %v7325_v0  ;;  %6982 = vmatpush3.bf16.msra.mxu1 %v7344_v1  ;;  %vm9898_vm12 = vmmov %vm9889_vm0 }
 0x343   : > { %6983 = vmatprep.subr.bf16.mxu1 %v7345_v41  ;;  %vm9899_vm13 = vmmov %vm9889_vm0 }
 0x344   : > { %3949 = vmatmul.mubr.bf16.gmra.mxu1 %v7326_v40  ;;  %vm9900_vm14 = vmmov %vm9889_vm0 }
 0x345   : > { %6962 = vmatpush3.bf16.msra.mxu0 %v7325_v0  ;;  %3956 = vmatprep.mubr.bf16.mxu1 %v7327_v16  ;;  %vm9901_vm15 = vmmov %vm9889_vm0 }
 0x346   : > { %6963 = vmatprep.subr.bf16.mxu0 %v7329_v5  ;;  %6984 = vmatpush3.bf16.msra.mxu1 %v7345_v41  ;;  %vm9902_vm3 = vmmov %vm9889_vm0 }
 0x347   : > { %6985 = vmatprep.subr.bf16.mxu1 %v7346_v6  ;;  %vm9903_vm4 = vmmov %vm9889_vm0 }
 0x348   : > { %3892 = vmatmul.mubr.bf16.gmra.mxu0 %v6240_v26  ;;  %vm9904_vm5 = vmmov %vm9889_vm0 }
 0x349   : > { %6964 = vmatpush3.bf16.msra.mxu0 %v7329_v5  ;;  %3899 = vmatprep.mubr.bf16.mxu0 %v7330_v62 }
 0x34a   : > { %6965 = vmatprep.subr.bf16.mxu0 %v7332_v61  ;;  %6986 = vmatpush3.bf16.msra.mxu1 %v7346_v6 }
 0x34b   : > { %6987 = vmatprep.subr.bf16.mxu1 %v7347_v4 }
 0x34c   : > { %3957 = vmatmul.mubr.bf16.gmra.mxu1 %v7333_v9 }
 0x34d   : > { %6966 = vmatpush3.bf16.msra.mxu0 %v7332_v61  ;;  %3964 = vmatprep.mubr.bf16.mxu1 %v7334_v12 }
 0x34e   : > { %6967 = vmatprep.subr.bf16.mxu0 %v7336_v43  ;;  %6988 = vmatpush3.bf16.msra.mxu1 %v7347_v4 }
 0x34f   : > { %6989 = vmatprep.subr.bf16.mxu1 %v7348_v38 }
 0x350   : > { %3900 = vmatmul.mubr.bf16.gmra.mxu0 %v6249_v32 }
 0x351   : > { %6968 = vmatpush3.bf16.msra.mxu0 %v7336_v43  ;;  %6971 = vmatprep.mubr.bf16.mxu0 %v7337_v3 }
 0x352   : > { %6969 = vmatprep.subr.bf16.mxu0 %v7338_v51  ;;  %6990 = vmatpush3.bf16.msra.mxu1 %v7348_v38 }
 0x353   : > { %6991 = vmatprep.subr.bf16.mxu1 %v7349_v45 }
 0x354   : > { %3965 = vmatmul.mubr.bf16.gmra.mxu1 %v7339_v54 }
 0x355   : > { %6970 = vmatpush3.bf16.msra.mxu0 %v7338_v51 }
 0x356   : > { %6992 = vmatpush3.bf16.msra.mxu1 %v7349_v45 }
 0x357   : > { %6993 = vmatprep.subr.bf16.mxu1 %v7350_v19 }
 0x358   : > { %6972 = vmatmul.mubr.bf16.vlgmr.msra.gmra.mxu0 %v7340_v14 }
 0x359   : > { %6975 = vmatprep.mubr.bf16.mxu0 %v7341_v7 }
 0x35a   : > { %6994 = vmatpush3.bf16.msra.mxu1 %v7350_v19 }
 0x360   : > { %6976 = vmatmul.mubr.bf16.gmra.mxu0 %v7342_v59 }
 0x3d0   : > { %v6711_v35 = vpop.f32.mrf.mxu0 }
 0x3d2   : > { %v6712_v55 = vpop.f32.mrf.mxu0 }
 0x3d3   : > { %v6713_v45 = vadd.f32 %v6712_v55, %v6711_v35 }
 0x3d4   : > { %v8881_v57 = vpop.f32.mrf.mxu0 }
 0x3d6   : > { %v8883_v10 = vpop.f32.mrf.mxu0 }
 0x3d9   : > { %v6751_v42 = vpop.f32.mrf.mxu1 }
 0x3db   : > { %v6752_v21 = vpop.f32.mrf.mxu1 }
 0x3dc   : > { %v6753_v33 = vadd.f32 %v6752_v21, %v6751_v42 }
 0x3dd   : > { %v6754_v28 = vpop.f32.mrf.mxu1 }
 0x3de   : > { %v6717_v37 = vpop.f32.mrf.mxu0 }
 0x3df   : > { %v6755_v22 = vpop.f32.mrf.mxu1 }
 0x3e0   : > { %v6718_v15 = vpop.f32.mrf.mxu0 }
 0x3e1   : > { %v6719_v1 = vadd.f32 %v6718_v15, %v6717_v37  ;;  %v6716_v37 = vadd.f32 %v8883_v10, %v8881_v57 }
 0x3e2   : > { %v6720_v46 = vpop.f32.mrf.mxu0 }
 0x3e4   : > { %v6757_v60 = vpop.f32.mrf.mxu1  ;;  %v6721_v47 = vpop.f32.mrf.mxu0 }
 0x3e6   : > { %v6758_v58 = vpop.f32.mrf.mxu1 }
 0x3e7   : > { %v6759_v14 = vadd.f32 %v6758_v58, %v6757_v60  ;;  %v3813_v60 = vadd.f32 %v6753_v33, %v6713_v45  ;;  %v9881_v45 = vld [vmem:[#allocation8_spill] sm:$0xff] }
 0x3e8   : > { %v8885_v17 = vpop.f32.mrf.mxu0  ;;  %v6760_v34 = vpop.f32.mrf.mxu1 }
 0x3e9   : > { %v3821_v19 = vadd.f32 %v6759_v14, %v6719_v1 }
 0x3ea   : > { %v6724_v23 = vpop.f32.mrf.mxu0  ;;  %v6761_v24 = vpop.f32.mrf.mxu1 }
 0x3eb   : > { %v6762_v4 = vadd.f32 %v6761_v24, %v6760_v34  ;;  %v6725_v15 = vadd.f32 %v6724_v23, %v8885_v17 }
 0x3ec   : > { %v8887_v8 = vpop.f32.mrf.mxu0  ;;  %v6763_v11 = vpop.f32.mrf.mxu1 }
 0x3ee   : > { %v8889_v52 = vpop.f32.mrf.mxu0  ;;  %v6764_v36 = vpop.f32.mrf.mxu1 }
 0x3f0   : > { %v8891_v44 = vpop.f32.mrf.mxu0  ;;  %v8893_v29 = vpop.f32.mrf.mxu1 }
 0x3f1   : > { %9865 = vst [vmem:[#allocation28_spill] sm:$0xff] %v8893_v29 }
 0x3f2   : > { %v8895_v48 = vpop.f32.mrf.mxu0  ;;  %v8897_v20 = vpop.f32.mrf.mxu1 }
 0x3f3   : > { %9866 = vst [vmem:[#allocation14_spill] sm:$0xff] %v8897_v20  ;;  %v6731_v17 = vadd.f32 %v8895_v48, %v8891_v44  ;;  %v9878_v48 = vld [vmem:[#allocation7_spill] sm:$0xff] }
 0x3f4   : > { %v8899_v56 = vpop.f32.mrf.mxu0  ;;  %v6769_v50 = vpop.f32.mrf.mxu1 }
 0x3f5   : > { %9867 = vst [vmem:[#allocation15_spill] sm:$0xff] %v8899_v56 }
 0x3f6   : > { %v8901_v13 = vpop.f32.mrf.mxu0  ;;  %v6770_v53 = vpop.f32.mrf.mxu1 }
 0x3f7   : > { %9868 = vst [vmem:[#allocation4_spill] sm:$0xff] %v8901_v13  ;;  %v6765_v13 = vadd.f32 %v6764_v36, %v6763_v11  ;;  %v6771_v11 = vadd.f32 %v6770_v53, %v6769_v50 }
 0x3f8   : > { %v6791_v25 = vpop.f32.mrf.mxu0  ;;  %v8903_v39 = vpop.f32.mrf.mxu1  ;;  %v9879_v14 = vld [vmem:[#allocation28_spill] sm:$0xff] }
 0x3f9   : > { %9869 = vst [vmem:[#allocation19_spill] sm:$0xff] %v8903_v39  ;;  %v6722_v39 = vadd.f32 %v6721_v47, %v6720_v46  ;;  %v6728_v46 = vadd.f32 %v8889_v52, %v8887_v8  ;;  %v3829_v47 = vadd.f32 %v6765_v13, %v6725_v15 }
 0x3fa   : > { %v6792_v49 = vpop.f32.mrf.mxu0  ;;  %v8905_v30 = vpop.f32.mrf.mxu1  ;;  %v9880_v33 = vld [vmem:[#allocation14_spill] sm:$0xff] }
 0x3fb   : > { %9870 = vst [vmem:[#allocation17_spill] sm:$0xff] %v8905_v30  ;;  %v6793_v20 = vadd.f32 %v6792_v49, %v6791_v25  ;;  %v3824_v35 = vadd.f32 %v6762_v4, %v6722_v39 }
 0x3fc   : > { %v6794_v0 = vpop.f32.mrf.mxu0  ;;  %v6831_v31 = vpop.f32.mrf.mxu1  ;;  %v9873_v23 = vld [vmem:[#allocation15_spill] sm:$0xff] }
 0x3fd   : > { %v3878_v34 = vadd.f32 %v6793_v20, %v3813_v60 }
 0x3fe   : > { %v6795_v5 = vpop.f32.mrf.mxu0  ;;  %v6832_v27 = vpop.f32.mrf.mxu1  ;;  %v9874_v20 = vld [vmem:[#allocation4_spill] sm:$0xff] }
 0x3ff   : > { %v6833_v58 = vadd.f32 %v6832_v27, %v6831_v31  ;;  %v6796_v24 = vadd.f32 %v6795_v5, %v6794_v0  ;;  %v6734_v39 = vadd.f32 %v9874_v20, %v9873_v23  ;;  %v9886_v23 = vld [vmem:[#allocation10_spill] sm:$0xff] }
 0x400   : > { %v6797_v18 = vpop.f32.mrf.mxu0  ;;  %v6834_v40 = vpop.f32.mrf.mxu1  ;;  %v9875_v0 = vld [vmem:[#allocation19_spill] sm:$0xff] }
 0x401   : > { %v3943_v10 = vadd.f32 %v6833_v58, %v3878_v34 }
 0x402   : > { %v6798_v16 = vpop.f32.mrf.mxu0  ;;  %v6835_v26 = vpop.f32.mrf.mxu1 }
 0x403   : > { %v6799_v41 = vadd.f32 %v6798_v16, %v6797_v18  ;;  %v6836_v31 = vadd.f32 %v6835_v26, %v6834_v40  ;;  %v3837_v40 = vadd.f32 %v6771_v11, %v6731_v17  ;;  %v9885_v17 = vld [vmem:[#allocation11_spill] sm:$0xff] }
 0x404   : > { %v6800_v61 = vpop.f32.mrf.mxu0  ;;  %v6837_v62 = vpop.f32.mrf.mxu1 }
 0x405   : > { %v3886_v56 = vadd.f32 %v6799_v41, %v3821_v19 }
 0x406   : > { %v6801_v43 = vpop.f32.mrf.mxu0  ;;  %v6838_v63 = vpop.f32.mrf.mxu1 }
 0x407   : > { %v6839_v29 = vadd.f32 %v6838_v63, %v6837_v62  ;;  %v6802_v42 = vadd.f32 %v6801_v43, %v6800_v61  ;;  %v9877_v62 = vld [vmem:[#allocation6_spill] sm:$0xff] }
 0x408   : > { %v6803_v2 = vpop.f32.mrf.mxu0  ;;  %v6840_v9 = vpop.f32.mrf.mxu1 }
 0x409   : > { %v3889_v27 = vadd.f32 %v6802_v42, %v3824_v35  ;;  %v9884_v35 = vld [vmem:[#allocation9_spill] sm:$0xff] }
 0x40a   : > { %v6804_v12 = vpop.f32.mrf.mxu0  ;;  %v6841_v32 = vpop.f32.mrf.mxu1 }
 0x40b   : > { %v6842_v25 = vadd.f32 %v6841_v32, %v6840_v9  ;;  %v6805_v52 = vadd.f32 %v6804_v12, %v6803_v2 }
 0x40c   : > { %v8907_v51 = vpop.f32.mrf.mxu0  ;;  %v6843_v3 = vpop.f32.mrf.mxu1 }
 0x40d   : > { %9871 = vst [vmem:[#allocation21_spill] sm:$0xff] %v8907_v51  ;;  %v6756_v51 = vadd.f32 %v6755_v22, %v6754_v28  ;;  %v3951_v28 = vadd.f32 %v6839_v29, %v3886_v56  ;;  %v9876_v29 = vld [vmem:[#allocation17_spill] sm:$0xff]  ;;  %v3954_v53 = vadd.f32 %v6842_v25, %v3889_v27  ;;  %v3894_v4 = vadd.f32 %v6805_v52, %v3829_v47 }
 0x40e   : > { %v8909_v54 = vpop.f32.mrf.mxu0  ;;  %v6844_v7 = vpop.f32.mrf.mxu1  ;;  %v6774_v56 = vadd.f32 %v9876_v29, %v9875_v0 }
 0x40f   : > { %9872 = vst [vmem:[#allocation16_spill] sm:$0xff] %v8909_v54  ;;  %v3816_v22 = vadd.f32 %v6756_v51, %v6716_v37  ;;  %v6845_v44 = vadd.f32 %v6844_v7, %v6843_v3 }
 0x410   : > { %v6809_v59 = vpop.f32.mrf.mxu0  ;;  %v8911_v6 = vpop.f32.mrf.mxu1  ;;  %v3840_v1 = vadd.f32 %v6774_v56, %v6734_v39 }
 0x411   : > { %v3881_v8 = vadd.f32 %v6796_v24, %v3816_v22  ;;  %v3959_v34 = vadd.f32 %v6845_v44, %v3894_v4 }
 0x412   : > { %v6810_v38 = vpop.f32.mrf.mxu0  ;;  %v8913_v30 = vpop.f32.mrf.mxu1 }
 0x413   : > { %v6811_v5 = vadd.f32 %v6810_v38, %v6809_v59  ;;  %v3946_v51 = vadd.f32 %v6836_v31, %v3881_v8  ;;  %v6768_v59 = vadd.f32 %v9880_v33, %v9879_v14  ;;  %v6848_v25 = vadd.f32 %v8913_v30, %v8911_v6 }
 0x414   : > { %v6812_v54 = vpop.f32.mrf.mxu0  ;;  %v6849_v21 = vpop.f32.mrf.mxu1  ;;  %v9882_v60 = vld [vmem:[#allocation21_spill] sm:$0xff] }
 0x415   : > { %v3902_v41 = vadd.f32 %v6811_v5, %v3837_v40  ;;  %v3832_v24 = vadd.f32 %v6768_v59, %v6728_v46  ;;  %v9887_v5 = vld [vmem:[#allocation13_spill] sm:$0xff] }
 0x416   : > { %v6813_v55 = vpop.f32.mrf.mxu0  ;;  %v6850_v49 = vpop.f32.mrf.mxu1  ;;  %v9883_v58 = vld [vmem:[#allocation16_spill] sm:$0xff] }
 0x417   : > { %v6814_v26 = vadd.f32 %v6813_v55, %v6812_v54  ;;  %v6851_v61 = vadd.f32 %v6850_v49, %v6849_v21  ;;  %v6808_v42 = vadd.f32 %v9883_v58, %v9882_v60 }
 0x418   : > { %v6973_v36 = vpop.f32.mrf.mxu0  ;;  %v6852_v18 = vpop.f32.mrf.mxu1 }
 0x419   : > { %v4016_v57 = vadd.f32 %v6973_v36, %v3951_v28  ;;  %v3905_v3 = vadd.f32 %v6814_v26, %v3840_v1  ;;  %v3967_v21 = vadd.f32 %v6851_v61, %v3902_v41  ;;  %v3897_v27 = vadd.f32 %v6808_v42, %v3832_v24  ;;  %v9888_v61 = vld [vmem:[#allocation12_spill] sm:$0xff] }
 0x41a   : > { %v4007_v16 = vpop.f32.mrf.mxu0  ;;  %v6853_v50 = vpop.f32.mrf.mxu1 }
 0x41b   : > { %v4008_v13 = vadd.f32 %v4007_v16, %v3943_v10  ;;  %v4040_v43 = vsub.f32 %v4016_v57, %v9877_v62  ;;  %v6854_v2 = vadd.f32 %v6853_v50, %v6852_v18  ;;  %v3962_v39 = vadd.f32 %v6848_v25, %v3897_v27 }
 0x41c   : > { %v6974_v63 = vpop.f32.mrf.mxu0 }
 0x41d   : > { %v4038_v9 = vsub.f32 %v4008_v13, %v9878_v48  ;;  %v4019_v32 = vadd.f32 %v6974_v63, %v3954_v53  ;;  %v4048_v7 = vmul.f32 0.3, %v4040_v43  ;;  %v3970_v22 = vadd.f32 %v6854_v2, %v3905_v3 }
 0x41e   : > { %v4010_v12 = vpop.f32.mrf.mxu0 }
 0x41f   : > { %v4046_v38 = vmul.f32 0.3, %v4038_v9  ;;  %v4041_v54 = vsub.f32 %v4019_v32, %v9881_v45  ;;  %v4011_v19 = vadd.f32 %v4010_v12, %v3946_v51  ;;  %v4056_v18 = vadd.f32 %v4048_v7, %v9877_v62 }
 0x420   : > { %v6977_v37 = vpop.f32.mrf.mxu0 }
 0x421   : > { %v4049_v15 = vmul.f32 0.3, %v4041_v54  ;;  %v4039_v55 = vsub.f32 %v4011_v19, %v9884_v35  ;;  %v4032_v49 = vadd.f32 %v6977_v37, %v3967_v21  ;;  %v4054_v47 = vadd.f32 %v4046_v38, %v9878_v48 }
 0x422   : > { %v4023_v28 = vpop.f32.mrf.mxu0  ;;  %v8949_v8 = vmul.f32 1.3130643, %v4056_v18 }
 0x423   : > { %v4057_v11 = vadd.f32 %v4049_v15, %v9881_v45  ;;  %v4047_v36 = vmul.f32 0.3, %v4039_v55  ;;  %v4024_v31 = vadd.f32 %v4023_v28, %v3959_v34  ;;  %v4044_v46 = vsub.f32 %v4032_v49, %v9885_v17 }
 0x424   : > { %v6978_v57 = vpop.f32.mrf.mxu0  ;;  %v8944_v29 = vmul.f32 1.3130643, %v4054_v47 }
 0x425   : > { %v4055_v10 = vadd.f32 %v4047_v36, %v9884_v35  ;;  %v4042_v20 = vsub.f32 %v4024_v31, %v9886_v23  ;;  %v4035_v30 = vadd.f32 %v6978_v57, %v3970_v22  ;;  %v8942_v6 = vmul.f32 1.3130643, %v4057_v11 }
 0x426   : > { %v4026_v0 = vpop.f32.mrf.mxu0  ;;  %v4052_v13 = vmul.f32 0.3, %v4044_v46 }
 0x427   : > { %v8946_v56 = vmul.f32 1.3130643, %v4055_v10  ;;  %v4045_v16 = vsub.f32 %v4035_v30, %v9887_v5  ;;  %v4050_v52 = vmul.f32 0.3, %v4042_v20  ;;  %v4027_v50 = vadd.f32 %v4026_v0, %v3962_v39 }
 0x428   : > { %v4087_v26 = vpack.c.bf16 %v8942_v6, %v8949_v8  ;;  %v4060_v48 = vadd.f32 %v4052_v13, %v9885_v17 }
 0x429   : > { %v4053_v53 = vmul.f32 0.3, %v4045_v16  ;;  %v4086_v40 = vpack.c.bf16 %v8946_v56, %v8944_v29  ;;  %v4043_v62 = vsub.f32 %v4027_v50, %v9888_v61  ;;  %v4058_v63 = vadd.f32 %v4050_v52, %v9886_v23 }
 0x42a   : > { %v8966_v33 = vmul.f32 1.3130643, %v4060_v48 }
 0x42b   : > { %v4061_v43 = vadd.f32 %v4053_v53, %v9887_v5  ;;  %6995 = vmatprep.mubr.bf16.mxu1 %v4086_v40  ;;  %v4051_v44 = vmul.f32 0.3, %v4043_v62  ;;  %v8962_v51 = vmul.f32 1.3130643, %v4058_v63 }
 0x42c   : > { %6996 = vmatmul.mubr.bf16.vlgmr.msra.gmra.mxu1 %v4087_v26 }
 0x42d   : > { %v4059_v9 = vadd.f32 %v4051_v44, %v9888_v61  ;;  %v8960_v32 = vmul.f32 1.3130643, %v4061_v43 }
 0x42f   : > { %v8964_v14 = vmul.f32 1.3130643, %v4059_v9  ;;  %v4089_v1 = vpack.c.bf16 %v8960_v32, %v8966_v33 }
 0x431   : > { %v4088_v59 = vpack.c.bf16 %v8964_v14, %v8962_v51 }
 0x433   : > { %6999 = vmatprep.mubr.bf16.mxu1 %v4088_v59 }
 0x434   : > { %7000 = vmatmul.mubr.bf16.gmra.mxu1 %v4089_v1 }
 0x4ec   : > { %v8972_v41 = vpop.f32.mrf.mxu1 }
 0x4ed   : > { %v8976_v2 = vmul.f32 %v8972_v41, %v8972_v41 }
 0x4ee   : > { %v8978_v12 = vpop.f32.mrf.mxu1 }
 0x4ef   : > { %4335 = vrot.lane.b32.xlu0 %v8976_v2, %s7716_s16  ;;  %v8998_v45 = vmul.f32 %v8978_v12, %v8978_v12 }
 0x4f0   : > { %v8982_v4 = vpop.f32.mrf.mxu1 }
 0x4f1   : > { %v8986_v38 = vmul.f32 %v8982_v4, %v8982_v4 }
 0x4f2   : > { %v9000_v54 = vpop.f32.mrf.mxu1 }
 0x4f3   : > { %5056 = vrot.lane.b32.xlu0 %v8976_v2, %s7717_s17  ;;  %4337 = vrot.lane.b32.xlu1 %v8986_v38, %s7716_s16  ;;  %v9008_v19 = vmul.f32 %v9000_v54, %v9000_v54 }
 0x4f4   : > { %v9014_v60 = vpop.f32.mrf.mxu1 }
 0x4f5   : > { %v9022_v58 = vmul.f32 %v9014_v60, %v9014_v60 }
 0x4f6   : > { %v9024_v42 = vpop.f32.mrf.mxu1 }
 0x4f7   : > { %4920 = vrot.lane.b32.xlu0 %v8976_v2, %s7718_s18  ;;  %5058 = vrot.lane.b32.xlu1 %v8986_v38, %s7717_s17  ;;  %v9032_v3 = vmul.f32 %v9024_v42, %v9024_v42 }
 0x4f8   : > { %v9034_v7 = vpop.f32.mrf.mxu1 }
 0x4f9   : > { %v9042_v21 = vmul.f32 %v9034_v7, %v9034_v7 }
 0x4fa   : > { %v9048_v37 = vpop.f32.mrf.mxu1 }
 0x4fb   : > { %4331 = vrot.lane.b32.xlu0 %v8998_v45, %s7716_s16  ;;  %4922 = vrot.lane.b32.xlu1 %v8986_v38, %s7718_s18  ;;  %v9056_v15 = vmul.f32 %v9048_v37, %v9048_v37 }
 0x4ff   : > { %5052 = vrot.lane.b32.xlu0 %v8998_v45, %s7717_s17  ;;  %4333 = vrot.lane.b32.xlu1 %v9008_v19, %s7716_s16 }
 0x503   : > { %4916 = vrot.lane.b32.xlu0 %v8998_v45, %s7718_s18  ;;  %5054 = vrot.lane.b32.xlu1 %v9008_v19, %s7717_s17 }
 0x507   : > { %4918 = vrot.lane.b32.xlu1 %v9008_v19, %s7718_s18  ;;  %4343 = vrot.lane.b32.xlu0 %v9022_v58, %s7716_s16 }
 0x50b   : > { %5064 = vrot.lane.b32.xlu0 %v9022_v58, %s7717_s17  ;;  %4339 = vrot.lane.b32.xlu1 %v9032_v3, %s7716_s16 }
 0x50f   : > { %5060 = vrot.lane.b32.xlu0 %v9032_v3, %s7717_s17  ;;  %4345 = vrot.lane.b32.xlu1 %v9042_v21, %s7716_s16 }
 0x513   : > { %4924 = vrot.lane.b32.xlu0 %v9032_v3, %s7718_s18  ;;  %5066 = vrot.lane.b32.xlu1 %v9042_v21, %s7717_s17 }
 0x517   : > { %4341 = vrot.lane.b32.xlu1 %v9056_v15, %s7716_s16 }
 0x51b   : > { %5062 = vrot.lane.b32.xlu1 %v9056_v15, %s7717_s17 }
 0x51f   : > { %4926 = vrot.lane.b32.xlu1 %v9056_v15, %s7718_s18 }
 0x561   : > { %v4336_v35 = vpop.permute.xlu0 %4335 }
 0x562   : > { %v4361_v39 = vsel %vm9893_vm7, %v4336_v35, 0.0  ;;  %vm9908_vm7 = vmmov %vm9889_vm0 }
 0x565   : > { %v5057_v55 = vpop.permute.xlu0 %5056  ;;  %v4338_v34 = vpop.permute.xlu1 %4337 }
 0x566   : > { %v4364_v50 = vsel %vm9897_vm11, %v4338_v34, 0.0  ;;  %v5082_v26 = vsel %vm9900_vm14, %v5057_v55, 0.0 }
 0x569   : > { %v4921_v24 = vpop.permute.xlu0 %4920  ;;  %v5059_v25 = vpop.permute.xlu1 %5058 }
 0x56a   : > { %v5085_v61 = vsel %vm9901_vm15, %v5059_v25, 0.0 }
 0x56d   : > { %v4332_v49 = vpop.permute.xlu0 %4331  ;;  %v4923_v28 = vpop.permute.xlu1 %4922 }
 0x56e   : > { %v4355_v0 = vsel %vm9894_vm8, %v4332_v49, 0.0  ;;  %v4949_v55 = vsel %vm9908_vm7, %v4923_v28, 0.0  ;;  %vm9909_vm8 = vmmov %vm9889_vm0 }
 0x571   : > { %v5053_v22 = vpop.permute.xlu0 %5052  ;;  %v4334_v47 = vpop.permute.xlu1 %4333 }
 0x572   : > { %v4358_v16 = vsel %vm9895_vm9, %v4334_v47, 0.0  ;;  %v5076_v43 = vsel %vm9902_vm3, %v5053_v22, 0.0  ;;  %vm9910_vm9 = vmmov %vm9889_vm0 }
 0x573   : > { %vm9913_vm3 = vmmov %vm9889_vm0 }
 0x575   : > { %v4917_v11 = vpop.permute.xlu0 %4916  ;;  %v5055_v36 = vpop.permute.xlu1 %5054 }
 0x576   : > { %v4940_v44 = vsel %vm9904_vm5, %v4917_v11, 0.0  ;;  %v5079_v48 = vsel %vm9889_vm0, %v5055_v36, 0.0  ;;  %v4211_v36 = vsel %vm9910_vm9, %v8998_v45, 0.0 }
 0x579   : > { %v4919_v31 = vpop.permute.xlu1 %4918  ;;  %v4344_v27 = vpop.permute.xlu0 %4343 }
 0x57a   : > { %v4373_v18 = vsel %vm9889_vm0, %v4344_v27, 0.0 }
 0x57b   : > { %4374 = vadd.xlane.f32.xlu0 %v4373_v18 }
 0x57d   : > { %v4340_v57 = vpop.permute.xlu1 %4339  ;;  %v5065_v5 = vpop.permute.xlu0 %5064 }
 0x57e   : > { %v4367_v10 = vsel %vm9890_vm1, %v4340_v57, 0.0  ;;  %v5094_v52 = vsel %vm9896_vm10, %v5065_v5, 0.0  ;;  %vm9905_vm1 = vmmov %vm9889_vm0 }
 0x57f   : > { %4368 = vadd.xlane.f32.xlu0 %v4367_v10  ;;  %v4946_v9 = vsel %vm9905_vm1, %v4921_v24, 0.0 }
 0x581   : > { %v4346_v17 = vpop.permute.xlu1 %4345  ;;  %v5061_v13 = vpop.permute.xlu0 %5060 }
 0x582   : > { %v4376_v46 = vsel %vm9891_vm2, %v4346_v17, 0.0  ;;  %v5088_v53 = vsel %vm9898_vm12, %v5061_v13, 0.0  ;;  %vm9906_vm2 = vmmov %vm9889_vm0 }
 0x583   : > { %4377 = vadd.xlane.f32.xlu1 %v4376_v46  ;;  %v4943_v59 = vsel %vm9906_vm2, %v4919_v31, 0.0  ;;  %vm9911_vm12 = vmmov %vm9889_vm0 }
 0x584   : > { %v4217_v10 = vsel %vm9911_vm12, %v8976_v2, 0.0  ;;  %vm9915_vm7 = vmmov %vm9906_vm2 }
 0x585   : > { %v5067_v23 = vpop.permute.xlu1 %5066  ;;  %v4925_v1 = vpop.permute.xlu0 %4924  ;;  %vm9917_vm9 = vmmov %vm9906_vm2 }
 0x586   : > { %v5097_v40 = vsel %vm9899_vm13, %v5067_v23, 0.0  ;;  %vm9912_vm13 = vmmov %vm9889_vm0 }
 0x589   : > { %v4342_v20 = vpop.permute.xlu1 %4341 }
 0x58a   : > { %v4370_v30 = vsel %vm9892_vm6, %v4342_v20, 0.0  ;;  %vm9907_vm6 = vmmov %vm9889_vm0 }
 0x58b   : > { %4371 = vadd.xlane.f32.xlu1 %v4370_v30  ;;  %v4952_v35 = vsel %vm9907_vm6, %v4925_v1, 0.0 }
 0x58d   : > { %v5063_v62 = vpop.permute.xlu1 %5062 }
 0x58e   : > { %v5091_v63 = vsel %vm9903_vm4, %v5063_v62, 0.0  ;;  %vm9914_vm4 = vmmov %vm9889_vm0 }
 0x591   : > { %v4927_v25 = vpop.permute.xlu1 %4926 }
 0x595   : > { %4928 = vrot.lane.b32.xlu0 %v9022_v58, %s7718_s18 }
 0x59c   : > { %4930 = vrot.lane.b32.xlu1 %v9042_v21, %s7718_s18 }
 0x5b4   : > { %4362 = vadd.xlane.f32.xlu0 %v4361_v39 }
 0x5b8   : > { %4356 = vadd.xlane.f32.xlu0 %v4355_v0 }
 0x5bc   : > { %4359 = vadd.xlane.f32.xlu0 %v4358_v16  ;;  %v4214_v16 = vsel %vm9913_vm3, %v9008_v19, 0.0 }
 0x5c0   : > { %5095 = vadd.xlane.f32.xlu0 %v5094_v52  ;;  %4365 = vadd.xlane.f32.xlu1 %v4364_v50 }
 0x5c4   : > { %5089 = vadd.xlane.f32.xlu0 %v5088_v53  ;;  %5098 = vadd.xlane.f32.xlu1 %v5097_v40 }
 0x5c8   : > { %5083 = vadd.xlane.f32.xlu0 %v5082_v26  ;;  %5086 = vadd.xlane.f32.xlu1 %v5085_v61  ;;  %v4220_v26 = vsel %vm9914_vm4, %v8986_v38, 0.0 }
 0x5cc   : > { %5077 = vadd.xlane.f32.xlu0 %v5076_v43  ;;  %5092 = vadd.xlane.f32.xlu1 %v5091_v63 }
 0x5d0   : > { %4941 = vadd.xlane.f32.xlu0 %v4940_v44  ;;  %5080 = vadd.xlane.f32.xlu1 %v5079_v48  ;;  %v4955_v48 = vsel %vm9906_vm2, %v4927_v25, 0.0  ;;  %v4229_v25 = vsel %vm9917_vm9, %v9022_v58, 0.0 }
 0x5d4   : > { %4947 = vadd.xlane.f32.xlu0 %v4946_v9  ;;  %4944 = vadd.xlane.f32.xlu1 %v4943_v59 }
 0x5d8   : > { %4953 = vadd.xlane.f32.xlu0 %v4952_v35  ;;  %4950 = vadd.xlane.f32.xlu1 %v4949_v55  ;;  %v4223_v55 = vsel %vm9915_vm7, %v9032_v3, 0.0 }
 0x604   : > { %v4375_v34 = vpop.xlane.xlu0 %4374 }
 0x605   : > { %7449 = vrsqrt.f32 %v4375_v34  ;;  %vm4423_vm10 = vcmp.eq.f32.partialorder %v4375_v34, inf  ;;  %v4426_v28 = vand.u32 2147483648, %v4375_v34  ;;  %vm4425_vm11 = vcmp.eq.f32.partialorder %v4375_v34, 0.0 }
 0x608   : > { %v4369_v49 = vpop.xlane.xlu0 %4368 }
 0x609   : > { %vm4409_vm5 = vcmp.eq.f32.partialorder %v4369_v49, inf  ;;  %v4412_v9 = vand.u32 2147483648, %v4369_v49  ;;  %vm4411_vm6 = vcmp.eq.f32.partialorder %v4369_v49, 0.0 }
 0x60c   : > { %v4929_v22 = vpop.permute.xlu0 %4928  ;;  %v4378_v47 = vpop.xlane.xlu1 %4377 }
 0x60d   : > { %7451 = vrsqrt.f32 %v4378_v47  ;;  %v4958_v24 = vsel %vm9909_vm8, %v4929_v22, 0.0  ;;  %vm4430_vm14 = vcmp.eq.f32.partialorder %v4378_v47, inf  ;;  %v4433_v39 = vand.u32 2147483648, %v4378_v47  ;;  %vm9916_vm8 = vmmov %vm9906_vm2 }
 0x60e   : > { %4959 = vadd.xlane.f32.xlu0 %v4958_v24  ;;  %7453 = vrsqrt.f32 %v4369_v49  ;;  %vm4432_vm15 = vcmp.eq.f32.partialorder %v4378_v47, 0.0 }
 0x612   : > { %v7450_v11 = vpop.eup %7449  ;;  %4212 = vadd.xlane.f32.xlu0 %v4211_v36 }
 0x613   : > { %v4422_v31 = vmul.f32 %v7450_v11, %v4375_v34 }
 0x614   : > { %v4372_v27 = vpop.xlane.xlu1 %4371 }
 0x615   : > { %v4424_v18 = vsel %vm4423_vm10, %v4375_v34, %v4422_v31  ;;  %7455 = vrsqrt.f32 %v4372_v27  ;;  %vm4416_vm0 = vcmp.eq.f32.partialorder %v4372_v27, inf  ;;  %v4419_v43 = vand.u32 2147483648, %v4372_v27  ;;  %vm9918_vm10 = vmmov %vm9906_vm2 }
 0x616   : > { %v4427_v57 = vsel %vm4425_vm11, %v4426_v28, %v4424_v18  ;;  %4218 = vadd.xlane.f32.xlu0 %v4217_v10  ;;  %vm4418_vm1 = vcmp.eq.f32.partialorder %v4372_v27, 0.0 }
 0x617   : > { %v4441_v46 = vmul.f32 0.25, %v4427_v57 }
 0x618   : > { %v4931_v17 = vpop.permute.xlu1 %4930 }
 0x619   : > { %v4961_v23 = vsel %vm9912_vm13, %v4931_v17, 0.0  ;;  %v4449_v0 = vadd.f32 0.0001, %v4441_v46 }
 0x61a   : > { %v7452_v20 = vpop.eup %7451  ;;  %4962 = vadd.xlane.f32.xlu1 %v4961_v23 }
 0x61b   : > { %v4429_v30 = vmul.f32 %v7452_v20, %v4378_v47  ;;  %v7454_v52 = vpop.eup %7453  ;;  %7457 = vrcp.f32 %v4449_v0 }
 0x61c   : > { %v4408_v53 = vmul.f32 %v7454_v52, %v4369_v49 }
 0x61d   : > { %v4431_v5 = vsel %vm4430_vm14, %v4378_v47, %v4429_v30  ;;  %v4226_v47 = vsel %vm9916_vm8, %v9056_v15, 0.0 }
 0x61e   : > { %v4434_v50 = vsel %vm4432_vm15, %v4433_v39, %v4431_v5  ;;  %4215 = vadd.xlane.f32.xlu1 %v4214_v16  ;;  %v4410_v63 = vsel %vm4409_vm5, %v4369_v49, %v4408_v53 }
 0x61f   : > { %v4442_v13 = vmul.f32 0.25, %v4434_v50  ;;  %v4413_v1 = vsel %vm4411_vm6, %v4412_v9, %v4410_v63 }
 0x620   : > { %v4439_v34 = vmul.f32 0.25, %v4413_v1 }
 0x621   : > { %v4450_v40 = vadd.f32 0.0001, %v4442_v13 }
 0x622   : > { %v7456_v61 = vpop.eup %7455  ;;  %4221 = vadd.xlane.f32.xlu1 %v4220_v26  ;;  %v4447_v11 = vadd.f32 0.0001, %v4439_v34 }
 0x623   : > { %7459 = vrcp.f32 %v4450_v40  ;;  %v4415_v62 = vmul.f32 %v7456_v61, %v4372_v27 }
 0x625   : > { %v4417_v44 = vsel %vm4416_vm0, %v4372_v27, %v4415_v62  ;;  %v4232_v27 = vsel %vm9918_vm10, %v9042_v21, 0.0 }
 0x626   : > { %v4420_v59 = vsel %vm4418_vm1, %v4419_v43, %v4417_v44  ;;  %4956 = vadd.xlane.f32.xlu1 %v4955_v48 }
 0x627   : > { %v4440_v35 = vmul.f32 0.25, %v4420_v59 }
 0x628   : > { %v7458_v24 = vpop.eup %7457 }
 0x629   : > { %v4448_v22 = vadd.f32 0.0001, %v4440_v35  ;;  %v4465_v49 = vmul.f32 %v7458_v24, %v9014_v60 }
 0x62a   : > { %4224 = vadd.xlane.f32.xlu1 %v4223_v55 }
 0x62b   : > { %7461 = vrcp.f32 %v4448_v22 }
 0x62c   : > { %7463 = vrcp.f32 %v4447_v11 }
 0x62e   : > { %4227 = vadd.xlane.f32.xlu1 %v4226_v47 }
 0x630   : > { %v7460_v36 = vpop.eup %7459 }
 0x631   : > { %v4466_v31 = vmul.f32 %v7460_v36, %v9034_v7 }
 0x632   : > { %4230 = vadd.xlane.f32.xlu1 %v4229_v25 }
 0x633   : > { %v4610_v28 = vpack.c.bf16 %v4466_v31, %v4465_v49 }
 0x635   : > { %4621 = vrot.lane.b32.xlu0 %v4610_v28, %s7716_s16 }
 0x636   : > { %4233 = vadd.xlane.f32.xlu1 %v4232_v27 }
 0x638   : > { %v7462_v57 = vpop.eup %7461 }
 0x639   : > { %v7464_v10 = vpop.eup %7463  ;;  %v4464_v46 = vmul.f32 %v7462_v57, %v9048_v37 }
 0x63a   : > { %v4463_v23 = vmul.f32 %v7464_v10, %v9024_v42 }
 0x63c   : > { %v4609_v30 = vpack.c.bf16 %v4464_v46, %v4463_v23 }
 0x63d   : > { %v4363_v18 = vpop.xlane.xlu0 %4362 }
 0x63e   : > { %7465 = vrsqrt.f32 %v4363_v18  ;;  %vm4395_vm11 = vcmp.eq.f32.partialorder %v4363_v18, inf  ;;  %v4398_v53 = vand.u32 2147483648, %v4363_v18  ;;  %vm4397_vm12 = vcmp.eq.f32.partialorder %v4363_v18, 0.0 }
 0x641   : > { %v4357_v17 = vpop.xlane.xlu0 %4356 }
 0x642   : > { %7467 = vrsqrt.f32 %v4357_v17  ;;  %vm4381_vm13 = vcmp.eq.f32.partialorder %v4357_v17, inf  ;;  %vm4383_vm14 = vcmp.eq.f32.partialorder %v4357_v17, 0.0  ;;  %v4384_v63 = vand.u32 2147483648, %v4357_v17 }
 0x645   : > { %v4360_v20 = vpop.xlane.xlu0 %4359 }
 0x646   : > { %7469 = vrsqrt.f32 %v4360_v20  ;;  %vm4388_vm15 = vcmp.eq.f32.partialorder %v4360_v20, inf  ;;  %vm4390_vm3 = vcmp.eq.f32.partialorder %v4360_v20, 0.0  ;;  %v4391_v9 = vand.u32 2147483648, %v4360_v20 }
 0x647   : > { %4619 = vrot.lane.b32.xlu1 %v4609_v30, %s7716_s16 }
 0x649   : > { %v9114_v39 = vpop.xlane.xlu0 %5095  ;;  %v9116_v0 = vpop.xlane.xlu1 %4365 }
 0x64a   : > { %7471 = vrsqrt.f32 %v9114_v39  ;;  %vm5144_vm4 = vcmp.eq.f32.partialorder %v9114_v39, inf  ;;  %vm5146_vm5 = vcmp.eq.f32.partialorder %v9114_v39, 0.0  ;;  %v5147_v35 = vand.u32 2147483648, %v9114_v39 }
 0x64b   : > { %v7466_v5 = vpop.eup %7465  ;;  %7473 = vrsqrt.f32 %v9116_v0  ;;  %vm4402_vm0 = vcmp.eq.f32.partialorder %v9116_v0, inf  ;;  %vm4404_vm1 = vcmp.eq.f32.partialorder %v9116_v0, 0.0  ;;  %v4405_v55 = vand.u32 2147483648, %v9116_v0 }
 0x64c   : > { %v4394_v16 = vmul.f32 %v7466_v5, %v4363_v18 }
 0x64d   : > { %v9120_v52 = vpop.xlane.xlu0 %5089  ;;  %v9122_v50 = vpop.xlane.xlu1 %5098 }
 0x64e   : > { %v4396_v13 = vsel %vm4395_vm11, %v4363_v18, %v4394_v16  ;;  %7475 = vrsqrt.f32 %v9120_v52  ;;  %vm5130_vm2 = vcmp.eq.f32.partialorder %v9120_v52, inf  ;;  %vm5132_vm6 = vcmp.eq.f32.partialorder %v9120_v52, 0.0 }
 0x64f   : > { %v7468_v40 = vpop.eup %7467  ;;  %7477 = vrsqrt.f32 %v9122_v50  ;;  %v4399_v26 = vsel %vm4397_vm12, %v4398_v53, %v4396_v13  ;;  %v5133_v27 = vand.u32 2147483648, %v9120_v52  ;;  %vm5151_vm7 = vcmp.eq.f32.partialorder %v9122_v50, inf }
 0x650   : > { %v4380_v61 = vmul.f32 %v7468_v40, %v4357_v17  ;;  %v4437_v48 = vmul.f32 0.25, %v4399_v26  ;;  %vm5153_vm8 = vcmp.eq.f32.partialorder %v9122_v50, 0.0  ;;  %v5154_v57 = vand.u32 2147483648, %v9122_v50 }
 0x651   : > { %v9126_v62 = vpop.xlane.xlu0 %5083  ;;  %v9128_v43 = vpop.xlane.xlu1 %5086 }
 0x652   : > { %7479 = vrsqrt.f32 %v9126_v62  ;;  %v4382_v59 = vsel %vm4381_vm13, %v4357_v17, %v4380_v61  ;;  %v4445_v11 = vadd.f32 0.0001, %v4437_v48  ;;  %vm5116_vm9 = vcmp.eq.f32.partialorder %v9126_v62, inf }
 0x653   : > { %v7470_v44 = vpop.eup %7469  ;;  %7481 = vrsqrt.f32 %v9128_v43  ;;  %v4385_v36 = vsel %vm4383_vm14, %v4384_v63, %v4382_v59  ;;  %vm5118_vm10 = vcmp.eq.f32.partialorder %v9126_v62, 0.0  ;;  %v5119_v23 = vand.u32 2147483648, %v9126_v62 }
 0x654   : > { %v4387_v1 = vmul.f32 %v7470_v44, %v4360_v20  ;;  %v4435_v17 = vmul.f32 0.25, %v4385_v36  ;;  %vm5123_vm11 = vcmp.eq.f32.partialorder %v9128_v43, inf  ;;  %vm5125_vm12 = vcmp.eq.f32.partialorder %v9128_v43, 0.0 }
 0x655   : > { %v9138_v34 = vpop.xlane.xlu0 %5077  ;;  %v9140_v22 = vpop.xlane.xlu1 %5092 }
 0x656   : > { %v4389_v47 = vsel %vm4388_vm15, %v4360_v20, %v4387_v1  ;;  %7483 = vrsqrt.f32 %v9138_v34  ;;  %v4443_v48 = vadd.f32 0.0001, %v4435_v17  ;;  %vm5102_vm13 = vcmp.eq.f32.partialorder %v9138_v34, inf }
 0x657   : > { %v7472_v24 = vpop.eup %7471  ;;  %v4392_v25 = vsel %vm4390_vm3, %v4391_v9, %v4389_v47  ;;  %7485 = vrsqrt.f32 %v9140_v22  ;;  %vm5104_vm14 = vcmp.eq.f32.partialorder %v9138_v34, 0.0  ;;  %vm5137_vm15 = vcmp.eq.f32.partialorder %v9140_v22, inf }
 0x658   : > { %v7474_v49 = vpop.eup %7473  ;;  %v4436_v31 = vmul.f32 0.25, %v4392_v25  ;;  %v5143_v28 = vmul.f32 %v7472_v24, %v9114_v39  ;;  %vm5139_vm3 = vcmp.eq.f32.partialorder %v9140_v22, 0.0 }
 0x659   : > { %v4401_v18 = vmul.f32 %v7474_v49, %v9116_v0  ;;  %v9156_v10 = vpop.xlane.xlu0 %4941  ;;  %v9164_v20 = vpop.xlane.xlu1 %5080  ;;  %v5105_v49 = vand.u32 2147483648, %v9138_v34 }
 0x65a   : > { %v5145_v46 = vsel %vm5144_vm4, %v9114_v39, %v5143_v28  ;;  %7487 = vrsqrt.f32 %v9156_v10  ;;  %v4444_v53 = vadd.f32 0.0001, %v4436_v31  ;;  %v5126_v39 = vand.u32 2147483648, %v9128_v43 }
 0x65b   : > { %v7476_v30 = vpop.eup %7475  ;;  %7489 = vrcp.f32 %v4445_v11  ;;  %v5148_v5 = vsel %vm5146_vm5, %v5147_v35, %v5145_v46  ;;  %v4403_v16 = vsel %vm4402_vm0, %v9116_v0, %v4401_v18  ;;  %vm4966_vm4 = vcmp.eq.f32.partialorder %v9156_v10, inf }
 0x65c   : > { %v7478_v13 = vpop.eup %7477  ;;  %v4406_v40 = vsel %vm4404_vm1, %v4405_v55, %v4403_v16  ;;  %v5129_v26 = vmul.f32 %v7476_v30, %v9120_v52  ;;  %7491 = vrsqrt.f32 %v9164_v20  ;;  %v5162_v9 = vmul.f32 0.25, %v5148_v5 }
 0x65d   : > { %v4438_v61 = vmul.f32 0.25, %v4406_v40  ;;  %v5150_v63 = vmul.f32 %v7478_v13, %v9122_v50  ;;  %v9179_v44 = vpop.xlane.xlu0 %4947  ;;  %v9195_v36 = vpop.xlane.xlu1 %4944  ;;  %v5140_v40 = vand.u32 2147483648, %v9140_v22  ;;  %vm4968_vm5 = vcmp.eq.f32.partialorder %v9156_v10, 0.0 }
 0x65e   : > { %v5131_v0 = vsel %vm5130_vm2, %v9120_v52, %v5129_v26  ;;  %7493 = vrsqrt.f32 %v9179_v44  ;;  %v5170_v31 = vadd.f32 0.0001, %v5162_v9  ;;  %vm5109_vm0 = vcmp.eq.f32.partialorder %v9164_v20, inf }
 0x65f   : > { %v7480_v59 = vpop.eup %7479  ;;  %v4446_v1 = vadd.f32 0.0001, %v4438_v61  ;;  %v5134_v35 = vsel %vm5132_vm6, %v5133_v27, %v5131_v0  ;;  %v5152_v55 = vsel %vm5151_vm7, %v9122_v50, %v5150_v63  ;;  %7495 = vrcp.f32 %v4444_v53 }
 0x660   : > { %v7482_v47 = vpop.eup %7481  ;;  %v5155_v24 = vsel %vm5153_vm8, %v5154_v57, %v5152_v55  ;;  %v5115_v11 = vmul.f32 %v7480_v59, %v9126_v62  ;;  %v5160_v28 = vmul.f32 0.25, %v5134_v35  ;;  %v4969_v55 = vand.u32 2147483648, %v9156_v10 }
 0x661   : > { %7497 = vrcp.f32 %v4446_v1  ;;  %v5163_v52 = vmul.f32 0.25, %v5155_v24  ;;  %v5122_v25 = vmul.f32 %v7482_v47, %v9128_v43  ;;  %vm5111_vm1 = vcmp.eq.f32.partialorder %v9164_v20, 0.0 }
 0x662   : > { %7499 = vrcp.f32 %v4443_v48  ;;  %v5117_v50 = vsel %vm5116_vm9, %v9126_v62, %v5115_v11  ;;  %v5168_v26 = vadd.f32 0.0001, %v5160_v28  ;;  %v9221_v48 = vpop.xlane.xlu1 %4950  ;;  %vm4980_vm2 = vcmp.eq.f32.partialorder %v9179_v44, inf }
 0x663   : > { %v7484_v27 = vpop.eup %7483  ;;  %v5171_v18 = vadd.f32 0.0001, %v5163_v52  ;;  %v5120_v57 = vsel %vm5118_vm10, %v5119_v23, %v5117_v50  ;;  %v5124_v17 = vsel %vm5123_vm11, %v9128_v43, %v5122_v25  ;;  %7501 = vrsqrt.f32 %v9195_v36 }
 0x664   : > { %v7486_v46 = vpop.eup %7485  ;;  %v5158_v30 = vmul.f32 0.25, %v5120_v57  ;;  %v5127_v5 = vsel %vm5125_vm12, %v5126_v39, %v5124_v17  ;;  %v5101_v16 = vmul.f32 %v7484_v27, %v9138_v34  ;;  %vm4982_vm6 = vcmp.eq.f32.partialorder %v9179_v44, 0.0 }
 0x665   : > { %7503 = vrcp.f32 %v5171_v18  ;;  %v5159_v13 = vmul.f32 0.25, %v5127_v5  ;;  %v5136_v62 = vmul.f32 %v7486_v46, %v9140_v22  ;;  %vm4973_vm7 = vcmp.eq.f32.partialorder %v9195_v36, inf }
 0x666   : > { %7505 = vrcp.f32 %v5170_v31  ;;  %v5166_v23 = vadd.f32 0.0001, %v5158_v30  ;;  %v5103_v53 = vsel %vm5102_vm13, %v9138_v34, %v5101_v16  ;;  %vm4975_vm8 = vcmp.eq.f32.partialorder %v9195_v36, 0.0 }
 0x667   : > { %v7488_v43 = vpop.eup %7487  ;;  %v5167_v61 = vadd.f32 0.0001, %v5159_v13  ;;  %v5106_v63 = vsel %vm5104_vm14, %v5105_v49, %v5103_v53  ;;  %v5138_v39 = vsel %vm5137_vm15, %v9140_v22, %v5136_v62  ;;  %v5112_v49 = vand.u32 2147483648, %v9164_v20 }
 0x668   : > { %v7490_v9 = vpop.eup %7489  ;;  %7507 = vrcp.f32 %v5166_v23  ;;  %v5156_v0 = vmul.f32 0.25, %v5106_v63  ;;  %v5141_v59 = vsel %vm5139_vm3, %v5140_v40, %v5138_v39  ;;  %v4965_v1 = vmul.f32 %v7488_v43, %v9156_v10 }
 0x669   : > { %7509 = vrcp.f32 %v5167_v61  ;;  %v5161_v35 = vmul.f32 0.25, %v5141_v59  ;;  %v7492_v47 = vpop.eup %7491  ;;  %v4461_v46 = vmul.f32 %v7490_v9, %v8972_v41  ;;  %vm4987_vm9 = vcmp.eq.f32.partialorder %v9221_v48, inf }
 0x66a   : > { %v4967_v34 = vsel %vm4966_vm4, %v9156_v10, %v4965_v1  ;;  %7511 = vrsqrt.f32 %v9221_v48  ;;  %v5108_v11 = vmul.f32 %v7492_v47, %v9164_v20  ;;  %v5164_v25 = vadd.f32 0.0001, %v5156_v0 }
 0x66b   : > { %7513 = vrcp.f32 %v5168_v26  ;;  %v5169_v22 = vadd.f32 0.0001, %v5161_v35  ;;  %v4970_v24 = vsel %vm4968_vm5, %v4969_v55, %v4967_v34  ;;  %v7494_v52 = vpop.eup %7493  ;;  %v4976_v26 = vand.u32 2147483648, %v9195_v36 }
 0x66c   : > { %v7496_v31 = vpop.eup %7495  ;;  %v5110_v28 = vsel %vm5109_vm0, %v9164_v20, %v5108_v11  ;;  %v4979_v10 = vmul.f32 %v7494_v52, %v9179_v44  ;;  %v5020_v27 = vmul.f32 0.25, %v4970_v24  ;;  %v4983_v20 = vand.u32 2147483648, %v9179_v44 }
 0x66d   : > { %7515 = vrcp.f32 %v5169_v22  ;;  %v5113_v18 = vsel %vm5111_vm1, %v5112_v49, %v5110_v28  ;;  %v4460_v53 = vmul.f32 %v7496_v31, %v9000_v54  ;;  %v4990_v52 = vand.u32 2147483648, %v9221_v48 }
 0x66e   : > { %v7498_v50 = vpop.eup %7497  ;;  %v5157_v17 = vmul.f32 0.25, %v5113_v18  ;;  %7517 = vrcp.f32 %v5164_v25  ;;  %v4981_v16 = vsel %vm4980_vm2, %v9179_v44, %v4979_v10  ;;  %v5028_v43 = vadd.f32 0.0001, %v5020_v27 }
 0x66f   : > { %v7500_v57 = vpop.eup %7499  ;;  %v4462_v30 = vmul.f32 %v7498_v50, %v8982_v4  ;;  %v4984_v63 = vsel %vm4982_vm6, %v4983_v20, %v4981_v16  ;;  %vm4989_vm10 = vcmp.eq.f32.partialorder %v9221_v48, 0.0  ;;  %vm9919_vm11 = vcmask 130048  }
 0x670   : > { %v7502_v5 = vpop.eup %7501  ;;  %v5165_v13 = vadd.f32 0.0001, %v5157_v17  ;;  %v4459_v44 = vmul.f32 %v7500_v57, %v8978_v12  ;;  %v5022_v47 = vmul.f32 0.25, %v4984_v63  ;;  %vm9920_vm12 = vmmov %vm9919_vm11 }
 0x671   : > { %v4972_v62 = vmul.f32 %v7502_v5, %v9195_v36  ;;  %v4608_v23 = vpack.c.bf16 %v4462_v30, %v4461_v46 }
 0x672   : > { %v7504_v40 = vpop.eup %7503  ;;  %7519 = vrcp.f32 %v5165_v13  ;;  %v4607_v1 = vpack.c.bf16 %v4460_v53, %v4459_v44  ;;  %v5030_v10 = vadd.f32 0.0001, %v5022_v47 }
 0x673   : > { %v7506_v61 = vpop.eup %7505  ;;  %v4974_v39 = vsel %vm4973_vm7, %v9195_v36, %v4972_v62  ;;  %4617 = vrot.lane.b32.xlu0 %v4608_v23, %s7716_s16  ;;  %v5187_v35 = vmul.f32 %v7504_v40, %v9034_v7  ;;  %7521 = vrcp.f32 %v5028_v43 }
 0x674   : > { %v4977_v9 = vsel %vm4975_vm8, %v4976_v26, %v4974_v39  ;;  %v5186_v24 = vmul.f32 %v7506_v61, %v9014_v60 }
 0x675   : > { %v7508_v0 = vpop.eup %7507  ;;  %v5021_v59 = vmul.f32 0.25, %v4977_v9 }
 0x676   : > { %v7510_v55 = vpop.eup %7509  ;;  %v5331_v25 = vpack.c.bf16 %v5187_v35, %v5186_v24  ;;  %v5182_v49 = vmul.f32 %v7508_v0, %v8972_v41  ;;  %v4954_v0 = vpop.xlane.xlu0 %4953 }
 0x677   : > { %v7512_v34 = vpop.eup %7511  ;;  %v5029_v22 = vadd.f32 0.0001, %v5021_v59  ;;  %4615 = vrot.lane.b32.xlu0 %v4607_v1, %s7716_s16  ;;  %v5183_v31 = vmul.f32 %v7510_v55, %v8982_v4  ;;  %vm4994_vm4 = vcmp.eq.f32.partialorder %v4954_v0, inf  ;;  %vm4996_vm1 = vcmp.eq.f32.partialorder %v4954_v0, 0.0 }
 0x678   : > { %v7514_v36 = vpop.eup %7513  ;;  %v4986_v11 = vmul.f32 %v7512_v34, %v9221_v48 }
 0x679   : > { %7523 = vrcp.f32 %v5029_v22  ;;  %v5184_v18 = vmul.f32 %v7514_v36, %v9024_v42  ;;  %v5329_v30 = vpack.c.bf16 %v5183_v31, %v5182_v49 }
 0x67a   : > { %v7516_v28 = vpop.eup %7515  ;;  %v4988_v50 = vsel %vm4987_vm9, %v9221_v48, %v4986_v11  ;;  %7525 = vrcp.f32 %v5030_v10  ;;  %vm9921_vm9 = vmmov %vm9919_vm11 }
 0x67b   : > { %v4991_v27 = vsel %vm4989_vm10, %v4990_v52, %v4988_v50  ;;  %5354 = vrot.lane.b32.xlu0 %v5331_v25, %s7717_s17  ;;  %v5185_v57 = vmul.f32 %v7516_v28, %v9048_v37  ;;  %v7518_v46 = vpop.eup %7517  ;;  %vm9922_vm10 = vmmov %vm9921_vm9 }
 0x67c   : > { %v5023_v17 = vmul.f32 0.25, %v4991_v27  ;;  %v5180_v48 = vmul.f32 %v7518_v46, %v8978_v12 }
 0x67d   : > { %v5330_v5 = vpack.c.bf16 %v5185_v57, %v5184_v18 }
 0x67e   : > { %v5031_v16 = vadd.f32 0.0001, %v5023_v17 }
 0x67f   : > { %5350 = vrot.lane.b32.xlu0 %v5329_v30, %s7717_s17  ;;  %5352 = vrot.lane.b32.xlu1 %v5330_v5, %s7717_s17  ;;  %v7520_v20 = vpop.eup %7519 }
 0x680   : > { %7527 = vrcp.f32 %v5031_v16  ;;  %v5181_v13 = vmul.f32 %v7520_v20, %v9000_v54  ;;  %v7522_v23 = vpop.eup %7521 }
 0x681   : > { %v5044_v40 = vmul.f32 %v7522_v23, %v8978_v12 }
 0x682   : > { %v5328_v62 = vpack.c.bf16 %v5181_v13, %v5180_v48 }
 0x684   : > { %5348 = vrot.lane.b32.xlu1 %v5328_v62, %s7717_s17 }
 0x686   : > { %v7524_v53 = vpop.eup %7523 }
 0x687   : > { %v5045_v43 = vmul.f32 %v7524_v53, %v9000_v54  ;;  %v7526_v61 = vpop.eup %7525 }
 0x688   : > { %v5046_v39 = vmul.f32 %v7526_v61, %v8972_v41 }
 0x689   : > { %v5324_v26 = vpack.c.bf16 %v5045_v43, %v5044_v40  ;;  %v4997_v40 = vand.u32 2147483648, %v4954_v0 }
 0x68b   : > { %5336 = vrot.lane.b32.xlu0 %v5324_v26, %s7718_s18 }
 0x68d   : > { %v7528_v63 = vpop.eup %7527 }
 0x68e   : > { %v5047_v44 = vmul.f32 %v7528_v63, %v8982_v4 }
 0x690   : > { %v5325_v9 = vpack.c.bf16 %v5047_v44, %v5046_v39 }
 0x692   : > { %5338 = vrot.lane.b32.xlu1 %v5325_v9, %s7718_s18 }
 0x697   : > { %v4960_v59 = vpop.xlane.xlu0 %4959 }
 0x698   : > { %7529 = vrsqrt.f32 %v4960_v59  ;;  %vm5008_vm13 = vcmp.eq.f32.partialorder %v4960_v59, inf  ;;  %v5011_v25 = vand.u32 2147483648, %v4960_v59  ;;  %vm5010_vm14 = vcmp.eq.f32.partialorder %v4960_v59, 0.0 }
 0x69b   : > { %v4213_v1 = vpop.xlane.xlu0 %4212 }
 0x69c   : > { %7531 = vrsqrt.f32 %v4213_v1  ;;  %vm4237_vm15 = vcmp.eq.f32.partialorder %v4213_v1, inf  ;;  %v4240_v18 = vand.u32 2147483648, %v4213_v1  ;;  %vm4239_vm3 = vcmp.eq.f32.partialorder %v4213_v1, 0.0 }
 0x69d   : > { %7533 = vrsqrt.f32 %v4954_v0 }
 0x69f   : > { %v9273_v35 = vpop.xlane.xlu0 %4218 }
 0x6a3   : > { %v4963_v55 = vpop.xlane.xlu1 %4962 }
 0x6a4   : > { %7535 = vrsqrt.f32 %v4963_v55  ;;  %vm5015_vm5 = vcmp.eq.f32.partialorder %v4963_v55, inf  ;;  %v5018_v20 = vand.u32 2147483648, %v4963_v55  ;;  %vm5017_vm0 = vcmp.eq.f32.partialorder %v4963_v55, 0.0 }
 0x6a5   : > { %v7530_v47 = vpop.eup %7529 }
 0x6a6   : > { %v5007_v34 = vmul.f32 %v7530_v47, %v4960_v59 }
 0x6a7   : > { %v4622_v22 = vpop.permute.xlu0 %4621  ;;  %v4216_v24 = vpop.xlane.xlu1 %4215 }
 0x6a8   : > { %v4645_v36 = vsel %vm9919_vm11, %v4622_v22, 0  ;;  %7537 = vrsqrt.f32 %v4216_v24  ;;  %7087 = vmatprep.subr.msk.bf16.mxu0 %vm9920_vm12, %v4622_v22  ;;  %v5009_v52 = vsel %vm5008_vm13, %v4960_v59, %v5007_v34  ;;  %vm4244_vm2 = vcmp.eq.f32.partialorder %v4216_v24, inf  ;;  %vm9923_vm11 = vmmov %vm9921_vm9 }
 0x6a9   : > { %7004 = vmatpush3.bf16.xpose.msra.mxu0 %v4645_v36  ;;  %v7532_v11 = vpop.eup %7531  ;;  %v5012_v10 = vsel %vm5010_vm14, %v5011_v25, %v5009_v52  ;;  %vm4246_vm6 = vcmp.eq.f32.partialorder %v4216_v24, 0.0  ;;  %v4247_v39 = vand.u32 2147483648, %v4216_v24  ;;  %vm4251_vm13 = vcmp.eq.f32.partialorder %v9273_v35, inf }
 0x6aa   : > { %v4236_v49 = vmul.f32 %v7532_v11, %v4213_v1  ;;  %v7534_v28 = vpop.eup %7533  ;;  %v5026_v17 = vmul.f32 0.25, %v5012_v10 }
 0x6ab   : > { %v9277_v31 = vpop.xlane.xlu1 %4221  ;;  %v4993_v27 = vmul.f32 %v7534_v28, %v4954_v0 }
 0x6ac   : > { %v4238_v50 = vsel %vm4237_vm15, %v4213_v1, %v4236_v49  ;;  %v5034_v13 = vadd.f32 0.0001, %v5026_v17  ;;  %vm4258_vm12 = vcmp.eq.f32.partialorder %v9277_v31, inf  ;;  %vm4253_vm15 = vcmp.eq.f32.partialorder %v9273_v35, 0.0 }
 0x6ad   : > { %v4241_v30 = vsel %vm4239_vm3, %v4240_v18, %v4238_v50  ;;  %v4995_v16 = vsel %vm4994_vm4, %v4954_v0, %v4993_v27  ;;  %vm4260_vm3 = vcmp.eq.f32.partialorder %v9277_v31, 0.0 }
 0x6ae   : > { %v4291_v62 = vmul.f32 0.25, %v4241_v30  ;;  %v4998_v63 = vsel %vm4996_vm1, %v4997_v40, %v4995_v16 }
 0x6af   : > { %v4957_v57 = vpop.xlane.xlu1 %4956  ;;  %v5024_v34 = vmul.f32 0.25, %v4998_v63 }
 0x6b0   : > { %7539 = vrsqrt.f32 %v4957_v57  ;;  %v4299_v9 = vadd.f32 0.0001, %v4291_v62  ;;  %vm5001_vm7 = vcmp.eq.f32.partialorder %v4957_v57, inf  ;;  %v5004_v25 = vand.u32 2147483648, %v4957_v57 }
 0x6b1   : > { %v7536_v46 = vpop.eup %7535  ;;  %7541 = vrcp.f32 %v5034_v13  ;;  %v5032_v11 = vadd.f32 0.0001, %v5024_v34  ;;  %vm5003_vm8 = vcmp.eq.f32.partialorder %v4957_v57, 0.0 }
 0x6b2   : > { %v5014_v5 = vmul.f32 %v7536_v46, %v4963_v55 }
 0x6b3   : > { %v9279_v48 = vpop.xlane.xlu1 %4224 }
 0x6b4   : > { %v5016_v23 = vsel %vm5015_vm5, %v4963_v55, %v5014_v5  ;;  %vm4265_vm4 = vcmp.eq.f32.partialorder %v9279_v48, inf }
 0x6b5   : > { %v7538_v53 = vpop.eup %7537  ;;  %v5019_v43 = vsel %vm5017_vm0, %v5018_v20, %v5016_v23  ;;  %vm4267_vm0 = vcmp.eq.f32.partialorder %v9279_v48, 0.0 }
 0x6b6   : > { %v5027_v26 = vmul.f32 0.25, %v5019_v43  ;;  %v4243_v61 = vmul.f32 %v7538_v53, %v4216_v24 }
 0x6b7   : > { %v9281_v44 = vpop.xlane.xlu1 %4227 }
 0x6b8   : > { %v5035_v59 = vadd.f32 0.0001, %v5027_v26  ;;  %v4245_v1 = vsel %vm4244_vm2, %v4216_v24, %v4243_v61  ;;  %vm4272_vm14 = vcmp.eq.f32.partialorder %v9281_v44, inf  ;;  %vm4274_vm5 = vcmp.eq.f32.partialorder %v9281_v44, 0.0 }
 0x6b9   : > { %v4248_v47 = vsel %vm4246_vm6, %v4247_v39, %v4245_v1 }
 0x6ba   : > { %7543 = vrcp.f32 %v5035_v59  ;;  %v4292_v55 = vmul.f32 0.25, %v4248_v47 }
 0x6bb   : > { %v9283_v22 = vpop.xlane.xlu1 %4230  ;;  %7545 = vrcp.f32 %v4299_v9 }
 0x6bc   : > { %v4300_v0 = vadd.f32 0.0001, %v4292_v55  ;;  %7547 = vrsqrt.f32 %v9277_v31  ;;  %vm4279_vm2 = vcmp.eq.f32.partialorder %v9283_v22, inf }
 0x6bd   : > { %v7540_v36 = vpop.eup %7539 }
 0x6be   : > { %7549 = vrcp.f32 %v4300_v0  ;;  %v5000_v52 = vmul.f32 %v7540_v36, %v4957_v57  ;;  %v7542_v17 = vpop.eup %7541  ;;  %v4261_v0 = vand.u32 2147483648, %v9277_v31 }
 0x6bf   : > { %7551 = vrsqrt.f32 %v9281_v44  ;;  %v9287_v49 = vpop.xlane.xlu1 %4233 }
 0x6c0   : > { %7553 = vrsqrt.f32 %v9273_v35  ;;  %v5002_v24 = vsel %vm5001_vm7, %v4957_v57, %v5000_v52  ;;  %v5050_v57 = vmul.f32 %v7542_v17, %v9014_v60  ;;  %v4275_v52 = vand.u32 2147483648, %v9281_v44 }
 0x6c1   : > { %v5005_v28 = vsel %vm5003_vm8, %v5004_v25, %v5002_v24  ;;  %7555 = vrsqrt.f32 %v9279_v48  ;;  %vm4286_vm1 = vcmp.eq.f32.partialorder %v9287_v49, inf  ;;  %vm4288_vm6 = vcmp.eq.f32.partialorder %v9287_v49, 0.0  ;;  %vm9924_vm8 = vmmov %vm9921_vm9 }
 0x6c2   : > { %7557 = vrcp.f32 %v5032_v11  ;;  %v5025_v10 = vmul.f32 0.25, %v5005_v28  ;;  %v4254_v28 = vand.u32 2147483648, %v9273_v35  ;;  %vm4281_vm7 = vcmp.eq.f32.partialorder %v9283_v22, 0.0 }
 0x6c3   : > { %v4620_v50 = vpop.permute.xlu1 %4619  ;;  %7559 = vrsqrt.f32 %v9287_v49 }
 0x6c4   : > { %v5033_v27 = vadd.f32 0.0001, %v5025_v10  ;;  %v4642_v18 = vsel %vm9921_vm9, %v4620_v50, 0  ;;  %7088 = vmatprep.subr.msk.bf16.mxu0 %vm9922_vm10, %v4620_v50  ;;  %vm9925_vm9 = vmmov %vm9924_vm8 }
 0x6c5   : > { %7006 = vmatpush3.bf16.xpose.msra.mxu0 %v4642_v18  ;;  %vm9926_vm10 = vmmov %vm9924_vm8 }
 0x6c6   : > { %7561 = vrcp.f32 %v5033_v27 }
 0x6c7   : > { %v7544_v46 = vpop.eup %7543  ;;  %7563 = vrsqrt.f32 %v9283_v22 }
 0x6c8   : > { %v5051_v30 = vmul.f32 %v7544_v46, %v9034_v7  ;;  %v7546_v5 = vpop.eup %7545 }
 0x6c9   : > { %v7548_v16 = vpop.eup %7547  ;;  %v4315_v23 = vmul.f32 %v7546_v5, %v8978_v12 }
 0x6ca   : > { %v5327_v20 = vpack.c.bf16 %v5051_v30, %v5050_v57  ;;  %v4257_v26 = vmul.f32 %v7548_v16, %v9277_v31 }
 0x6cb   : > { %v7550_v13 = vpop.eup %7549 }
 0x6cc   : > { %v7552_v62 = vpop.eup %7551  ;;  %5342 = vrot.lane.b32.xlu1 %v5327_v20, %s7718_s18  ;;  %v4316_v53 = vmul.f32 %v7550_v13, %v9000_v54  ;;  %v4259_v47 = vsel %vm4258_vm12, %v9277_v31, %v4257_v26  ;;  %v4268_v31 = vand.u32 2147483648, %v9279_v48  ;;  %vm9928_vm12 = vmmov %vm9924_vm8 }
 0x6cd   : > { %v7554_v40 = vpop.eup %7553  ;;  %v4271_v39 = vmul.f32 %v7552_v62, %v9281_v44  ;;  %v4262_v10 = vsel %vm4260_vm3, %v4261_v0, %v4259_v47  ;;  %vm9932_vm3 = vmmov %vm9924_vm8 }
 0x6ce   : > { %v7556_v43 = vpop.eup %7555  ;;  %v4603_v61 = vpack.c.bf16 %v4316_v53, %v4315_v23  ;;  %v4250_v9 = vmul.f32 %v7554_v40, %v9273_v35  ;;  %v4294_v57 = vmul.f32 0.25, %v4262_v10  ;;  %v4282_v53 = vand.u32 2147483648, %v9283_v22 }
 0x6cf   : > { %v7558_v63 = vpop.eup %7557  ;;  %v4264_v59 = vmul.f32 %v7556_v43, %v9279_v48  ;;  %v4273_v36 = vsel %vm4272_vm14, %v9281_v44, %v4271_v39  ;;  %vm9930_vm14 = vmmov %vm9924_vm8 }
 0x6d0   : > { %7011 = vmatprep.mubr.msk.bf16.mxu0 %vm9923_vm11, %v4603_v61  ;;  %4481 = vrot.lane.b32.xlu1 %v9042_v21, %s7719_s19  ;;  %v7560_v1 = vpop.eup %7559  ;;  %v5048_v34 = vmul.f32 %v7558_v63, %v9024_v42  ;;  %v4252_v11 = vsel %vm4251_vm13, %v9273_v35, %v4250_v9  ;;  %v4276_v27 = vsel %vm4274_vm5, %v4275_v52, %v4273_v36  ;;  %v4289_v35 = vand.u32 2147483648, %v9287_v49  ;;  %vm9927_vm11 = vmmov %vm9924_vm8 }
 0x6d1   : > { %v4266_v50 = vsel %vm4265_vm4, %v9279_v48, %v4264_v59  ;;  %v4285_v18 = vmul.f32 %v7560_v1, %v9287_v49  ;;  %v4255_v46 = vsel %vm4253_vm15, %v4254_v28, %v4252_v11  ;;  %v4296_v44 = vmul.f32 0.25, %v4276_v27  ;;  %vm9929_vm13 = vmmov %vm9924_vm8 }
 0x6d2   : > { %v4269_v30 = vsel %vm4267_vm0, %v4268_v31, %v4266_v50  ;;  %v4293_v16 = vmul.f32 0.25, %v4255_v46  ;;  %v4302_v48 = vadd.f32 0.0001, %v4294_v57  ;;  %vm9931_vm15 = vmmov %vm9924_vm8 }
 0x6d3   : > { %v7562_v55 = vpop.eup %7561  ;;  %v4287_v20 = vsel %vm4286_vm1, %v9287_v49, %v4285_v18  ;;  %v4295_v13 = vmul.f32 0.25, %v4269_v30  ;;  %v4304_v23 = vadd.f32 0.0001, %v4296_v44  ;;  %vm9933_vm4 = vmmov %vm9932_vm3 }
 0x6d4   : > { %4477 = vrot.lane.b32.xlu1 %v9056_v15, %s7719_s19  ;;  %v5049_v25 = vmul.f32 %v7562_v55, %v9048_v37  ;;  %v7564_v24 = vpop.eup %7563  ;;  %v4290_v40 = vsel %vm4288_vm6, %v4289_v35, %v4287_v20  ;;  %v4301_v43 = vadd.f32 0.0001, %v4293_v16  ;;  %7565 = vrcp.f32 %v4302_v48  ;;  %vm9934_vm5 = vmmov %vm9932_vm3 }
 0x6d5   : > { %v4278_v5 = vmul.f32 %v7564_v24, %v9283_v22  ;;  %v4303_v26 = vadd.f32 0.0001, %v4295_v13  ;;  %v4298_v63 = vmul.f32 0.25, %v4290_v40  ;;  %7567 = vrcp.f32 %v4304_v23  ;;  %vm9935_vm0 = vmmov %vm9932_vm3 }
 0x6d6   : > { %v5326_v17 = vpack.c.bf16 %v5049_v25, %v5048_v34  ;;  %7569 = vrcp.f32 %v4301_v43  ;;  %vm9936_vm1 = vmmov %vm9935_vm0 }
 0x6d7   : > { %v4280_v62 = vsel %vm4279_vm2, %v9283_v22, %v4278_v5  ;;  %7571 = vrcp.f32 %v4303_v26  ;;  %v4306_v39 = vadd.f32 0.0001, %v4298_v63  ;;  %vm9937_vm2 = vmmov %vm9935_vm0 }
 0x6d8   : > { %5340 = vrot.lane.b32.xlu0 %v5326_v17, %s7718_s18  ;;  %4473 = vrot.lane.b32.xlu1 %v8986_v38, %s7719_s19  ;;  %v4283_v61 = vsel %vm4281_vm7, %v4282_v53, %v4280_v62  ;;  %vm9938_vm6 = vmmov %vm9935_vm0 }
 0x6d9   : > { %v4297_v49 = vmul.f32 0.25, %v4283_v61  ;;  %7573 = vrcp.f32 %v4306_v39  ;;  %vm9939_vm7 = vmmov %vm9935_vm0 }
 0x6db   : > { %v4305_v9 = vadd.f32 0.0001, %v4297_v49 }
 0x6dc   : > { %4479 = vrot.lane.b32.xlu0 %v9022_v58, %s7719_s19  ;;  %4469 = vrot.lane.b32.xlu1 %v9008_v19, %s7719_s19 }
 0x6dd   : > { %7575 = vrcp.f32 %v4305_v9 }
 0x6e0   : > { %4475 = vrot.lane.b32.xlu0 %v9032_v3, %s7719_s19  ;;  %5202 = vrot.lane.b32.xlu1 %v9042_v21, %s7720_s20 }
 0x6e4   : > { %4471 = vrot.lane.b32.xlu0 %v8976_v2, %s7719_s19  ;;  %5198 = vrot.lane.b32.xlu1 %v9056_v15, %s7720_s20  ;;  %v7566_v15 = vpop.eup %7565 }
 0x6e5   : > { %v4618_v22 = vpop.permute.xlu0 %4617  ;;  %v7568_v1 = vpop.eup %7567 }
 0x6e6   : > { %v4639_v59 = vsel %vm9924_vm8, %v4618_v22, 0  ;;  %7089 = vmatprep.subr.msk.bf16.mxu0 %vm9925_vm9, %v4618_v22  ;;  %v7570_v34 = vpop.eup %7569  ;;  %vm9940_vm8 = vmmov %vm9935_vm0 }
 0x6e7   : > { %7008 = vmatpush3.bf16.xpose.msra.mxu0 %v4639_v59  ;;  %v7572_v0 = vpop.eup %7571  ;;  %v4317_v36 = vmul.f32 %v7570_v34, %v8972_v41  ;;  %vm9941_vm9 = vmmov %vm9935_vm0 }
 0x6e8   : > { %4467 = vrot.lane.b32.xlu0 %v8998_v45, %s7719_s19  ;;  %5194 = vrot.lane.b32.xlu1 %v8986_v38, %s7720_s20  ;;  %v4318_v38 = vmul.f32 %v7566_v15, %v8982_v4  ;;  %v7574_v52 = vpop.eup %7573 }
 0x6e9   : > { %v4616_v21 = vpop.permute.xlu0 %4615  ;;  %v4322_v10 = vmul.f32 %v7574_v52, %v9034_v7 }
 0x6ea   : > { %7090 = vmatprep.subr.msk.bf16.mxu0 %vm9926_vm10, %v4616_v21  ;;  %v4636_v47 = vsel %vm9927_vm11, %v4616_v21, 0  ;;  %v4604_v11 = vpack.c.bf16 %v4318_v38, %v4317_v36  ;;  %v7576_v28 = vpop.eup %7575  ;;  %vm9942_vm10 = vmmov %vm9935_vm0 }
 0x6eb   : > { %v4321_v50 = vmul.f32 %v7576_v28, %v9014_v60  ;;  %vm9943_vm11 = vmmov %vm9935_vm0 }
 0x6ec   : > { %5200 = vrot.lane.b32.xlu0 %v9022_v58, %s7720_s20  ;;  %5190 = vrot.lane.b32.xlu1 %v9008_v19, %s7720_s20  ;;  %v4320_v58 = vmul.f32 %v7568_v1, %v9048_v37  ;;  %v4319_v19 = vmul.f32 %v7572_v0, %v9024_v42 }
 0x6ed   : > { %v5355_v55 = vpop.permute.xlu0 %5354  ;;  %v4606_v31 = vpack.c.bf16 %v4322_v10, %v4321_v50 }
 0x6ee   : > { %v4605_v25 = vpack.c.bf16 %v4320_v58, %v4319_v19  ;;  %v5378_v24 = vsel %vm9929_vm13, %v5355_v55, 0  ;;  %vm9945_vm13 = vmmov %vm9935_vm0 }
 0x6ef   : > { %7010 = vmatpush3.bf16.xpose.msra.mxu0 %v4636_v47 }
 0x6f0   : > { %7091 = vmatprep.subr.msk.bf16.mxu0 %vm9928_vm12, %v5355_v55  ;;  %5196 = vrot.lane.b32.xlu0 %v9032_v3, %s7720_s20  ;;  %vm9944_vm12 = vmmov %vm9935_vm0 }
 0x6f1   : > { %v5353_v3 = vpop.permute.xlu1 %5352 }
 0x6f2   : > { %v5375_v27 = vsel %vm9933_vm4, %v5353_v3, 0  ;;  %vm9949_vm4 = vmmov %vm9935_vm0 }
 0x6f4   : > { %5192 = vrot.lane.b32.xlu0 %v8976_v2, %s7720_s20  ;;  %v5351_v2 = vpop.permute.xlu0 %5350 }
 0x6f5   : > { %v5372_v17 = vsel %vm9937_vm2, %v5351_v2, 0  ;;  %vm9952_vm2 = vmmov %vm9935_vm0 }
 0x6f6   : > { %7012 = vmatmul.mubr.msk.bf16.vlgmr.msra.gmra.mxu0 %vm9930_vm14, %v4604_v11  ;;  %v5349_v46 = vpop.permute.xlu1 %5348  ;;  %vm9946_vm14 = vmmov %vm9935_vm0 }
 0x6f7   : > { %7015 = vmatprep.mubr.msk.bf16.mxu0 %vm9931_vm15, %v4605_v25  ;;  %7036 = vmatpush3.bf16.xpose.msra.mxu0 %v5378_v24  ;;  %vm9947_vm15 = vmmov %vm9935_vm0 }
 0x6f8   : > { %7092 = vmatprep.subr.msk.bf16.mxu0 %vm9932_vm3, %v5353_v3  ;;  %5188 = vrot.lane.b32.xlu0 %v8998_v45, %s7720_s20  ;;  %v5369_v45 = vsel %vm9939_vm7, %v5349_v46, 0  ;;  %vm9948_vm3 = vmmov %vm9935_vm0 }
 0x6f9   : > { %vm9954_vm7 = vmmov %vm9935_vm0 }
 0x6fd   : > { %v5337_v18 = vpop.permute.xlu0 %5336 }
 0x6fe   : > { %7016 = vmatmul.mubr.msk.bf16.gmra.mxu0 %vm9934_vm5, %v4606_v31  ;;  %vm9950_vm5 = vmmov %vm9935_vm0 }
 0x6ff   : > { %7038 = vmatpush3.bf16.xpose.msra.mxu0 %v5375_v27  ;;  %7043 = vmatprep.mubr.msk.bf16.mxu0 %vm9935_vm0, %v5337_v18 }
 0x700   : > { %7093 = vmatprep.subr.msk.bf16.mxu0 %vm9936_vm1, %v5351_v2  ;;  %vm9951_vm1 = vmmov %vm9935_vm0 }
 0x704   : > { %v5339_v57 = vpop.permute.xlu1 %5338 }
 0x707   : > { %7040 = vmatpush3.bf16.xpose.msra.mxu0 %v5372_v17 }
 0x708   : > { %7094 = vmatprep.subr.msk.bf16.mxu0 %vm9938_vm6, %v5349_v46  ;;  %vm9953_vm6 = vmmov %vm9935_vm0 }
 0x70f   : > { %7042 = vmatpush3.bf16.xpose.msra.mxu0 %v5369_v45 }
 0x716   : > { %7044 = vmatmul.mubr.msk.bf16.vlgmr.msra.gmra.mxu0 %vm9940_vm8, %v5339_v57  ;;  %vm9955_vm8 = vmmov %vm9935_vm0 }
 0x73e   : > { %v5343_v30 = vpop.permute.xlu1 %5342 }
 0x742   : > { %v4482_v5 = vpop.permute.xlu1 %4481 }
 0x743   : > { %v4512_v44 = vsel %vm9941_vm9, %v4482_v5, 0.0  ;;  %vm9956_vm9 = vmmov %vm9935_vm0 }
 0x744   : > { %4513 = vadd.xlane.f32.xlu1 %v4512_v44 }
 0x746   : > { %v4478_v16 = vpop.permute.xlu1 %4477 }
 0x747   : > { %v4506_v22 = vsel %vm9950_vm5, %v4478_v16, 0.0 }
 0x74a   : > { %v5341_v20 = vpop.permute.xlu0 %5340  ;;  %v4474_v13 = vpop.permute.xlu1 %4473 }
 0x74b   : > { %7047 = vmatprep.mubr.msk.bf16.mxu0 %vm9942_vm10, %v5341_v20  ;;  %v4500_v35 = vsel %vm9943_vm11, %v4474_v13, 0.0  ;;  %vm9957_vm10 = vmmov %vm9935_vm0 }
 0x74c   : > { %7048 = vmatmul.mubr.msk.bf16.gmra.mxu0 %vm9944_vm12, %v5343_v30  ;;  %4501 = vadd.xlane.f32.xlu1 %v4500_v35 }
 0x74e   : > { %v4480_v48 = vpop.permute.xlu0 %4479  ;;  %v4470_v62 = vpop.permute.xlu1 %4469 }
 0x74f   : > { %v4494_v23 = vsel %vm9945_vm13, %v4470_v62, 0.0  ;;  %v4509_v53 = vsel %vm9946_vm14, %v4480_v48, 0.0 }
 0x750   : > { %4510 = vadd.xlane.f32.xlu0 %v4509_v53  ;;  %4495 = vadd.xlane.f32.xlu1 %v4494_v23 }
 0x752   : > { %v4476_v40 = vpop.permute.xlu0 %4475  ;;  %v5203_v43 = vpop.permute.xlu1 %5202 }
 0x753   : > { %v5233_v26 = vsel %vm9947_vm15, %v5203_v43, 0.0  ;;  %v4503_v61 = vsel %vm9948_vm3, %v4476_v40, 0.0 }
 0x754   : > { %4504 = vadd.xlane.f32.xlu0 %v4503_v61  ;;  %5234 = vadd.xlane.f32.xlu1 %v5233_v26 }
 0x756   : > { %v4472_v63 = vpop.permute.xlu0 %4471  ;;  %v5199_v49 = vpop.permute.xlu1 %5198 }
 0x757   : > { %v5227_v39 = vsel %vm9949_vm4, %v5199_v49, 0.0  ;;  %v4497_v15 = vsel %vm9951_vm1, %v4472_v63, 0.0 }
 0x758   : > { %4507 = vadd.xlane.f32.xlu0 %v4506_v22  ;;  %5228 = vadd.xlane.f32.xlu1 %v5227_v39 }
 0x75a   : > { %v4468_v9 = vpop.permute.xlu0 %4467  ;;  %v5195_v59 = vpop.permute.xlu1 %5194 }
 0x75b   : > { %v5221_v21 = vsel %vm9935_vm0, %v5195_v59, 0.0  ;;  %v4491_v34 = vsel %vm9952_vm2, %v4468_v9, 0.0 }
 0x75c   : > { %4498 = vadd.xlane.f32.xlu0 %v4497_v15  ;;  %5222 = vadd.xlane.f32.xlu1 %v5221_v21 }
 0x75e   : > { %v5201_v1 = vpop.permute.xlu0 %5200  ;;  %v5191_v47 = vpop.permute.xlu1 %5190 }
 0x75f   : > { %v5215_v55 = vsel %vm9953_vm6, %v5191_v47, 0.0  ;;  %v5230_v38 = vsel %vm9954_vm7, %v5201_v1, 0.0 }
 0x760   : > { %4492 = vadd.xlane.f32.xlu0 %v4491_v34  ;;  %5216 = vadd.xlane.f32.xlu1 %v5215_v55 }
 0x762   : > { %v5197_v0 = vpop.permute.xlu0 %5196 }
 0x763   : > { %v5224_v36 = vsel %vm9955_vm8, %v5197_v0, 0.0 }
 0x764   : > { %5231 = vadd.xlane.f32.xlu0 %v5230_v38 }
 0x766   : > { %v5193_v58 = vpop.permute.xlu0 %5192 }
 0x767   : > { %v5218_v19 = vsel %vm9956_vm9, %v5193_v58, 0.0 }
 0x768   : > { %5225 = vadd.xlane.f32.xlu0 %v5224_v36 }
 0x76a   : > { %v5189_v11 = vpop.permute.xlu0 %5188 }
 0x76b   : > { %v5212_v52 = vsel %vm9957_vm10, %v5189_v11, 0.0 }
 0x76c   : > { %5219 = vadd.xlane.f32.xlu0 %v5218_v19 }
 0x770   : > { %5213 = vadd.xlane.f32.xlu0 %v5212_v52 }
 0x7cd   : > { %v4514_v25 = vpop.xlane.xlu1 %4513 }
 0x7ce   : > { %7577 = vrsqrt.f32 %v4514_v25  ;;  %vm4566_vm11 = vcmp.eq.f32.partialorder %v4514_v25, inf  ;;  %v4569_v18 = vand.u32 2147483648, %v4514_v25  ;;  %vm4568_vm12 = vcmp.eq.f32.partialorder %v4514_v25, 0.0 }
 0x7d5   : > { %v4502_v24 = vpop.xlane.xlu1 %4501 }
 0x7d6   : > { %7579 = vrsqrt.f32 %v4502_v24  ;;  %vm4538_vm15 = vcmp.eq.f32.partialorder %v4502_v24, inf  ;;  %vm4540_vm3 = vcmp.eq.f32.partialorder %v4502_v24, 0.0  ;;  %v4541_v63 = vand.u32 2147483648, %v4502_v24 }
 0x7d9   : > { %v4511_v28 = vpop.xlane.xlu0 %4510  ;;  %v9409_v3 = vpop.xlane.xlu1 %4495 }
 0x7da   : > { %7581 = vrsqrt.f32 %v4511_v28  ;;  %vm4559_vm13 = vcmp.eq.f32.partialorder %v4511_v28, inf  ;;  %v4562_v35 = vand.u32 2147483648, %v4511_v28  ;;  %vm4561_vm14 = vcmp.eq.f32.partialorder %v4511_v28, 0.0 }
 0x7db   : > { %v7578_v10 = vpop.eup %7577 }
 0x7dc   : > { %v4565_v2 = vmul.f32 %v7578_v10, %v4514_v25 }
 0x7dd   : > { %v4505_v50 = vpop.xlane.xlu0 %4504  ;;  %v9411_v31 = vpop.xlane.xlu1 %5234 }
 0x7de   : > { %7583 = vrsqrt.f32 %v4505_v50  ;;  %v4567_v27 = vsel %vm4566_vm11, %v4514_v25, %v4565_v2  ;;  %vm4545_vm4 = vcmp.eq.f32.partialorder %v4505_v50, inf  ;;  %v4548_v49 = vand.u32 2147483648, %v4505_v50 }
 0x7df   : > { %v4570_v45 = vsel %vm4568_vm12, %v4569_v18, %v4567_v27  ;;  %vm4547_vm5 = vcmp.eq.f32.partialorder %v4505_v50, 0.0  ;;  %vm4720_vm11 = vcmask 523264  }
 0x7e0   : > { %v4578_v5 = vmul.f32 0.25, %v4570_v45 }
 0x7e1   : > { %v4508_v17 = vpop.xlane.xlu0 %4507  ;;  %v9413_v46 = vpop.xlane.xlu1 %5228 }
 0x7e2   : > { %7585 = vrsqrt.f32 %v4508_v17  ;;  %v4586_v62 = vadd.f32 0.0001, %v4578_v5  ;;  %vm4552_vm0 = vcmp.eq.f32.partialorder %v4508_v17, inf  ;;  %v4555_v34 = vand.u32 2147483648, %v4508_v17 }
 0x7e3   : > { %v7580_v57 = vpop.eup %7579  ;;  %vm4554_vm1 = vcmp.eq.f32.partialorder %v4508_v17, 0.0 }
 0x7e4   : > { %v4537_v20 = vmul.f32 %v7580_v57, %v4502_v24 }
 0x7e5   : > { %v4499_v30 = vpop.xlane.xlu0 %4498  ;;  %v9415_v44 = vpop.xlane.xlu1 %5222 }
 0x7e6   : > { %7587 = vrsqrt.f32 %v4499_v30  ;;  %v4539_v43 = vsel %vm4538_vm15, %v4502_v24, %v4537_v20  ;;  %vm4531_vm2 = vcmp.eq.f32.partialorder %v4499_v30, inf  ;;  %vm4533_vm6 = vcmp.eq.f32.partialorder %v4499_v30, 0.0 }
 0x7e7   : > { %v7582_v16 = vpop.eup %7581  ;;  %7589 = vrsqrt.f32 %v9415_v44  ;;  %v4542_v21 = vsel %vm4540_vm3, %v4541_v63, %v4539_v43  ;;  %v4534_v25 = vand.u32 2147483648, %v4499_v30  ;;  %vm5259_vm7 = vcmp.eq.f32.partialorder %v9415_v44, inf }
 0x7e8   : > { %v4558_v13 = vmul.f32 %v7582_v16, %v4511_v28  ;;  %7591 = vrcp.f32 %v4586_v62  ;;  %v4574_v0 = vmul.f32 0.25, %v4542_v21  ;;  %v5262_v20 = vand.u32 2147483648, %v9415_v44 }
 0x7e9   : > { %v9418_v48 = vpop.xlane.xlu0 %4492  ;;  %vm5261_vm8 = vcmp.eq.f32.partialorder %v9415_v44, 0.0  ;;  %vm5289_vm15 = vcmp.eq.f32.partialorder %v9411_v31, 0.0 }
 0x7ea   : > { %v4560_v23 = vsel %vm4559_vm13, %v4511_v28, %v4558_v13  ;;  %v4582_v10 = vadd.f32 0.0001, %v4574_v0  ;;  %vm5287_vm13 = vcmp.eq.f32.partialorder %v9411_v31, inf  ;;  %vm4517_vm3 = vcmp.eq.f32.partialorder %v9418_v48, inf }
 0x7eb   : > { %v7584_v53 = vpop.eup %7583  ;;  %v4563_v40 = vsel %vm4561_vm14, %v4562_v35, %v4560_v23 }
 0x7ec   : > { %v4577_v26 = vmul.f32 0.25, %v4563_v40  ;;  %v4544_v61 = vmul.f32 %v7584_v53, %v4505_v50 }
 0x7ed   : > { %v9420_v39 = vpop.xlane.xlu0 %5231 }
 0x7ee   : > { %v4585_v22 = vadd.f32 0.0001, %v4577_v26  ;;  %v4546_v9 = vsel %vm4545_vm4, %v4505_v50, %v4544_v61  ;;  %vm5280_vm12 = vcmp.eq.f32.partialorder %v9420_v39, inf  ;;  %vm5282_vm14 = vcmp.eq.f32.partialorder %v9420_v39, 0.0 }
 0x7ef   : > { %v7586_v59 = vpop.eup %7585  ;;  %v4549_v15 = vsel %vm4547_vm5, %v4548_v49, %v4546_v9  ;;  %vm4524_vm4 = vcmp.eq.f32.partialorder %v9409_v3, inf  ;;  %vm4519_vm5 = vcmp.eq.f32.partialorder %v9418_v48, 0.0 }
 0x7f0   : > { %7593 = vrcp.f32 %v4585_v22  ;;  %v4575_v1 = vmul.f32 0.25, %v4549_v15  ;;  %v4551_v47 = vmul.f32 %v7586_v59, %v4508_v17 }
 0x7f1   : > { %v9422_v55 = vpop.xlane.xlu0 %5225 }
 0x7f2   : > { %v4583_v38 = vadd.f32 0.0001, %v4575_v1  ;;  %v4553_v58 = vsel %vm4552_vm0, %v4508_v17, %v4551_v47  ;;  %vm4526_vm0 = vcmp.eq.f32.partialorder %v9409_v3, 0.0 }
 0x7f3   : > { %v7588_v36 = vpop.eup %7587  ;;  %v4556_v19 = vsel %vm4554_vm1, %v4555_v34, %v4553_v58  ;;  %v7013_v58 = vpop.f32.mrf.mxu0  ;;  %vm5266_vm1 = vcmp.eq.f32.partialorder %v9422_v55, inf }
 0x7f4   : > { %v4576_v11 = vmul.f32 0.25, %v4556_v19  ;;  %v4530_v52 = vmul.f32 %v7588_v36, %v4499_v30  ;;  %v7590_v28 = vpop.eup %7589  ;;  %7595 = vrcp.f32 %v4583_v38 }
 0x7f5   : > { %v5220_v24 = vpop.xlane.xlu0 %5219  ;;  %v5258_v45 = vmul.f32 %v7590_v28, %v9415_v44  ;;  %v7592_v57 = vpop.eup %7591 }
 0x7f6   : > { %v4584_v2 = vadd.f32 0.0001, %v4576_v11  ;;  %v4532_v50 = vsel %vm4531_vm2, %v4499_v30, %v4530_v52  ;;  %7597 = vrsqrt.f32 %v5220_v24  ;;  %v4602_v30 = vmul.f32 %v7592_v57, %v9034_v7  ;;  %v4681_v36 = vpop.f32.mrf.mxu0 }
 0x7f7   : > { %v4535_v27 = vsel %vm4533_vm6, %v4534_v25, %v4532_v50  ;;  %v5260_v16 = vsel %vm5259_vm7, %v9415_v44, %v5258_v45  ;;  %vm5252_vm9 = vcmp.eq.f32.partialorder %v5220_v24, inf  ;;  %v5255_v61 = vand.u32 2147483648, %v5220_v24 }
 0x7f8   : > { %7599 = vrcp.f32 %v4584_v2  ;;  %v4573_v18 = vmul.f32 0.25, %v4535_v27  ;;  %v5263_v35 = vsel %vm5261_vm8, %v5262_v20, %v5260_v16  ;;  %vm5254_vm10 = vcmp.eq.f32.partialorder %v5220_v24, 0.0  ;;  %v7014_v19 = vpop.f32.mrf.mxu0 }
 0x7f9   : > { %7601 = vrcp.f32 %v4582_v10  ;;  %v5295_v53 = vmul.f32 0.25, %v5263_v35  ;;  %v9449_v45 = vmul.f32 0.25, %v7013_v58  ;;  %vm5273_vm2 = vcmp.eq.f32.partialorder %v9413_v46, inf }
 0x7fa   : > { %v4581_v17 = vadd.f32 0.0001, %v4573_v18  ;;  %v4684_v25 = vpop.f32.mrf.mxu0  ;;  %vm5268_vm6 = vcmp.eq.f32.partialorder %v9422_v55, 0.0  ;;  %vm5275_vm7 = vcmp.eq.f32.partialorder %v9413_v46, 0.0 }
 0x7fb   : > { %v5303_v9 = vadd.f32 0.0001, %v5295_v53  ;;  %v4727_v16 = vsel %vm4720_vm11, %v9449_v45, -inf  ;;  %v9459_v20 = vmul.f32 0.25, %v4684_v25  ;;  %v5283_v53 = vand.u32 2147483648, %v9420_v39 }
 0x7fc   : > { %7603 = vrcp.f32 %v4581_v17  ;;  %v7017_v2 = vpop.f32.mrf.mxu0  ;;  %v9451_v17 = vmul.f32 0.25, %v7014_v19 }
 0x7fd   : > { %v7594_v5 = vpop.eup %7593  ;;  %7605 = vrcp.f32 %v5303_v9 }
 0x7fe   : > { %v4601_v13 = vmul.f32 %v7594_v5, %v9014_v60  ;;  %v4697_v50 = vpop.f32.mrf.mxu0  ;;  %v9455_v5 = vmul.f32 0.25, %v4681_v36  ;;  %v4730_v35 = vsel %vm4720_vm11, %v9451_v17, -inf }
 0x800   : > { %v4816_v62 = vpack.c.bf16 %v4602_v30, %v4601_v13  ;;  %v7018_v27 = vpop.f32.mrf.mxu0 }
 0x801   : > { %v7596_v23 = vpop.eup %7595 }
 0x802   : > { %4827 = vrot.lane.b32.xlu0 %v4816_v62, %s7719_s19  ;;  %v4599_v63 = vmul.f32 %v7596_v23, %v9024_v42  ;;  %v9466_v23 = vmul.f32 0.25, %v7017_v2 }
 0x803   : > { %v7598_v40 = vpop.eup %7597 }
 0x804   : > { %v5251_v26 = vmul.f32 %v7598_v40, %v5220_v24  ;;  %v4721_v40 = vsel %vm4720_vm11, %v9455_v5, -inf }
 0x805   : > { %v7600_v43 = vpop.eup %7599 }
 0x806   : > { %v4600_v49 = vmul.f32 %v7600_v43, %v9048_v37  ;;  %v7602_v22 = vpop.eup %7601  ;;  %v5253_v59 = vsel %vm5252_vm9, %v5220_v24, %v5251_v26  ;;  %v9472_v43 = vmul.f32 0.25, %v7018_v27 }
 0x807   : > { %v5256_v44 = vsel %vm5254_vm10, %v5255_v61, %v5253_v59  ;;  %v4598_v34 = vmul.f32 %v7602_v22, %v8982_v4  ;;  %v9480_v59 = vmul.f32 0.25, %v4697_v50 }
 0x808   : > { %v4815_v21 = vpack.c.bf16 %v4600_v49, %v4599_v63  ;;  %v5294_v1 = vmul.f32 0.25, %v5256_v44  ;;  %v4724_v63 = vsel %vm4720_vm11, %v9459_v20, -inf  ;;  %v5290_v49 = vand.u32 2147483648, %v9411_v31 }
 0x809   : > { %v7604_v15 = vpop.eup %7603  ;;  %v4733_v58 = vsel %vm4720_vm11, %v9480_v59, -inf }
 0x80a   : > { %4825 = vrot.lane.b32.xlu1 %v4815_v21, %s7719_s19  ;;  %v4597_v47 = vmul.f32 %v7604_v15, %v8972_v41  ;;  %v5302_v0 = vadd.f32 0.0001, %v5294_v1  ;;  %v7606_v11 = vpop.eup %7605  ;;  %v4739_v21 = vsel %vm4720_vm11, %v9466_v23, -inf }
 0x80b   : > { %v9443_v28 = vmul.f32 %v7606_v11, %v8982_v4  ;;  %v4700_v4 = vpop.f32.mrf.mxu0 }
 0x80c   : > { %v4814_v38 = vpack.c.bf16 %v4598_v34, %v4597_v47  ;;  %7607 = vrcp.f32 %v5302_v0  ;;  %v9484_v15 = vmul.f32 0.25, %v4700_v4  ;;  %v4742_v47 = vsel %vm4720_vm11, %v9472_v43, -inf }
 0x80d   : > { %7609 = vrsqrt.f32 %v9420_v39  ;;  %v7045_v13 = vpop.f32.mrf.mxu0 }
 0x80e   : > { %4823 = vrot.lane.b32.xlu0 %v4814_v38, %s7719_s19  ;;  %7611 = vrsqrt.f32 %v9411_v31  ;;  %v9489_v38 = vmul.f32 0.25, %v7045_v13  ;;  %v4736_v25 = vsel %vm4720_vm11, %v9484_v15, -inf }
 0x80f   : > { %7613 = vrsqrt.f32 %v9418_v48  ;;  %v5414_v26 = vpop.f32.mrf.mxu0 }
 0x810   : > { %7615 = vrsqrt.f32 %v9409_v3  ;;  %v9499_v2 = vmul.f32 0.25, %v5414_v26  ;;  %v5459_v4 = vsel %vm4720_vm11, %v9489_v38, -inf }
 0x819   : > { %v7608_v52 = vpop.eup %7607 }
 0x81a   : > { %v9440_v24 = vmul.f32 %v7608_v52, %v8972_v41  ;;  %v7610_v18 = vpop.eup %7609 }
 0x81b   : > { %v7612_v41 = vpop.eup %7611  ;;  %v5279_v57 = vmul.f32 %v7610_v18, %v9420_v39 }
 0x81c   : > { %v5546_v10 = vpack.c.bf16 %v9443_v28, %v9440_v24  ;;  %v5286_v30 = vmul.f32 %v7612_v41, %v9411_v31  ;;  %v7614_v9 = vpop.eup %7613  ;;  %v4520_v41 = vand.u32 2147483648, %v9418_v48 }
 0x81d   : > { %v5281_v62 = vsel %vm5280_vm12, %v9420_v39, %v5279_v57  ;;  %v7046_v39 = vpop.f32.mrf.mxu0  ;;  %v7616_v34 = vpop.eup %7615 }
 0x81e   : > { %v5288_v61 = vsel %vm5287_vm13, %v9411_v31, %v5286_v30  ;;  %v5284_v22 = vsel %vm5282_vm14, %v5283_v53, %v5281_v62  ;;  %v4516_v31 = vmul.f32 %v7614_v9, %v9418_v48  ;;  %v9493_v36 = vmul.f32 0.25, %v7046_v39 }
 0x81f   : > { %v5291_v44 = vsel %vm5289_vm15, %v5290_v49, %v5288_v61  ;;  %v5298_v1 = vmul.f32 0.25, %v5284_v22  ;;  %v4523_v19 = vmul.f32 %v7616_v34, %v9409_v3  ;;  %v5417_v11 = vpop.f32.mrf.mxu0  ;;  %v4527_v30 = vand.u32 2147483648, %v9409_v3 }
 0x820   : > { %v5299_v0 = vmul.f32 0.25, %v5291_v44  ;;  %v4518_v27 = vsel %vm4517_vm3, %v9418_v48, %v4516_v31  ;;  %v9503_v18 = vmul.f32 0.25, %v5417_v11  ;;  %v5462_v13 = vsel %vm4720_vm11, %v9493_v36, -inf }
 0x821   : > { %v5306_v52 = vadd.f32 0.0001, %v5298_v1  ;;  %v4525_v57 = vsel %vm4524_vm4, %v9409_v3, %v4523_v19  ;;  %vm9958_vm13 = vcmask 130048  }
 0x822   : > { %v5307_v50 = vadd.f32 0.0001, %v5299_v0  ;;  %v4528_v62 = vsel %vm4526_vm0, %v4527_v30, %v4525_v57  ;;  %v5456_v61 = vsel %vm4720_vm11, %v9503_v18, -inf  ;;  %vm9959_vm14 = vmmov %vm9958_vm13 }
 0x823   : > { %7617 = vrcp.f32 %v5306_v52 }
 0x824   : > { %7619 = vrcp.f32 %v5307_v50 }
 0x82d   : > { %4728 = vmax.xlane.f32.xlu0 %v4727_v16  ;;  %v7049_v16 = vpop.f32.mrf.mxu0 }
 0x82e   : > { %4731 = vmax.xlane.f32.xlu1 %v4730_v35  ;;  %v4521_v35 = vsel %vm4519_vm5, %v4520_v41, %v4518_v27  ;;  %v9514_v53 = vmul.f32 0.25, %v7049_v16  ;;  %v5269_v27 = vand.u32 2147483648, %v9422_v55 }
 0x82f   : > { %v4571_v48 = vmul.f32 0.25, %v4521_v35  ;;  %v5430_v26 = vpop.f32.mrf.mxu0 }
 0x830   : > { %v9520_v49 = vmul.f32 0.25, %v5430_v26  ;;  %v5471_v3 = vsel %vm4720_vm11, %v9514_v53, -inf }
 0x831   : > { %4722 = vmax.xlane.f32.xlu0 %v4721_v40  ;;  %v5453_v40 = vsel %vm4720_vm11, %v9499_v2, -inf  ;;  %v4579_v22 = vadd.f32 0.0001, %v4571_v48  ;;  %v7050_v30 = vpop.f32.mrf.mxu0 }
 0x832   : > { %4725 = vmax.xlane.f32.xlu1 %v4724_v63  ;;  %v4572_v63 = vmul.f32 0.25, %v4528_v62  ;;  %v5465_v44 = vsel %vm4720_vm11, %v9520_v49, -inf  ;;  %v9544_v62 = vpop.xlane.xlu0 %5213  ;;  %v9546_v48 = vmul.f32 0.25, %v7050_v30 }
 0x833   : > { %7621 = vrcp.f32 %v4579_v22  ;;  %v5433_v26 = vpop.f32.mrf.mxu0  ;;  %vm5238_vm8 = vcmp.eq.f32.partialorder %v9544_v62, inf  ;;  %vm5240_vm10 = vcmp.eq.f32.partialorder %v9544_v62, 0.0 }
 0x834   : > { %v4580_v9 = vadd.f32 0.0001, %v4572_v63 }
 0x835   : > { %4740 = vmax.xlane.f32.xlu0 %v4739_v21  ;;  %v7618_v21 = vpop.eup %7617 }
 0x836   : > { %4743 = vmax.xlane.f32.xlu1 %v4742_v47  ;;  %7623 = vrcp.f32 %v4580_v9  ;;  %v7620_v39 = vpop.eup %7619  ;;  %v5322_v1 = vmul.f32 %v7618_v21, %v9014_v60 }
 0x837   : > { %v5323_v47 = vmul.f32 %v7620_v39, %v9034_v7  ;;  %7625 = vrsqrt.f32 %v9422_v55 }
 0x838   : > { %7627 = vrsqrt.f32 %v9413_v46 }
 0x839   : > { %4734 = vmax.xlane.f32.xlu0 %v4733_v58  ;;  %v5548_v34 = vpack.c.bf16 %v5323_v47, %v5322_v1 }
 0x83a   : > { %4737 = vmax.xlane.f32.xlu1 %v4736_v25 }
 0x83d   : > { %5460 = vmax.xlane.f32.xlu0 %v5459_v4  ;;  %v5276_v4 = vand.u32 2147483648, %v9413_v46 }
 0x83e   : > { %5463 = vmax.xlane.f32.xlu1 %v5462_v13 }
 0x840   : > { %v7622_v0 = vpop.eup %7621 }
 0x841   : > { %5454 = vmax.xlane.f32.xlu0 %v5453_v40  ;;  %v4595_v58 = vmul.f32 %v7622_v0, %v8978_v12 }
 0x842   : > { %5457 = vmax.xlane.f32.xlu1 %v5456_v61 }
 0x843   : > { %v7624_v31 = vpop.eup %7623 }
 0x844   : > { %v4596_v19 = vmul.f32 %v7624_v31, %v9000_v54  ;;  %v7626_v52 = vpop.eup %7625 }
 0x845   : > { %5472 = vmax.xlane.f32.xlu0 %v5471_v3  ;;  %v7628_v60 = vpop.eup %7627  ;;  %v5265_v7 = vmul.f32 %v7626_v52, %v9422_v55  ;;  %v9552_v3 = vpop.xlane.xlu1 %5216 }
 0x846   : > { %v4813_v11 = vpack.c.bf16 %v4596_v19, %v4595_v58  ;;  %v5272_v25 = vmul.f32 %v7628_v60, %v9413_v46  ;;  %vm5245_vm9 = vcmp.eq.f32.partialorder %v9552_v3, inf  ;;  %vm5247_vm12 = vcmp.eq.f32.partialorder %v9552_v3, 0.0 }
 0x847   : > { %v5267_v50 = vsel %vm5266_vm1, %v9422_v55, %v5265_v7  ;;  %v9548_v55 = vmul.f32 0.25, %v5433_v26 }
 0x848   : > { %v5274_v41 = vsel %vm5273_vm2, %v9413_v46, %v5272_v25  ;;  %v5270_v57 = vsel %vm5268_vm6, %v5269_v27, %v5267_v50  ;;  %v5474_v46 = vsel %vm4720_vm11, %v9546_v48, -inf }
 0x849   : > { %5466 = vmax.xlane.f32.xlu0 %v5465_v44  ;;  %v5277_v16 = vsel %vm5275_vm7, %v5276_v4, %v5274_v41  ;;  %v5296_v13 = vmul.f32 0.25, %v5270_v57  ;;  %v5468_v22 = vsel %vm4720_vm11, %v9548_v55, -inf }
 0x84a   : > { %v5297_v35 = vmul.f32 0.25, %v5277_v16 }
 0x84b   : > { %v5304_v40 = vadd.f32 0.0001, %v5296_v13 }
 0x84c   : > { %v5305_v61 = vadd.f32 0.0001, %v5297_v35 }
 0x84d   : > { %7629 = vrcp.f32 %v5304_v40 }
 0x84e   : > { %7631 = vrcp.f32 %v5305_v61 }
 0x853   : > { %5559 = vrot.lane.b32.xlu1 %v5548_v34, %s7720_s20 }
 0x85a   : > { %v7630_v21 = vpop.eup %7629 }
 0x85b   : > { %v7632_v39 = vpop.eup %7631  ;;  %v5320_v1 = vmul.f32 %v7630_v21, %v9024_v42 }
 0x85c   : > { %v5321_v47 = vmul.f32 %v7632_v39, %v9048_v37 }
 0x85e   : > { %v5547_v34 = vpack.c.bf16 %v5321_v47, %v5320_v1 }
 0x85f   : > { %4821 = vrot.lane.b32.xlu0 %v4813_v11, %s7719_s19 }
 0x874   : > { %v4828_v63 = vpop.permute.xlu0 %4827 }
 0x875   : > { %7019 = vmatprep.subr.bf16.mxu1 %v4828_v63 }
 0x876   : > { %7020 = vmatpush3.bf16.msra.mxu1 %v4828_v63 }
 0x877   : > { %5475 = vmax.xlane.f32.xlu1 %v5474_v46 }
 0x87b   : > { %5469 = vmax.xlane.f32.xlu1 %v5468_v22 }
 0x87c   : > { %v4826_v9 = vpop.permute.xlu1 %4825 }
 0x87d   : > { %7021 = vmatprep.subr.bf16.mxu1 %v4826_v9 }
 0x87e   : > { %7022 = vmatpush3.bf16.msra.mxu1 %v4826_v9 }
 0x880   : > { %v4824_v44 = vpop.permute.xlu0 %4823 }
 0x881   : > { %7023 = vmatprep.subr.bf16.mxu1 %v4824_v44 }
 0x882   : > { %7024 = vmatpush3.bf16.msra.mxu1 %v4824_v44 }
 0x88c   : > { %5557 = vrot.lane.b32.xlu1 %v5547_v34, %s7720_s20 }
 0x8b6   : > { %v4729_v0 = vpop.xlane.xlu0 %4728 }
 0x8b7   : > { %v4747_v31 = vsub.f32 %v9449_v45, %v4729_v0  ;;  %v4732_v58 = vpop.xlane.xlu1 %4731 }
 0x8b8   : > { %v4748_v19 = vsub.f32 %v9451_v17, %v4732_v58 }
 0x8b9   : > { %v4757_v11 = vmul.f32 1.442695, %v4747_v31 }
 0x8ba   : > { %v4759_v52 = vmul.f32 1.442695, %v4748_v19  ;;  %v4723_v60 = vpop.xlane.xlu0 %4722 }
 0x8bb   : > { %7633 = vpow2.f32 %v4757_v11  ;;  %v4745_v7 = vsub.f32 %v9455_v5, %v4723_v60  ;;  %v4726_v25 = vpop.xlane.xlu1 %4725 }
 0x8bc   : > { %7635 = vpow2.f32 %v4759_v52  ;;  %v4746_v42 = vsub.f32 %v9459_v20, %v4726_v25 }
 0x8bd   : > { %v4753_v37 = vmul.f32 1.442695, %v4745_v7 }
 0x8be   : > { %v4755_v50 = vmul.f32 1.442695, %v4746_v42  ;;  %v4741_v27 = vpop.xlane.xlu0 %4740 }
 0x8bf   : > { %7637 = vpow2.f32 %v4753_v37  ;;  %v4751_v41 = vsub.f32 %v9466_v23, %v4741_v27  ;;  %v4744_v45 = vpop.xlane.xlu1 %4743 }
 0x8c0   : > { %7639 = vpow2.f32 %v4755_v50  ;;  %v4752_v17 = vsub.f32 %v9472_v43, %v4744_v45 }
 0x8c1   : > { %v4765_v4 = vmul.f32 1.442695, %v4751_v41 }
 0x8c2   : > { %v4767_v57 = vmul.f32 1.442695, %v4752_v17  ;;  %v4735_v16 = vpop.xlane.xlu0 %4734 }
 0x8c3   : > { %7641 = vpow2.f32 %v4765_v4  ;;  %v4749_v5 = vsub.f32 %v9480_v59, %v4735_v16  ;;  %v4738_v13 = vpop.xlane.xlu1 %4737 }
 0x8c4   : > { %7643 = vpow2.f32 %v4767_v57  ;;  %v4750_v20 = vsub.f32 %v9484_v15, %v4738_v13 }
 0x8c5   : > { %v4761_v30 = vmul.f32 1.442695, %v4749_v5 }
 0x8c6   : > { %v4763_v35 = vmul.f32 1.442695, %v4750_v20  ;;  %v5461_v40 = vpop.xlane.xlu0 %5460 }
 0x8c7   : > { %7645 = vpow2.f32 %v4761_v30  ;;  %v5479_v23 = vsub.f32 %v9489_v38, %v5461_v40  ;;  %v5464_v26 = vpop.xlane.xlu1 %5463 }
 0x8c8   : > { %v9568_v61 = vpop.eup %7633  ;;  %7647 = vpow2.f32 %v4763_v35  ;;  %v5480_v46 = vsub.f32 %v9493_v36, %v5464_v26 }
 0x8c9   : > { %v9570_v43 = vpop.eup %7635  ;;  %v5489_v63 = vmul.f32 1.442695, %v5479_v23  ;;  %v4775_v59 = vsel %vm4720_vm11, %v9568_v61, 0.0 }
 0x8ca   : > { %v5455_v22 = vpop.xlane.xlu0 %5454  ;;  %4776 = vadd.xlane.f32.xlu0 %v4775_v59  ;;  %v4778_v15 = vsel %vm4720_vm11, %v9570_v43, 0.0  ;;  %v5491_v47 = vmul.f32 1.442695, %v5480_v46 }
 0x8cb   : > { %7649 = vpow2.f32 %v5489_v63  ;;  %v5477_v38 = vsub.f32 %v9499_v2, %v5455_v22  ;;  %4779 = vadd.xlane.f32.xlu1 %v4778_v15  ;;  %v5458_v9 = vpop.xlane.xlu1 %5457 }
 0x8cc   : > { %v9578_v44 = vpop.eup %7637  ;;  %v5478_v36 = vsub.f32 %v9503_v18, %v5458_v9 }
 0x8cd   : > { %v9580_v21 = vpop.eup %7639  ;;  %v5485_v39 = vmul.f32 1.442695, %v5477_v38  ;;  %v4769_v1 = vsel %vm4720_vm11, %v9578_v44, 0.0 }
 0x8ce   : > { %v5473_v34 = vpop.xlane.xlu0 %5472  ;;  %4770 = vadd.xlane.f32.xlu0 %v4769_v1  ;;  %v4772_v0 = vsel %vm4720_vm11, %v9580_v21, 0.0  ;;  %v5487_v52 = vmul.f32 1.442695, %v5478_v36  ;;  %v5241_v1 = vand.u32 2147483648, %v9544_v62  ;;  %v5248_v36 = vand.u32 2147483648, %v9552_v3 }
 0x8cf   : > { %7651 = vpow2.f32 %v5485_v39  ;;  %v5483_v2 = vsub.f32 %v9514_v53, %v5473_v34  ;;  %4773 = vadd.xlane.f32.xlu1 %v4772_v0 }
 0x8d0   : > { %v9588_v31 = vpop.eup %7641  ;;  %7653 = vpow2.f32 %v5491_v47 }
 0x8d1   : > { %v9590_v58 = vpop.eup %7643  ;;  %v5497_v19 = vmul.f32 1.442695, %v5483_v2  ;;  %v4787_v11 = vsel %vm4720_vm11, %v9588_v31, 0.0 }
 0x8d2   : > { %v5467_v18 = vpop.xlane.xlu0 %5466  ;;  %4788 = vadd.xlane.f32.xlu0 %v4787_v11  ;;  %v4790_v60 = vsel %vm4720_vm11, %v9590_v58, 0.0 }
 0x8d3   : > { %7655 = vpow2.f32 %v5497_v19  ;;  %v5481_v7 = vsub.f32 %v9520_v49, %v5467_v18  ;;  %4791 = vadd.xlane.f32.xlu1 %v4790_v60  ;;  %v9607_v49 = vpop.permute.xlu1 %5559 }
 0x8d4   : > { %v9597_v53 = vpop.eup %7645  ;;  %7657 = vpow2.f32 %v5487_v52 }
 0x8d5   : > { %v9599_v25 = vpop.eup %7647  ;;  %v5493_v42 = vmul.f32 1.442695, %v5481_v7  ;;  %v4781_v37 = vsel %vm4720_vm11, %v9597_v53, 0.0 }
 0x8d6   : > { %4782 = vadd.xlane.f32.xlu0 %v4781_v37  ;;  %v4822_v50 = vpop.permute.xlu0 %4821  ;;  %v4784_v27 = vsel %vm4720_vm11, %v9599_v25, 0.0 }
 0x8d7   : > { %7659 = vpow2.f32 %v5493_v42  ;;  %7025 = vmatprep.subr.bf16.mxu1 %v4822_v50  ;;  %4785 = vadd.xlane.f32.xlu1 %v4784_v27 }
 0x8d8   : > { %v9605_v41 = vpop.eup %7649  ;;  %7026 = vmatpush3.bf16.msra.mxu1 %v4822_v50  ;;  %7661 = vrsqrt.f32 %v9544_v62 }
 0x8d9   : > { %7051 = vmatprep.subr.bf16.mxu1 %v9607_v49  ;;  %v5507_v45 = vsel %vm4720_vm11, %v9605_v41, 0.0  ;;  %7663 = vrsqrt.f32 %v9552_v3 }
 0x8db   : > { %5508 = vadd.xlane.f32.xlu1 %v5507_v45 }
 0x8dc   : > { %v9612_v17 = vpop.eup %7651 }
 0x8dd   : > { %v5501_v4 = vsel %vm4720_vm11, %v9612_v17, 0.0  ;;  %v9616_v57 = vpop.eup %7653 }
 0x8de   : > { %v5510_v13 = vsel %vm4720_vm11, %v9616_v57, 0.0 }
 0x8df   : > { %5502 = vadd.xlane.f32.xlu1 %v5501_v4 }
 0x8e0   : > { %v9618_v16 = vpop.eup %7655 }
 0x8e1   : > { %v5519_v5 = vsel %vm4720_vm11, %v9618_v16, 0.0  ;;  %v9624_v20 = vpop.eup %7657 }
 0x8e2   : > { %5520 = vadd.xlane.f32.xlu0 %v5519_v5  ;;  %v5504_v40 = vsel %vm4720_vm11, %v9624_v20, 0.0 }
 0x8e3   : > { %5511 = vadd.xlane.f32.xlu1 %v5510_v13 }
 0x8e4   : > { %v9626_v30 = vpop.eup %7659 }
 0x8e5   : > { %v5513_v35 = vsel %vm4720_vm11, %v9626_v30, 0.0  ;;  %v7662_v23 = vpop.eup %7661 }
 0x8e6   : > { %5514 = vadd.xlane.f32.xlu0 %v5513_v35  ;;  %v7664_v26 = vpop.eup %7663  ;;  %v5237_v59 = vmul.f32 %v7662_v23, %v9544_v62 }
 0x8e7   : > { %5505 = vadd.xlane.f32.xlu1 %v5504_v40  ;;  %v5244_v22 = vmul.f32 %v7664_v26, %v9552_v3 }
 0x8e8   : > { %v5239_v9 = vsel %vm5238_vm8, %v9544_v62, %v5237_v59 }
 0x8e9   : > { %v5246_v47 = vsel %vm5245_vm9, %v9552_v3, %v5244_v22  ;;  %v5242_v34 = vsel %vm5240_vm10, %v5241_v1, %v5239_v9 }
 0x8ea   : > { %v5249_v0 = vsel %vm5247_vm12, %v5248_v36, %v5246_v47  ;;  %v5292_v2 = vmul.f32 0.25, %v5242_v34 }
 0x8eb   : > { %v5293_v19 = vmul.f32 0.25, %v5249_v0 }
 0x8ec   : > { %v5300_v11 = vadd.f32 0.0001, %v5292_v2 }
 0x900   : > { %v5476_v63 = vpop.xlane.xlu1 %5475 }
 0x901   : > { %v5484_v46 = vsub.f32 %v9546_v48, %v5476_v63 }
 0x903   : > { %v5499_v15 = vmul.f32 1.442695, %v5484_v46 }
 0x904   : > { %v5470_v38 = vpop.xlane.xlu1 %5469 }
 0x905   : > { %7665 = vpow2.f32 %v5499_v15  ;;  %v5482_v39 = vsub.f32 %v9548_v55, %v5470_v38  ;;  %v5301_v55 = vadd.f32 0.0001, %v5293_v19 }
 0x907   : > { %v5495_v48 = vmul.f32 1.442695, %v5482_v39 }
 0x908   : > { %v5558_v27 = vpop.permute.xlu1 %5557 }
 0x909   : > { %7667 = vpow2.f32 %v5495_v48 }
 0x90a   : > { %7669 = vrcp.f32 %v5300_v11 }
 0x90b   : > { %7671 = vrcp.f32 %v5301_v55 }
 0x912   : > { %v9646_v52 = vpop.eup %7665 }
 0x913   : > { %v5522_v18 = vsel %vm4720_vm11, %v9646_v52, 0.0 }
 0x914   : > { %5523 = vadd.xlane.f32.xlu0 %v5522_v18 }
 0x916   : > { %v9650_v62 = vpop.eup %7667 }
 0x917   : > { %v5516_v60 = vsel %vm4720_vm11, %v9650_v62, 0.0  ;;  %v7670_v3 = vpop.eup %7669 }
 0x918   : > { %5517 = vadd.xlane.f32.xlu1 %v5516_v60  ;;  %v7672_v7 = vpop.eup %7671  ;;  %v5316_v42 = vmul.f32 %v7670_v3, %v8978_v12 }
 0x919   : > { %v5317_v37 = vmul.f32 %v7672_v7, %v9000_v54 }
 0x91b   : > { %v5545_v50 = vpack.c.bf16 %v5317_v37, %v5316_v42 }
 0x929   : > { %5553 = vrot.lane.b32.xlu1 %v5545_v50, %s7720_s20 }
 0x92a   : > { %5555 = vrot.lane.b32.xlu0 %v5546_v10, %s7720_s20 }
 0x953   : > { %v4777_v45 = vpop.xlane.xlu0 %4776 }
 0x954   : > { %v4780_v4 = vpop.xlane.xlu1 %4779  ;;  %7673 = vrcp.f32 %v4777_v45 }
 0x955   : > { %7675 = vrcp.f32 %v4780_v4 }
 0x957   : > { %v4771_v5 = vpop.xlane.xlu0 %4770 }
 0x958   : > { %7677 = vrcp.f32 %v4771_v5  ;;  %v4774_v13 = vpop.xlane.xlu1 %4773 }
 0x959   : > { %7679 = vrcp.f32 %v4774_v13 }
 0x95b   : > { %v4789_v12 = vpop.xlane.xlu0 %4788 }
 0x95c   : > { %v4792_v35 = vpop.xlane.xlu1 %4791  ;;  %7681 = vrcp.f32 %v4789_v12 }
 0x95d   : > { %7683 = vrcp.f32 %v4792_v35 }
 0x95f   : > { %v4783_v54 = vpop.xlane.xlu0 %4782 }
 0x960   : > { %7685 = vrcp.f32 %v4783_v54  ;;  %v4786_v40 = vpop.xlane.xlu1 %4785 }
 0x961   : > { %7687 = vrcp.f32 %v4786_v40  ;;  %v7674_v23 = vpop.eup %7673 }
 0x962   : > { %v7676_v24 = vpop.eup %7675  ;;  %v4803_v63 = vmul.f32 %v7674_v23, %v9568_v61 }
 0x963   : > { %v4804_v59 = vmul.f32 %v7676_v24, %v9570_v43 }
 0x964   : > { %v5509_v28 = vpop.xlane.xlu1 %5508 }
 0x965   : > { %v7678_v10 = vpop.eup %7677  ;;  %v4810_v39 = vpack.c.bf16 %v4804_v59, %v4803_v63 }
 0x966   : > { %v7680_v26 = vpop.eup %7679  ;;  %v4801_v46 = vmul.f32 %v7678_v10, %v9578_v44 }
 0x967   : > { %v4802_v22 = vmul.f32 %v7680_v26, %v9580_v21 }
 0x968   : > { %v5503_v15 = vpop.xlane.xlu1 %5502 }
 0x969   : > { %v4809_v38 = vpack.c.bf16 %v4802_v22, %v4801_v46  ;;  %v7682_v9 = vpop.eup %7681  ;;  %7689 = vrcp.f32 %v5503_v15 }
 0x96a   : > { %v7684_v1 = vpop.eup %7683  ;;  %v4807_v44 = vmul.f32 %v7682_v9, %v9588_v31 }
 0x96b   : > { %7027 = vmatprep.mubr.msk.bf16.mxu1 %vm4720_vm11, %v4809_v38  ;;  %v4808_v21 = vmul.f32 %v7684_v1, %v9590_v58  ;;  %v5521_v58 = vpop.xlane.xlu0 %5520 }
 0x96c   : > { %7028 = vmatmul.mubr.msk.bf16.vlgmr.msra.gmra.mxu1 %vm4720_vm11, %v4810_v39  ;;  %v5512_v47 = vpop.xlane.xlu1 %5511 }
 0x96d   : > { %v7686_v48 = vpop.eup %7685  ;;  %7052 = vmatpush3.bf16.msra.mxu1 %v9607_v49  ;;  %v4812_v2 = vpack.c.bf16 %v4808_v21, %v4807_v44 }
 0x96e   : > { %v7688_v61 = vpop.eup %7687  ;;  %7053 = vmatprep.subr.bf16.mxu1 %v5558_v27  ;;  %v4805_v43 = vmul.f32 %v7686_v48, %v9597_v53 }
 0x96f   : > { %v4806_v36 = vmul.f32 %v7688_v61, %v9599_v25  ;;  %v5515_v25 = vpop.xlane.xlu0 %5514 }
 0x970   : > { %v5506_v34 = vpop.xlane.xlu1 %5505 }
 0x971   : > { %7054 = vmatpush3.bf16.msra.mxu1 %v5558_v27  ;;  %7691 = vrcp.f32 %v5506_v34  ;;  %v4811_v0 = vpack.c.bf16 %v4806_v36, %v4805_v43 }
 0x972   : > { %7693 = vrcp.f32 %v5512_v47 }
 0x973   : > { %7031 = vmatprep.mubr.msk.bf16.mxu1 %vm4720_vm11, %v4811_v0  ;;  %7695 = vrcp.f32 %v5509_v28 }
 0x974   : > { %7032 = vmatmul.mubr.msk.bf16.gmra.mxu1 %vm4720_vm11, %v4812_v2 }
 0x976   : > { %v7690_v49 = vpop.eup %7689 }
 0x977   : > { %v5533_v53 = vmul.f32 %v7690_v49, %v9612_v17 }
 0x97e   : > { %v7692_v19 = vpop.eup %7691 }
 0x97f   : > { %v5534_v31 = vmul.f32 %v7692_v19, %v9624_v20  ;;  %v7694_v18 = vpop.eup %7693 }
 0x980   : > { %v7696_v7 = vpop.eup %7695  ;;  %v5536_v17 = vmul.f32 %v7694_v18, %v9616_v57 }
 0x981   : > { %v5541_v11 = vpack.c.bf16 %v5534_v31, %v5533_v53  ;;  %v5535_v42 = vmul.f32 %v7696_v7, %v9605_v41  ;;  %v7351_v41 = vld [vmem:[%s9740_s6] sm:$0xff]  }
 0x982   : > { %7077 = vmatprep.subr.bf16.mxu0 %v7351_v41 }
 0x983   : > { %7059 = vmatprep.mubr.msk.bf16.mxu1 %vm4720_vm11, %v5541_v11  ;;  %v5542_v37 = vpack.c.bf16 %v5536_v17, %v5535_v42  ;;  %7078 = vmatpush3.bf16.msra.mxu0 %v7351_v41 }
 0x99d   : > { %v5524_v55 = vpop.xlane.xlu0 %5523 }
 0x99e   : > { %7697 = vrcp.f32 %v5524_v55 }
 0x99f   : > { %7699 = vrcp.f32 %v5515_v25 }
 0x9a0   : > { %7701 = vrcp.f32 %v5521_v58 }
 0x9a1   : > { %v5556_v60 = vpop.permute.xlu0 %5555  ;;  %v5518_v3 = vpop.xlane.xlu1 %5517 }
 0x9a2   : > { %7703 = vrcp.f32 %v5518_v3  ;;  %7055 = vmatprep.subr.bf16.mxu1 %v5556_v60 }
 0x9a3   : > { %7056 = vmatpush3.bf16.msra.mxu1 %v5556_v60 }
 0x9a5   : > { %v5554_v20 = vpop.permute.xlu1 %5553 }
 0x9a6   : > { %7057 = vmatprep.subr.bf16.mxu1 %v5554_v20 }
 0x9a7   : > { %7058 = vmatpush3.bf16.msra.mxu1 %v5554_v20 }
 0x9aa   : > { %7060 = vmatmul.mubr.msk.bf16.vlgmr.msra.gmra.mxu1 %vm4720_vm11, %v5542_v37 }
 0x9ab   : > { %v7698_v50 = vpop.eup %7697 }
 0x9ac   : > { %v7700_v27 = vpop.eup %7699  ;;  %v5540_v5 = vmul.f32 %v7698_v50, %v9646_v52 }
 0x9ad   : > { %v7702_v45 = vpop.eup %7701  ;;  %v5537_v13 = vmul.f32 %v7700_v27, %v9626_v30  ;;  %v7352_v30 = vld [vmem:[%s9740_s6 + $0x8] sm:$0xff]  }
 0x9ae   : > { %v5539_v57 = vmul.f32 %v7702_v45, %v9618_v16  ;;  %7067 = vmatprep.subr.bf16.mxu1 %v7352_v30 }
 0x9af   : > { %v7704_v4 = vpop.eup %7703  ;;  %7068 = vmatpush3.bf16.msra.mxu1 %v7352_v30 }
 0x9b0   : > { %v5538_v12 = vmul.f32 %v7704_v4, %v9650_v62  ;;  %v5544_v54 = vpack.c.bf16 %v5540_v5, %v5539_v57 }
 0x9b2   : > { %v5543_v35 = vpack.c.bf16 %v5538_v12, %v5537_v13 }
 0x9b4   : > { %7063 = vmatprep.mubr.msk.bf16.mxu1 %vm4720_vm11, %v5543_v35 }
 0x9b5   : > { %7064 = vmatmul.mubr.msk.bf16.gmra.mxu1 %vm4720_vm11, %v5544_v54  ;;  %vm9960_vm11 = vmmov %vm9958_vm13 }
 0x9b6   : > { %vm9961_vm15 = vmmov %vm9960_vm11 }
 0x9b7   : > { %vm9962_vm3 = vmmov %vm9960_vm11 }
 0x9b8   : > { %vm9963_vm4 = vmmov %vm9962_vm3 }
 0x9b9   : > { %vm9964_vm5 = vmmov %vm9962_vm3 }
 0x9ba   : > { %vm9965_vm0 = vmmov %vm9962_vm3 }
 0xa2c   : > { %v7029_v52 = vpop.f32.mrf.mxu1 }
 0xa2e   : > { %v4879_v16 = vpop.f32.mrf.mxu1 }
 0xa30   : > { %v7030_v62 = vpop.f32.mrf.mxu1 }
 0xa31   : > { %v4913_v24 = vpack.c.bf16 %v7030_v62, %v7029_v52 }
 0xa32   : > { %v4882_v40 = vpop.f32.mrf.mxu1 }
 0xa33   : > { %v4912_v23 = vpack.c.bf16 %v4882_v40, %v4879_v16 }
 0xa34   : > { %v7033_v28 = vpop.f32.mrf.mxu1 }
 0xa35   : > { %7079 = vmatprep.mubr.msk.bf16.mxu0 %vm9958_vm13, %v4912_v23 }
 0xa36   : > { %v4895_v10 = vpop.f32.mrf.mxu1  ;;  %7080 = vmatmul.mubr.msk.bf16.vlgmr.msra.gmra.mxu0 %vm9959_vm14, %v4913_v24 }
 0xa38   : > { %v7034_v26 = vpop.f32.mrf.mxu1 }
 0xa39   : > { %v4915_v46 = vpack.c.bf16 %v7034_v26, %v7033_v28 }
 0xa3a   : > { %v4898_v63 = vpop.f32.mrf.mxu1 }
 0xa3b   : > { %v4914_v59 = vpack.c.bf16 %v4898_v63, %v4895_v10 }
 0xa3d   : > { %7083 = vmatprep.mubr.msk.bf16.mxu0 %vm9960_vm11, %v4914_v59 }
 0xa3e   : > { %7084 = vmatmul.mubr.msk.bf16.gmra.mxu0 %vm9961_vm15, %v4915_v46 }
 0xa6a   : > { %v7061_v22 = vpop.f32.mrf.mxu1 }
 0xa6c   : > { %v5611_v15 = vpop.f32.mrf.mxu1 }
 0xa6e   : > { %v7062_v38 = vpop.f32.mrf.mxu1 }
 0xa6f   : > { %v5646_v1 = vpack.c.bf16 %v7062_v38, %v7061_v22 }
 0xa70   : > { %v5614_v9 = vpop.f32.mrf.mxu1 }
 0xa71   : > { %v5645_v39 = vpack.c.bf16 %v5614_v9, %v5611_v15 }
 0xa73   : > { %7069 = vmatprep.mubr.msk.bf16.mxu1 %vm9962_vm3, %v5645_v39 }
 0xa74   : > { %7070 = vmatmul.mubr.msk.bf16.vlgmr.msra.gmra.mxu1 %vm9963_vm4, %v5646_v1 }
 0xa75   : > { %v7065_v47 = vpop.f32.mrf.mxu1 }
 0xa77   : > { %v5627_v48 = vpop.f32.mrf.mxu1 }
 0xa79   : > { %v7066_v61 = vpop.f32.mrf.mxu1 }
 0xa7a   : > { %v5648_v21 = vpack.c.bf16 %v7066_v61, %v7065_v47 }
 0xa7b   : > { %v5630_v43 = vpop.f32.mrf.mxu1 }
 0xa7c   : > { %v5647_v44 = vpack.c.bf16 %v5630_v43, %v5627_v48 }
 0xa7e   : > { %7073 = vmatprep.mubr.msk.bf16.mxu1 %vm9964_vm5, %v5647_v44 }
 0xa7f   : > { %7074 = vmatmul.mubr.msk.bf16.gmra.mxu1 %vm9965_vm0, %v5648_v21 }
 0xaf6   : > { %v7081_v36 = vpop.f32.mrf.mxu0 }
 0xaf8   : > { %v5784_v34 = vpop.f32.mrf.mxu0 }
 0xafa   : > { %v7082_v0 = vpop.f32.mrf.mxu0 }
 0xafc   : > { %v5787_v49 = vpop.f32.mrf.mxu0 }
 0xafe   : > { %v7085_v25 = vpop.f32.mrf.mxu0 }
 0xb00   : > { %v5800_v37 = vpop.f32.mrf.mxu0 }
 0xb02   : > { %v7086_v54 = vpop.f32.mrf.mxu0 }
 0xb04   : > { %v5803_v26 = vpop.f32.mrf.mxu0 }
 0xb34   : > { %v7071_v2 = vpop.f32.mrf.mxu1 }
 0xb35   : > { %v5793_v19 = vadd.f32 %v7081_v36, %v7071_v2 }
 0xb36   : > { %v5701_v53 = vpop.f32.mrf.mxu1 }
 0xb37   : > { %v5817_v31 = vsub.f32 %v5793_v19, %v8949_v8  ;;  %v5785_v11 = vadd.f32 %v5784_v34, %v5701_v53 }
 0xb38   : > { %v7072_v58 = vpop.f32.mrf.mxu1 }
 0xb39   : > { %v5825_v55 = vmul.f32 0.3, %v5817_v31  ;;  %v5815_v18 = vsub.f32 %v5785_v11, %v8944_v29  ;;  %v5796_v60 = vadd.f32 %v7082_v0, %v7072_v58 }
 0xb3a   : > { %v5704_v3 = vpop.f32.mrf.mxu1 }
 0xb3b   : > { %v5833_v7 = vadd.f32 %v5825_v55, %v8949_v8  ;;  %v5823_v17 = vmul.f32 0.3, %v5815_v18  ;;  %v5818_v20 = vsub.f32 %v5796_v60, %v8942_v6  ;;  %v5788_v42 = vadd.f32 %v5787_v49, %v5704_v3 }
 0xb3d   : > { %v5841_v50 = vmul.f32 1.3130643, %v5833_v7  ;;  %v5831_v27 = vadd.f32 %v5823_v17, %v8944_v29  ;;  %v5826_v45 = vmul.f32 0.3, %v5818_v20  ;;  %v5816_v4 = vsub.f32 %v5788_v42, %v8946_v56 }
 0xb3f   : > { %v6364_v8 = vclamps-f32 %v5841_v50, 256.0  ;;  %v5839_v5 = vmul.f32 1.3130643, %v5831_v27  ;;  %v5834_v13 = vadd.f32 %v5826_v45, %v8942_v6  ;;  %v5824_v12 = vmul.f32 0.3, %v5816_v4  ;;  %v7075_v57 = vpop.f32.mrf.mxu1 }
 0xb40   : > { %v5809_v35 = vadd.f32 %v7085_v25, %v7075_v57 }
 0xb41   : > { %5865 = vst [vmem:[%s9711_s30 + $0x10] sm:$0xff] %v6364_v8  ;;  %v6362_v29 = vclamps-f32 %v5839_v5, 256.0  ;;  %v5842_v41 = vmul.f32 1.3130643, %v5834_v13  ;;  %v5832_v30 = vadd.f32 %v5824_v12, %v8946_v56  ;;  %v5717_v52 = vpop.f32.mrf.mxu1 }
 0xb42   : > { %v5821_v16 = vsub.f32 %v5809_v35, %v8966_v33  ;;  %v5801_v62 = vadd.f32 %v5800_v37, %v5717_v52 }
 0xb43   : > { %5863 = vst [vmem:[%s9711_s30] sm:$0xff] %v6362_v29  ;;  %v6365_v40 = vclamps-f32 %v5842_v41, 256.0  ;;  %v5840_v23 = vmul.f32 1.3130643, %v5832_v30  ;;  %v7076_v24 = vpop.f32.mrf.mxu1 }
 0xb44   : > { %v5829_v6 = vmul.f32 0.3, %v5821_v16  ;;  %v5819_v28 = vsub.f32 %v5801_v62, %v8962_v51  ;;  %v5812_v10 = vadd.f32 %v7086_v54, %v7076_v24 }
 0xb45   : > { %5866 = vst [vmem:[%s9711_s30 + $0x18] sm:$0xff] %v6365_v40  ;;  %v6363_v63 = vclamps-f32 %v5840_v23, 256.0  ;;  %v5720_v59 = vpop.f32.mrf.mxu1 }
 0xb46   : > { %v5837_v56 = vadd.f32 %v5829_v6, %v8966_v33  ;;  %v5827_v46 = vmul.f32 0.3, %v5819_v28  ;;  %v5822_v22 = vsub.f32 %v5812_v10, %v8960_v32  ;;  %v5804_v15 = vadd.f32 %v5803_v26, %v5720_v59 }
 0xb47   : > { %5864 = vst [vmem:[%s9711_s30 + $0x8] sm:$0xff] %v6363_v63 }
 0xb48   : > { %v5845_v38 = vmul.f32 1.3130643, %v5837_v56  ;;  %v5835_v9 = vadd.f32 %v5827_v46, %v8962_v51  ;;  %v5830_v39 = vmul.f32 0.3, %v5822_v22  ;;  %v5820_v1 = vsub.f32 %v5804_v15, %v8964_v14 }
 0xb4a   : > { %v6368_v47 = vclamps-f32 %v5845_v38, 256.0  ;;  %v5843_v48 = vmul.f32 1.3130643, %v5835_v9  ;;  %v5838_v61 = vadd.f32 %v5830_v39, %v8960_v32  ;;  %v5828_v43 = vmul.f32 0.3, %v5820_v1 }
 0xb4c   : > { %5869 = vst [vmem:[%s9711_s30 + $0x30] sm:$0xff] %v6368_v47  ;;  %v6366_v33 = vclamps-f32 %v5843_v48, 256.0  ;;  %v5846_v44 = vmul.f32 1.3130643, %v5838_v61  ;;  %v5836_v21 = vadd.f32 %v5828_v43, %v8964_v14 }
 0xb4e   : > { %5867 = vst [vmem:[%s9711_s30 + $0x20] sm:$0xff] %v6366_v33  ;;  %v6369_v36 = vclamps-f32 %v5846_v44, 256.0  ;;  %v5844_v34 = vmul.f32 1.3130643, %v5836_v21 }
 0xb50   : > { %5870 = vst [vmem:[%s9711_s30 + $0x38] sm:$0xff] %v6369_v36  ;;  %v6367_v0 = vclamps-f32 %v5844_v34, 256.0 }
 0xb52   : > { %5868 = vst [vmem:[%s9711_s30 + $0x28] sm:$0xff] %v6367_v0 }
 0xb53 PF: > { %s17_s24 = sadd.s32 1, %s7712_s24  }
 0xb54   : > { %p14_p4 = scmp.ge.s32.totalorder %s17_s24, 4  }
 0xb56   :  { %16 = sbr.rel (!%p14_p4) target bundleno = 1 (0x1), region = 82 }

</bundles_post_ra>
